<compile_context>
chip_gen: v7x
topology: tpu7x:2x2x1
jax: 0.10.0
libtpu: 0.0.40
codegen_flags: <defaults>
</compile_context>

<pallas_src>
import functools

import jax
import jax.numpy as jnp
from jax import lax
from jax.experimental import pallas as pl
from jax.experimental.pallas import tpu as pltpu


def _round_up(x, m):
    return (x + m - 1) // m * m


# ----------------------------------------------------------------------------
# Fused kernel: one (batch, band-group, band) tile per grid step.
# ----------------------------------------------------------------------------
def fused_basic_block_kernel(
    # inputs
    x_hbm,        # (N, (Hr+4d)*Wp, Cp) mm_dtype   padded input, HBM (pl.ANY)
    w1_ref,       # (3, 3, Cp, Cp) mm_dtype        conv1 weights (ky, kx, I, O)
    w2_ref,       # (3, 3, Cp, Cp) mm_dtype        conv2 weights
    bn_ref,       # (4, Cp) f32                    [scale1, bias1, scale2, bias2]
    aux_ref,      # ((R+2d)*Wp, 1) int32           mid row index / halo sentinel
    # output
    o_ref,        # (1, R*Wp, Cp)
    # scratch
    x_band,       # VMEM (2, (R+4d)*Wp + 2d, Cp) mm_dtype   double-buffered band
    mid_ref,      # VMEM ((R+2d)*Wp + 2d, Cp) mm_dtype      conv1 output (w/ halo)
    dma_sem,      # DMA semaphores (2,)
    *, H, W, R, d, inner_bands):
    n = pl.program_id(0)
    o = pl.program_id(1)
    i = pl.program_id(2)

    cp = w1_ref.shape[-1]
    Wp = W + 4 * d
    flat_in = (R + 4 * d) * Wp            # band rows needed (flattened)
    flat_mid = (R + 2 * d) * Wp           # conv1-output rows (flattened)

    band = o * inner_bands + i            # global band index
    slot = i % 2

    def band_copy(band_idx, s):
        return pltpu.make_async_copy(
            x_hbm.at[n, pl.ds(band_idx * (R * Wp), flat_in)],
            x_band.at[s, pl.ds(0, flat_in)],
            dma_sem.at[s])

    # Prime the pipeline at the start of each band sequence; for later steps
    # the DMA for this band was already started by the previous grid step.
    @pl.when(i == 0)
    def _():
        band_copy(band, slot).start()

    # Prefetch the next band into the other slot; it overlaps both convs.
    if inner_bands > 1:
        @pl.when(i + 1 < inner_bands)
        def _():
            band_copy(band + 1, 1 - slot).start()

    band_copy(band, slot).wait()

    # ---- conv1 + bn1 + relu : 9 shifted 2-D matmuls, f32 accumulation ------
    acc1 = None
    for ky in range(3):
        for kx in range(3):
            s0 = ky * d * Wp + kx * d
            lhs = x_band[slot, s0:s0 + flat_mid, :]
            p = jnp.dot(lhs, w1_ref[ky, kx], preferred_element_type=jnp.float32)
            acc1 = p if acc1 is None else acc1 + p

    mid = jnp.maximum(acc1 * bn_ref[0:1, :] + bn_ref[1:2, :], 0.0)

    # conv2 zero-pads *its* input (the conv1 output): positions of `mid` that
    # fall outside the real H x W image must be zero.  aux holds the mid-row
    # index for in-image columns and a large negative sentinel for halo /
    # wrap columns, so a single row-range test covers both row and column
    # validity.
    img_row = aux_ref[...] + (band * R - d)                 # ((R+2d)*Wp, 1)
    valid = (img_row >= 0) & (img_row < H)
    mid = jnp.where(valid, mid, 0.0)

    mid_ref[0:flat_mid, :] = mid.astype(mid_ref.dtype)
    mid_ref[flat_mid:flat_mid + 2 * d, :] = jnp.zeros((2 * d, cp),
                                                      mid_ref.dtype)

    # ---- conv2 + bn2 + residual + relu --------------------------------------
    acc2 = None
    for ky in range(3):
        for kx in range(3):
            s0 = ky * d * Wp + kx * d
            lhs = mid_ref[s0:s0 + R * Wp, :]
            p = jnp.dot(lhs, w2_ref[ky, kx], preferred_element_type=jnp.float32)
            acc2 = p if acc2 is None else acc2 + p

    rs = 2 * d * Wp + 2 * d
    residual = x_band[slot, rs:rs + R * Wp, :].astype(jnp.float32)
    y = jnp.maximum(acc2 * bn_ref[2:3, :] + bn_ref[3:4, :] + residual, 0.0)
    o_ref[0] = y.astype(o_ref.dtype)


# ----------------------------------------------------------------------------
# Sizing helpers (generation aware).
# ----------------------------------------------------------------------------
def _vmem_limit_bytes():
    try:
        cap = int(pltpu.get_tpu_info().vmem_capacity_bytes)
    except Exception:
        cap = 64 * 1024 * 1024            # conservative: v7x per-TC VMEM
    return int(max(min(cap * 3 // 4, 96 * 1024 * 1024), 32 * 1024 * 1024))


def _scratch_bytes_est(R, W, cp, d, out_itemsize):
    Wp = W + 4 * d
    flat_in = (R + 4 * d) * Wp
    flat_mid = (R + 2 * d) * Wp
    band = 2 * (flat_in + 2 * d) * cp * 2          # double-buffered bf16 band
    mid = (flat_mid + 2 * d) * cp * 2              # bf16 conv1 output
    outb = 2 * R * Wp * cp * out_itemsize          # double-buffered out block
    aux = 2 * flat_mid * 128 * 4                   # (X,1) block padded to lanes
    acc = (flat_mid + R * Wp) * cp * 4             # f32 accumulators
    return band + mid + outb + aux + 2 * acc


def _pick_band_rows(N, H, W, cp, d, budget_bytes, out_itemsize):
    h_cap = min(_round_up(H, 8), 256)
    best = 8
    r = 8
    while r <= h_cap:
        nb = -(-H // r)
        # Keep at least 2 grid steps when N == 1 (feeds megacore / v7x).
        ok_grid = (N >= 2) or (nb >= 2) or (H <= 8)
        if ok_grid and _scratch_bytes_est(r, W, cp, d, out_itemsize) <= budget_bytes:
            best = r
        r += 8
    return best


# ----------------------------------------------------------------------------
# Wrapper (NCHW in / NCHW out, matching the PyTorch module).
# ----------------------------------------------------------------------------
def basic_block_forward(x_nchw, params, dilation=1, band_rows=None,
                        mm_dtype=jnp.bfloat16):
    # TODO(synk): stride>1 and a learned downsample branch are not implemented
    # (module defaults: stride=1, downsample=None, i.e. inplanes == planes).
    N, C, H, W = x_nchw.shape
    d = int(dilation)
    cp = params["w1"].shape[-1]
    assert cp % 128 == 0 and params["w1"].shape == (3, 3, cp, cp)
    assert C <= cp

    out_itemsize = jnp.dtype(x_nchw.dtype).itemsize
    limit = _vmem_limit_bytes()
    wbytes = 2 * (2 * 9 * cp * cp * 2 + 4 * cp * 4)
    budget = max(limit - wbytes - 8 * 1024 * 1024, 4 * 1024 * 1024)

    if band_rows is None:
        R = _pick_band_rows(N, H, W, cp, d, budget, out_itemsize)
    else:
        R = min(max(8, _round_up(int(band_rows), 8)), _round_up(H, 8))

    Hr = _round_up(H, R)
    num_bands = Hr // R
    # Split bands into (groups, inner) so v7x's 2 TensorCores both get work
    # for N == 1, while the DMA prefetch chain stays within one core's
    # sequential (inner) axis.
    if N == 1 and num_bands >= 4 and num_bands % 2 == 0:
        ob = 2
    else:
        ob = 1
    ib = num_bands // ob

    Wp = W + 4 * d
    flat_in = (R + 4 * d) * Wp
    flat_mid = (R + 2 * d) * Wp

    # NCHW -> NHWC (channels on lanes), bf16 band, pad halo/rows/channels,
    # flatten (rows, cols) so the kernel sees one contiguous flat-row axis.
    # TODO(synk): keeping NHWC (and bf16) between blocks would remove the
    # transpose round trips for a full network.
    x = jnp.transpose(x_nchw, (0, 2, 3, 1)).astype(mm_dtype)
    x_pad = jnp.pad(
        x, ((0, 0), (2 * d, 2 * d + (Hr - H)), (2 * d, 2 * d), (0, cp - C)))
    x_flat = x_pad.reshape(N, (Hr + 4 * d) * Wp, cp)

    # mid-row index per flat position; sentinel for halo / wrap columns.
    q = jnp.arange(flat_mid, dtype=jnp.int32) % Wp
    m = jnp.arange(flat_mid, dtype=jnp.int32) // Wp
    col_ok = (q >= d) & (q < W + d)
    aux = jnp.where(col_ok, m, jnp.int32(-(2 ** 24))).reshape(flat_mid, 1)

    kernel = functools.partial(
        fused_basic_block_kernel, H=H, W=W, R=R, d=d, inner_bands=ib)

    flops = 2 * 9 * cp * cp * N * num_bands * (flat_mid + R * Wp)
    bytes_accessed = (N * num_bands * flat_in * cp * 2
                      + N * Hr * Wp * cp * out_itemsize
                      + 2 * 9 * cp * cp * 2 + 4 * cp * 4 + flat_mid * 4)

    # TODO(synk): single-buffer the constant w1/w2/bn operands
    # (pipeline_mode=pl.Buffered(1)) to save VMEM for very wide layers.
    out = pl.pallas_call(
        kernel,
        grid=(N, ob, ib),
        in_specs=[
            pl.BlockSpec(memory_space=pl.ANY),                           # x
            pl.BlockSpec((3, 3, cp, cp), lambda n, o, i: (0, 0, 0, 0)),  # w1
            pl.BlockSpec((3, 3, cp, cp), lambda n, o, i: (0, 0, 0, 0)),  # w2
            pl.BlockSpec((4, cp), lambda n, o, i: (0, 0)),               # bn
            pl.BlockSpec((flat_mid, 1), lambda n, o, i: (0, 0)),         # aux
        ],
        out_specs=pl.BlockSpec((1, R * Wp, cp),
                               lambda n, o, i: (n, o * ib + i, 0)),
        out_shape=jax.ShapeDtypeStruct((N, Hr * Wp, cp), x_nchw.dtype),
        scratch_shapes=[
            pltpu.VMEM((2, flat_in + 2 * d, cp), mm_dtype),
            pltpu.VMEM((flat_mid + 2 * d, cp), mm_dtype),
            pltpu.SemaphoreType.DMA((2,)),
        ],
        compiler_params=pltpu.CompilerParams(
            dimension_semantics=("parallel", "parallel", "arbitrary"),
            vmem_limit_bytes=limit),
        cost_estimate=pl.CostEstimate(
            flops=flops, transcendentals=0, bytes_accessed=bytes_accessed),
    )(x_flat, params["w1"], params["w2"], params["bn"], aux)

    out = out.reshape(N, Hr, Wp, cp)[:, :H, :W, :C]
    return jnp.transpose(out, (0, 3, 1, 2))


# ----------------------------------------------------------------------------
# Parameter construction (BN folded to inference scale/bias) + JAX reference.
# ----------------------------------------------------------------------------
def make_basic_block_params(key, inplanes, planes, dtype=jnp.float32, eps=1e-5,
                            mm_dtype=jnp.bfloat16):
    assert inplanes == planes, "downsample=None requires inplanes == planes"
    ks = jax.random.split(key, 8)
    w1 = 0.1 * jax.random.normal(ks[0], (planes, inplanes, 3, 3), dtype)
    w2 = 0.1 * jax.random.normal(ks[1], (planes, planes, 3, 3), dtype)
    g1 = 1.0 + 0.1 * jax.random.normal(ks[2], (planes,), dtype)
    b1 = 0.1 * jax.random.normal(ks[3], (planes,), dtype)
    m1 = 0.05 * jax.random.normal(ks[4], (planes,), dtype)
    v1 = jnp.abs(1.0 + 0.1 * jax.random.normal(ks[5], (planes,), dtype))
    g2 = 1.0 + 0.1 * jax.random.normal(ks[6], (planes,), dtype)
    b2 = 0.1 * jax.random.normal(ks[7], (planes,), dtype)
    m2 = jnp.zeros((planes,), dtype)
    v2 = jnp.ones((planes,), dtype)

    raw = dict(w1=w1, w2=w2, g1=g1, b1=b1, m1=m1, v1=v1,
               g2=g2, b2=b2, m2=m2, v2=v2, eps=eps)

    scale1 = (g1 / jnp.sqrt(v1 + eps)).astype(jnp.float32)
    bias1 = (b1.astype(jnp.float32) - m1.astype(jnp.float32) * scale1)
    scale2 = (g2 / jnp.sqrt(v2 + eps)).astype(jnp.float32)
    bias2 = (b2.astype(jnp.float32) - m2.astype(jnp.float32) * scale2)

    cp = _round_up(planes, 128)

    def prep_w(w):
        # OIHW -> HWIO, pad in/out channels to Cp, keep (ky, kx) separate.
        w_hwio = jnp.transpose(w, (2, 3, 1, 0))
        w_hwio = jnp.pad(w_hwio, ((0, 0), (0, 0),
                                  (0, cp - w_hwio.shape[2]),
                                  (0, cp - w_hwio.shape[3])))
        return w_hwio.astype(mm_dtype)

    def prep_v(v):
        return jnp.pad(v.astype(jnp.float32), (0, cp - v.shape[0]))

    bn = jnp.stack([prep_v(scale1), prep_v(bias1),
                    prep_v(scale2), prep_v(bias2)], axis=0)
    return dict(w1=prep_w(w1), w2=prep_w(w2), bn=bn, raw=raw)


def basic_block_reference(x_nchw, raw, dilation=1):
    d = int(dilation)

    def conv(x, w):
        return lax.conv_general_dilated(
            x, w, window_strides=(1, 1), padding=((d, d), (d, d)),
            rhs_dilation=(d, d),
            dimension_numbers=("NCHW", "OIHW", "NCHW"))

    def bn(x, g, b, m, v):
        s = g / jnp.sqrt(v + raw["eps"])
        return x * s[None, :, None, None] + (b - m * s)[None, :, None, None]

    out = jnp.maximum(bn(conv(x_nchw, raw["w1"]),
                         raw["g1"], raw["b1"], raw["m1"], raw["v1"]), 0.0)
    out = bn(conv(out, raw["w2"]), raw["g2"], raw["b2"], raw["m2"], raw["v2"])
    return jnp.maximum(out + x_nchw, 0.0)


if __name__ == "__main__":
    key = jax.random.PRNGKey(0)
    kx_, kp = jax.random.split(key)

    N, C, H, W = 2, 4, 16, 16          # inplanes = planes = 4
    x = jax.random.normal(kx_, (N, C, H, W), jnp.float32)
    params = make_basic_block_params(kp, inplanes=C, planes=C)
    kparams = {k: v for k, v in params.items() if k != "raw"}

    # Run 1: dilation=1, two row bands per image -> exercises the manual
    # double-buffered DMA chain (prime at band 0, prefetch of band 1).
    fwd = jax.jit(functools.partial(basic_block_forward,
                                    dilation=1, band_rows=8))
    out = fwd(x, kparams)
    jax.block_until_ready(out)
    assert out.shape == (N, C, H, W)
    ref = basic_block_reference(x, params["raw"], dilation=1)
    err = float(jnp.max(jnp.abs(out - ref)))
    assert err < 6e-2, f"dilation=1: max abs error vs reference too large: {err}"

    # Run 2: dilation=2, N=1, auto band size -> exercises the d>1 halo math
    # and the N==1 band-splitting heuristic.
    x1 = x[:1]
    fwd2 = jax.jit(functools.partial(basic_block_forward, dilation=2))
    out2 = fwd2(x1, kparams)
    jax.block_until_ready(out2)
    ref2 = basic_block_reference(x1, params["raw"], dilation=2)
    err2 = float(jnp.max(jnp.abs(out2 - ref2)))
    assert err2 < 6e-2, f"dilation=2: max abs error vs reference too large: {err2}"

    print("KERNEL_OK")
</pallas_src>

<mosaic_0001>
module attributes {stable_mosaic.version = 11 : i64} {
  func.func @fused_basic_block_kernel(%arg0: i32, %arg1: i32, %arg2: i32, %arg3: memref<2x400x128xbf16, #tpu.memory_space<any>>, %arg4: memref<3x3x128x128xbf16, #tpu.memory_space<vmem>>, %arg5: memref<3x3x128x128xbf16, #tpu.memory_space<vmem>>, %arg6: memref<4x128xf32, #tpu.memory_space<vmem>>, %arg7: memref<200x1xi32, #tpu.memory_space<vmem>>, %arg8: memref<1x160x128xf32, #tpu.memory_space<vmem>>, %arg9: memref<2x242x128xbf16, #tpu.memory_space<vmem>>, %arg10: memref<202x128xbf16, #tpu.memory_space<vmem>>, %arg11: memref<2x!tpu.dma_semaphore, #tpu.memory_space<semaphore_mem>>) attributes {dimension_semantics = [#tpu.dimension_semantics<parallel>, #tpu.dimension_semantics<parallel>, #tpu.dimension_semantics<arbitrary>], iteration_bounds = array<i64: 2, 1, 2>, scalar_prefetch = 0 : i64, scratch_operands = 3 : i64, tpu.core_type = #tpu.core_type<tc>, window_params = [{}, {pipeline_mode = #tpu.pipeline_mode<synchronous>, transform_indices = @transform_1, window_bounds = array<i64: 3, 3, 128, 128>}, {pipeline_mode = #tpu.pipeline_mode<synchronous>, transform_indices = @transform_2, window_bounds = array<i64: 3, 3, 128, 128>}, {pipeline_mode = #tpu.pipeline_mode<synchronous>, transform_indices = @transform_3, window_bounds = array<i64: 4, 128>}, {pipeline_mode = #tpu.pipeline_mode<synchronous>, transform_indices = @transform_4, window_bounds = array<i64: 200, 1>}, {transform_indices = @transform_5, window_bounds = array<i64: 1, 160, 128>}]} {
    %c2_i32 = arith.constant 2 : i32
    %0 = arith.muli %arg1, %c2_i32 : i32
    %1 = arith.addi %0, %arg2 : i32
    %c2_i32_0 = arith.constant 2 : i32
    %c0_i32 = arith.constant 0 : i32
    %2 = arith.cmpi eq, %c2_i32_0, %c0_i32 : i32
    %c1_i32 = arith.constant 1 : i32
    %3 = arith.select %2, %c1_i32, %c2_i32_0 : i32
    %4 = arith.remsi %arg2, %3 : i32
    %c0_i32_1 = arith.constant 0 : i32
    %5 = arith.cmpi ne, %4, %c0_i32_1 : i32
    %c0_i32_2 = arith.constant 0 : i32
    %6 = arith.cmpi slt, %4, %c0_i32_2 : i32
    %c0_i32_3 = arith.constant 0 : i32
    %7 = arith.cmpi slt, %3, %c0_i32_3 : i32
    %8 = arith.xori %6, %7 : i1
    %9 = arith.andi %8, %5 : i1
    %10 = arith.addi %4, %3 : i32
    %11 = arith.select %9, %10, %4 : i32
    %c0_i32_4 = arith.constant 0 : i32
    %12 = arith.cmpi eq, %arg2, %c0_i32_4 : i32
    %13 = arith.extui %12 : i1 to i32
    %c0_i32_5 = arith.constant 0 : i32
    %14 = arith.cmpi ne, %13, %c0_i32_5 : i32
    scf.if %14 {
      %c160_i32_151 = arith.constant 160 : i32
      %174 = arith.muli %1, %c160_i32_151 : i32
      %c0_i32_152 = arith.constant 0 : i32
      %175 = tpu.memref_slice %arg3[%arg0, %174, %c0_i32_152] : memref<2x400x128xbf16, #tpu.memory_space<any>> -> memref<1x240x128xbf16, #tpu.memory_space<any>>
      %176 = tpu.memref_squeeze %175 : memref<1x240x128xbf16, #tpu.memory_space<any>> -> memref<240x128xbf16, #tpu.memory_space<any>>
      %c0_i32_153 = arith.constant 0 : i32
      %c0_i32_154 = arith.constant 0 : i32
      %177 = tpu.memref_slice %arg9[%11, %c0_i32_153, %c0_i32_154] : memref<2x242x128xbf16, #tpu.memory_space<vmem>> -> memref<1x240x128xbf16, #tpu.memory_space<vmem>>
      %178 = tpu.memref_squeeze %177 : memref<1x240x128xbf16, #tpu.memory_space<vmem>> -> memref<240x128xbf16, #tpu.memory_space<vmem>>
      %179 = tpu.memref_slice %arg11[%11] : memref<2x!tpu.dma_semaphore, #tpu.memory_space<semaphore_mem>> -> memref<1x!tpu.dma_semaphore, #tpu.memory_space<semaphore_mem>>
      %180 = tpu.memref_squeeze %179 : memref<1x!tpu.dma_semaphore, #tpu.memory_space<semaphore_mem>> -> memref<!tpu.dma_semaphore, #tpu.memory_space<semaphore_mem>>
      tpu.enqueue_dma source(%176 : memref<240x128xbf16, #tpu.memory_space<any>>) target(%178 : memref<240x128xbf16, #tpu.memory_space<vmem>>) target_semaphore(%180 : memref<!tpu.dma_semaphore, #tpu.memory_space<semaphore_mem>>)
    } else {
    }
    %c1_i32_6 = arith.constant 1 : i32
    %15 = arith.addi %arg2, %c1_i32_6 : i32
    %c2_i32_7 = arith.constant 2 : i32
    %16 = arith.cmpi slt, %15, %c2_i32_7 : i32
    %17 = arith.extui %16 : i1 to i32
    %c0_i32_8 = arith.constant 0 : i32
    %18 = arith.cmpi ne, %17, %c0_i32_8 : i32
    scf.if %18 {
      %c1_i32_151 = arith.constant 1 : i32
      %174 = arith.addi %1, %c1_i32_151 : i32
      %c1_i32_152 = arith.constant 1 : i32
      %175 = arith.subi %c1_i32_152, %11 : i32
      %c160_i32_153 = arith.constant 160 : i32
      %176 = arith.muli %174, %c160_i32_153 : i32
      %c0_i32_154 = arith.constant 0 : i32
      %177 = tpu.memref_slice %arg3[%arg0, %176, %c0_i32_154] : memref<2x400x128xbf16, #tpu.memory_space<any>> -> memref<1x240x128xbf16, #tpu.memory_space<any>>
      %178 = tpu.memref_squeeze %177 : memref<1x240x128xbf16, #tpu.memory_space<any>> -> memref<240x128xbf16, #tpu.memory_space<any>>
      %c0_i32_155 = arith.constant 0 : i32
      %c0_i32_156 = arith.constant 0 : i32
      %179 = tpu.memref_slice %arg9[%175, %c0_i32_155, %c0_i32_156] : memref<2x242x128xbf16, #tpu.memory_space<vmem>> -> memref<1x240x128xbf16, #tpu.memory_space<vmem>>
      %180 = tpu.memref_squeeze %179 : memref<1x240x128xbf16, #tpu.memory_space<vmem>> -> memref<240x128xbf16, #tpu.memory_space<vmem>>
      %181 = tpu.memref_slice %arg11[%175] : memref<2x!tpu.dma_semaphore, #tpu.memory_space<semaphore_mem>> -> memref<1x!tpu.dma_semaphore, #tpu.memory_space<semaphore_mem>>
      %182 = tpu.memref_squeeze %181 : memref<1x!tpu.dma_semaphore, #tpu.memory_space<semaphore_mem>> -> memref<!tpu.dma_semaphore, #tpu.memory_space<semaphore_mem>>
      tpu.enqueue_dma source(%178 : memref<240x128xbf16, #tpu.memory_space<any>>) target(%180 : memref<240x128xbf16, #tpu.memory_space<vmem>>) target_semaphore(%182 : memref<!tpu.dma_semaphore, #tpu.memory_space<semaphore_mem>>)
    } else {
    }
    %c160_i32 = arith.constant 160 : i32
    %19 = arith.muli %1, %c160_i32 : i32
    %c0_i32_9 = arith.constant 0 : i32
    %20 = tpu.memref_slice %arg3[%arg0, %19, %c0_i32_9] : memref<2x400x128xbf16, #tpu.memory_space<any>> -> memref<1x240x128xbf16, #tpu.memory_space<any>>
    %21 = tpu.memref_squeeze %20 : memref<1x240x128xbf16, #tpu.memory_space<any>> -> memref<240x128xbf16, #tpu.memory_space<any>>
    %c0_i32_10 = arith.constant 0 : i32
    %c0_i32_11 = arith.constant 0 : i32
    %22 = tpu.memref_slice %arg9[%11, %c0_i32_10, %c0_i32_11] : memref<2x242x128xbf16, #tpu.memory_space<vmem>> -> memref<1x240x128xbf16, #tpu.memory_space<vmem>>
    %23 = tpu.memref_squeeze %22 : memref<1x240x128xbf16, #tpu.memory_space<vmem>> -> memref<240x128xbf16, #tpu.memory_space<vmem>>
    %24 = tpu.memref_slice %arg11[%11] : memref<2x!tpu.dma_semaphore, #tpu.memory_space<semaphore_mem>> -> memref<1x!tpu.dma_semaphore, #tpu.memory_space<semaphore_mem>>
    %25 = tpu.memref_squeeze %24 : memref<1x!tpu.dma_semaphore, #tpu.memory_space<semaphore_mem>> -> memref<!tpu.dma_semaphore, #tpu.memory_space<semaphore_mem>>
    tpu.wait_dma2 semaphore(%25 : memref<!tpu.dma_semaphore, #tpu.memory_space<semaphore_mem>>) src(%21 : memref<240x128xbf16, #tpu.memory_space<any>>) dst(%23 : memref<240x128xbf16, #tpu.memory_space<vmem>>)
    %26 = arith.index_cast %11 : i32 to index
    %c0 = arith.constant 0 : index
    %c0_12 = arith.constant 0 : index
    %27 = vector.load %arg9[%26, %c0, %c0_12] : memref<2x242x128xbf16, #tpu.memory_space<vmem>>, vector<1x200x128xbf16>
    %28 = vector.shape_cast %27 : vector<1x200x128xbf16> to vector<200x128xbf16>
    %c0_13 = arith.constant 0 : index
    %c0_14 = arith.constant 0 : index
    %c0_15 = arith.constant 0 : index
    %c0_16 = arith.constant 0 : index
    %29 = vector.load %arg4[%c0_13, %c0_14, %c0_15, %c0_16] : memref<3x3x128x128xbf16, #tpu.memory_space<vmem>>, vector<1x1x128x128xbf16>
    %30 = vector.shape_cast %29 : vector<1x1x128x128xbf16> to vector<128x128xbf16>
    %cst = arith.constant dense<0.000000e+00> : vector<200x128xf32>
    %31 = tpu.matmul %28, %30, %cst {dimension_numbers = #tpu.dot_dimension_numbers<[1], [0], [0], [1], [0, 0, 1, 1], [], []>} : vector<200x128xbf16>, vector<128x128xbf16>, vector<200x128xf32> -> vector<200x128xf32>
    %32 = arith.index_cast %11 : i32 to index
    %c1 = arith.constant 1 : index
    %c0_17 = arith.constant 0 : index
    %33 = vector.load %arg9[%32, %c1, %c0_17] : memref<2x242x128xbf16, #tpu.memory_space<vmem>>, vector<1x200x128xbf16>
    %34 = vector.shape_cast %33 : vector<1x200x128xbf16> to vector<200x128xbf16>
    %c0_18 = arith.constant 0 : index
    %c1_19 = arith.constant 1 : index
    %c0_20 = arith.constant 0 : index
    %c0_21 = arith.constant 0 : index
    %35 = vector.load %arg4[%c0_18, %c1_19, %c0_20, %c0_21] : memref<3x3x128x128xbf16, #tpu.memory_space<vmem>>, vector<1x1x128x128xbf16>
    %36 = vector.shape_cast %35 : vector<1x1x128x128xbf16> to vector<128x128xbf16>
    %cst_22 = arith.constant dense<0.000000e+00> : vector<200x128xf32>
    %37 = tpu.matmul %34, %36, %cst_22 {dimension_numbers = #tpu.dot_dimension_numbers<[1], [0], [0], [1], [0, 0, 1, 1], [], []>} : vector<200x128xbf16>, vector<128x128xbf16>, vector<200x128xf32> -> vector<200x128xf32>
    %38 = arith.addf %31, %37 : vector<200x128xf32>
    %39 = arith.index_cast %11 : i32 to index
    %c2 = arith.constant 2 : index
    %c0_23 = arith.constant 0 : index
    %40 = vector.load %arg9[%39, %c2, %c0_23] : memref<2x242x128xbf16, #tpu.memory_space<vmem>>, vector<1x200x128xbf16>
    %41 = vector.shape_cast %40 : vector<1x200x128xbf16> to vector<200x128xbf16>
    %c0_24 = arith.constant 0 : index
    %c2_25 = arith.constant 2 : index
    %c0_26 = arith.constant 0 : index
    %c0_27 = arith.constant 0 : index
    %42 = vector.load %arg4[%c0_24, %c2_25, %c0_26, %c0_27] : memref<3x3x128x128xbf16, #tpu.memory_space<vmem>>, vector<1x1x128x128xbf16>
    %43 = vector.shape_cast %42 : vector<1x1x128x128xbf16> to vector<128x128xbf16>
    %cst_28 = arith.constant dense<0.000000e+00> : vector<200x128xf32>
    %44 = tpu.matmul %41, %43, %cst_28 {dimension_numbers = #tpu.dot_dimension_numbers<[1], [0], [0], [1], [0, 0, 1, 1], [], []>} : vector<200x128xbf16>, vector<128x128xbf16>, vector<200x128xf32> -> vector<200x128xf32>
    %45 = arith.addf %38, %44 : vector<200x128xf32>
    %46 = arith.index_cast %11 : i32 to index
    %c20 = arith.constant 20 : index
    %c0_29 = arith.constant 0 : index
    %47 = vector.load %arg9[%46, %c20, %c0_29] : memref<2x242x128xbf16, #tpu.memory_space<vmem>>, vector<1x200x128xbf16>
    %48 = vector.shape_cast %47 : vector<1x200x128xbf16> to vector<200x128xbf16>
    %c1_30 = arith.constant 1 : index
    %c0_31 = arith.constant 0 : index
    %c0_32 = arith.constant 0 : index
    %c0_33 = arith.constant 0 : index
    %49 = vector.load %arg4[%c1_30, %c0_31, %c0_32, %c0_33] : memref<3x3x128x128xbf16, #tpu.memory_space<vmem>>, vector<1x1x128x128xbf16>
    %50 = vector.shape_cast %49 : vector<1x1x128x128xbf16> to vector<128x128xbf16>
    %cst_34 = arith.constant dense<0.000000e+00> : vector<200x128xf32>
    %51 = tpu.matmul %48, %50, %cst_34 {dimension_numbers = #tpu.dot_dimension_numbers<[1], [0], [0], [1], [0, 0, 1, 1], [], []>} : vector<200x128xbf16>, vector<128x128xbf16>, vector<200x128xf32> -> vector<200x128xf32>
    %52 = arith.addf %45, %51 : vector<200x128xf32>
    %53 = arith.index_cast %11 : i32 to index
    %c21 = arith.constant 21 : index
    %c0_35 = arith.constant 0 : index
    %54 = vector.load %arg9[%53, %c21, %c0_35] : memref<2x242x128xbf16, #tpu.memory_space<vmem>>, vector<1x200x128xbf16>
    %55 = vector.shape_cast %54 : vector<1x200x128xbf16> to vector<200x128xbf16>
    %c1_36 = arith.constant 1 : index
    %c1_37 = arith.constant 1 : index
    %c0_38 = arith.constant 0 : index
    %c0_39 = arith.constant 0 : index
    %56 = vector.load %arg4[%c1_36, %c1_37, %c0_38, %c0_39] : memref<3x3x128x128xbf16, #tpu.memory_space<vmem>>, vector<1x1x128x128xbf16>
    %57 = vector.shape_cast %56 : vector<1x1x128x128xbf16> to vector<128x128xbf16>
    %cst_40 = arith.constant dense<0.000000e+00> : vector<200x128xf32>
    %58 = tpu.matmul %55, %57, %cst_40 {dimension_numbers = #tpu.dot_dimension_numbers<[1], [0], [0], [1], [0, 0, 1, 1], [], []>} : vector<200x128xbf16>, vector<128x128xbf16>, vector<200x128xf32> -> vector<200x128xf32>
    %59 = arith.addf %52, %58 : vector<200x128xf32>
    %60 = arith.index_cast %11 : i32 to index
    %c22 = arith.constant 22 : index
    %c0_41 = arith.constant 0 : index
    %61 = vector.load %arg9[%60, %c22, %c0_41] : memref<2x242x128xbf16, #tpu.memory_space<vmem>>, vector<1x200x128xbf16>
    %62 = vector.shape_cast %61 : vector<1x200x128xbf16> to vector<200x128xbf16>
    %c1_42 = arith.constant 1 : index
    %c2_43 = arith.constant 2 : index
    %c0_44 = arith.constant 0 : index
    %c0_45 = arith.constant 0 : index
    %63 = vector.load %arg4[%c1_42, %c2_43, %c0_44, %c0_45] : memref<3x3x128x128xbf16, #tpu.memory_space<vmem>>, vector<1x1x128x128xbf16>
    %64 = vector.shape_cast %63 : vector<1x1x128x128xbf16> to vector<128x128xbf16>
    %cst_46 = arith.constant dense<0.000000e+00> : vector<200x128xf32>
    %65 = tpu.matmul %62, %64, %cst_46 {dimension_numbers = #tpu.dot_dimension_numbers<[1], [0], [0], [1], [0, 0, 1, 1], [], []>} : vector<200x128xbf16>, vector<128x128xbf16>, vector<200x128xf32> -> vector<200x128xf32>
    %66 = arith.addf %59, %65 : vector<200x128xf32>
    %67 = arith.index_cast %11 : i32 to index
    %c40 = arith.constant 40 : index
    %c0_47 = arith.constant 0 : index
    %68 = vector.load %arg9[%67, %c40, %c0_47] : memref<2x242x128xbf16, #tpu.memory_space<vmem>>, vector<1x200x128xbf16>
    %69 = vector.shape_cast %68 : vector<1x200x128xbf16> to vector<200x128xbf16>
    %c2_48 = arith.constant 2 : index
    %c0_49 = arith.constant 0 : index
    %c0_50 = arith.constant 0 : index
    %c0_51 = arith.constant 0 : index
    %70 = vector.load %arg4[%c2_48, %c0_49, %c0_50, %c0_51] : memref<3x3x128x128xbf16, #tpu.memory_space<vmem>>, vector<1x1x128x128xbf16>
    %71 = vector.shape_cast %70 : vector<1x1x128x128xbf16> to vector<128x128xbf16>
    %cst_52 = arith.constant dense<0.000000e+00> : vector<200x128xf32>
    %72 = tpu.matmul %69, %71, %cst_52 {dimension_numbers = #tpu.dot_dimension_numbers<[1], [0], [0], [1], [0, 0, 1, 1], [], []>} : vector<200x128xbf16>, vector<128x128xbf16>, vector<200x128xf32> -> vector<200x128xf32>
    %73 = arith.addf %66, %72 : vector<200x128xf32>
    %74 = arith.index_cast %11 : i32 to index
    %c41 = arith.constant 41 : index
    %c0_53 = arith.constant 0 : index
    %75 = vector.load %arg9[%74, %c41, %c0_53] : memref<2x242x128xbf16, #tpu.memory_space<vmem>>, vector<1x200x128xbf16>
    %76 = vector.shape_cast %75 : vector<1x200x128xbf16> to vector<200x128xbf16>
    %c2_54 = arith.constant 2 : index
    %c1_55 = arith.constant 1 : index
    %c0_56 = arith.constant 0 : index
    %c0_57 = arith.constant 0 : index
    %77 = vector.load %arg4[%c2_54, %c1_55, %c0_56, %c0_57] : memref<3x3x128x128xbf16, #tpu.memory_space<vmem>>, vector<1x1x128x128xbf16>
    %78 = vector.shape_cast %77 : vector<1x1x128x128xbf16> to vector<128x128xbf16>
    %cst_58 = arith.constant dense<0.000000e+00> : vector<200x128xf32>
    %79 = tpu.matmul %76, %78, %cst_58 {dimension_numbers = #tpu.dot_dimension_numbers<[1], [0], [0], [1], [0, 0, 1, 1], [], []>} : vector<200x128xbf16>, vector<128x128xbf16>, vector<200x128xf32> -> vector<200x128xf32>
    %80 = arith.addf %73, %79 : vector<200x128xf32>
    %81 = arith.index_cast %11 : i32 to index
    %c42 = arith.constant 42 : index
    %c0_59 = arith.constant 0 : index
    %82 = vector.load %arg9[%81, %c42, %c0_59] : memref<2x242x128xbf16, #tpu.memory_space<vmem>>, vector<1x200x128xbf16>
    %83 = vector.shape_cast %82 : vector<1x200x128xbf16> to vector<200x128xbf16>
    %c2_60 = arith.constant 2 : index
    %c2_61 = arith.constant 2 : index
    %c0_62 = arith.constant 0 : index
    %c0_63 = arith.constant 0 : index
    %84 = vector.load %arg4[%c2_60, %c2_61, %c0_62, %c0_63] : memref<3x3x128x128xbf16, #tpu.memory_space<vmem>>, vector<1x1x128x128xbf16>
    %85 = vector.shape_cast %84 : vector<1x1x128x128xbf16> to vector<128x128xbf16>
    %cst_64 = arith.constant dense<0.000000e+00> : vector<200x128xf32>
    %86 = tpu.matmul %83, %85, %cst_64 {dimension_numbers = #tpu.dot_dimension_numbers<[1], [0], [0], [1], [0, 0, 1, 1], [], []>} : vector<200x128xbf16>, vector<128x128xbf16>, vector<200x128xf32> -> vector<200x128xf32>
    %87 = arith.addf %80, %86 : vector<200x128xf32>
    %c0_65 = arith.constant 0 : index
    %c0_66 = arith.constant 0 : index
    %88 = vector.load %arg6[%c0_65, %c0_66] : memref<4x128xf32, #tpu.memory_space<vmem>>, vector<1x128xf32>
    %89 = vector.broadcast %88 : vector<1x128xf32> to vector<200x128xf32>
    %90 = arith.mulf %87, %89 : vector<200x128xf32>
    %c1_67 = arith.constant 1 : index
    %c0_68 = arith.constant 0 : index
    %91 = vector.load %arg6[%c1_67, %c0_68] : memref<4x128xf32, #tpu.memory_space<vmem>>, vector<1x128xf32>
    %92 = vector.broadcast %91 : vector<1x128xf32> to vector<200x128xf32>
    %93 = arith.addf %90, %92 : vector<200x128xf32>
    %cst_69 = arith.constant 0.000000e+00 : f32
    %94 = vector.broadcast %cst_69 : f32 to vector<200x128xf32>
    %95 = arith.maximumf %93, %94 : vector<200x128xf32>
    %c0_70 = arith.constant 0 : index
    %c0_71 = arith.constant 0 : index
    %96 = vector.load %arg7[%c0_70, %c0_71] : memref<200x1xi32, #tpu.memory_space<vmem>>, vector<200x1xi32>
    %c8_i32 = arith.constant 8 : i32
    %97 = arith.muli %1, %c8_i32 : i32
    %c1_i32_72 = arith.constant 1 : i32
    %98 = arith.subi %97, %c1_i32_72 : i32
    %99 = vector.broadcast %98 : i32 to vector<200x1xi32>
    %100 = arith.addi %96, %99 : vector<200x1xi32>
    %c0_i32_73 = arith.constant 0 : i32
    %101 = vector.broadcast %c0_i32_73 : i32 to vector<200x1xi32>
    %102 = arith.cmpi sge, %100, %101 : vector<200x1xi32>
    %c16_i32 = arith.constant 16 : i32
    %103 = vector.broadcast %c16_i32 : i32 to vector<200x1xi32>
    %104 = arith.cmpi slt, %100, %103 : vector<200x1xi32>
    %105 = arith.andi %102, %104 : vector<200x1xi1>
    %cst_74 = arith.constant 0.000000e+00 : f32
    %106 = vector.shape_cast %105 : vector<200x1xi1> to vector<200x1xi1>
    %107 = vector.broadcast %106 : vector<200x1xi1> to vector<200x128xi1>
    %108 = vector.broadcast %cst_74 : f32 to vector<200x128xf32>
    %109 = arith.select %107, %95, %108 : vector<200x128xi1>, vector<200x128xf32>
    %110 = arith.truncf %109 : vector<200x128xf32> to vector<200x128xbf16>
    %c0_75 = arith.constant 0 : index
    %c0_76 = arith.constant 0 : index
    %111 = vector.load %arg10[%c0_75, %c0_76] : memref<202x128xbf16, #tpu.memory_space<vmem>>, vector<200x128xbf16>
    tpu.vector_store %arg10[%c0_75, %c0_76], %110 {strides = array<i32>} : memref<202x128xbf16, #tpu.memory_space<vmem>>, vector<200x128xbf16>,
    %cst_77 = arith.constant 0.000000e+00 : bf16
    %112 = vector.broadcast %cst_77 : bf16 to vector<2x128xbf16>
    %c200 = arith.constant 200 : index
    %c0_78 = arith.constant 0 : index
    %113 = vector.load %arg10[%c200, %c0_78] : memref<202x128xbf16, #tpu.memory_space<vmem>>, vector<2x128xbf16>
    tpu.vector_store %arg10[%c200, %c0_78], %112 {strides = array<i32>} : memref<202x128xbf16, #tpu.memory_space<vmem>>, vector<2x128xbf16>,
    %c0_79 = arith.constant 0 : index
    %c0_80 = arith.constant 0 : index
    %114 = vector.load %arg10[%c0_79, %c0_80] : memref<202x128xbf16, #tpu.memory_space<vmem>>, vector<160x128xbf16>
    %c0_81 = arith.constant 0 : index
    %c0_82 = arith.constant 0 : index
    %c0_83 = arith.constant 0 : index
    %c0_84 = arith.constant 0 : index
    %115 = vector.load %arg5[%c0_81, %c0_82, %c0_83, %c0_84] : memref<3x3x128x128xbf16, #tpu.memory_space<vmem>>, vector<1x1x128x128xbf16>
    %116 = vector.shape_cast %115 : vector<1x1x128x128xbf16> to vector<128x128xbf16>
    %cst_85 = arith.constant dense<0.000000e+00> : vector<160x128xf32>
    %117 = tpu.matmul %114, %116, %cst_85 {dimension_numbers = #tpu.dot_dimension_numbers<[1], [0], [0], [1], [0, 0, 1, 1], [], []>} : vector<160x128xbf16>, vector<128x128xbf16>, vector<160x128xf32> -> vector<160x128xf32>
    %c1_86 = arith.constant 1 : index
    %c0_87 = arith.constant 0 : index
    %118 = vector.load %arg10[%c1_86, %c0_87] : memref<202x128xbf16, #tpu.memory_space<vmem>>, vector<160x128xbf16>
    %c0_88 = arith.constant 0 : index
    %c1_89 = arith.constant 1 : index
    %c0_90 = arith.constant 0 : index
    %c0_91 = arith.constant 0 : index
    %119 = vector.load %arg5[%c0_88, %c1_89, %c0_90, %c0_91] : memref<3x3x128x128xbf16, #tpu.memory_space<vmem>>, vector<1x1x128x128xbf16>
    %120 = vector.shape_cast %119 : vector<1x1x128x128xbf16> to vector<128x128xbf16>
    %cst_92 = arith.constant dense<0.000000e+00> : vector<160x128xf32>
    %121 = tpu.matmul %118, %120, %cst_92 {dimension_numbers = #tpu.dot_dimension_numbers<[1], [0], [0], [1], [0, 0, 1, 1], [], []>} : vector<160x128xbf16>, vector<128x128xbf16>, vector<160x128xf32> -> vector<160x128xf32>
    %122 = arith.addf %117, %121 : vector<160x128xf32>
    %c2_93 = arith.constant 2 : index
    %c0_94 = arith.constant 0 : index
    %123 = vector.load %arg10[%c2_93, %c0_94] : memref<202x128xbf16, #tpu.memory_space<vmem>>, vector<160x128xbf16>
    %c0_95 = arith.constant 0 : index
    %c2_96 = arith.constant 2 : index
    %c0_97 = arith.constant 0 : index
    %c0_98 = arith.constant 0 : index
    %124 = vector.load %arg5[%c0_95, %c2_96, %c0_97, %c0_98] : memref<3x3x128x128xbf16, #tpu.memory_space<vmem>>, vector<1x1x128x128xbf16>
    %125 = vector.shape_cast %124 : vector<1x1x128x128xbf16> to vector<128x128xbf16>
    %cst_99 = arith.constant dense<0.000000e+00> : vector<160x128xf32>
    %126 = tpu.matmul %123, %125, %cst_99 {dimension_numbers = #tpu.dot_dimension_numbers<[1], [0], [0], [1], [0, 0, 1, 1], [], []>} : vector<160x128xbf16>, vector<128x128xbf16>, vector<160x128xf32> -> vector<160x128xf32>
    %127 = arith.addf %122, %126 : vector<160x128xf32>
    %c20_100 = arith.constant 20 : index
    %c0_101 = arith.constant 0 : index
    %128 = vector.load %arg10[%c20_100, %c0_101] : memref<202x128xbf16, #tpu.memory_space<vmem>>, vector<160x128xbf16>
    %c1_102 = arith.constant 1 : index
    %c0_103 = arith.constant 0 : index
    %c0_104 = arith.constant 0 : index
    %c0_105 = arith.constant 0 : index
    %129 = vector.load %arg5[%c1_102, %c0_103, %c0_104, %c0_105] : memref<3x3x128x128xbf16, #tpu.memory_space<vmem>>, vector<1x1x128x128xbf16>
    %130 = vector.shape_cast %129 : vector<1x1x128x128xbf16> to vector<128x128xbf16>
    %cst_106 = arith.constant dense<0.000000e+00> : vector<160x128xf32>
    %131 = tpu.matmul %128, %130, %cst_106 {dimension_numbers = #tpu.dot_dimension_numbers<[1], [0], [0], [1], [0, 0, 1, 1], [], []>} : vector<160x128xbf16>, vector<128x128xbf16>, vector<160x128xf32> -> vector<160x128xf32>
    %132 = arith.addf %127, %131 : vector<160x128xf32>
    %c21_107 = arith.constant 21 : index
    %c0_108 = arith.constant 0 : index
    %133 = vector.load %arg10[%c21_107, %c0_108] : memref<202x128xbf16, #tpu.memory_space<vmem>>, vector<160x128xbf16>
    %c1_109 = arith.constant 1 : index
    %c1_110 = arith.constant 1 : index
    %c0_111 = arith.constant 0 : index
    %c0_112 = arith.constant 0 : index
    %134 = vector.load %arg5[%c1_109, %c1_110, %c0_111, %c0_112] : memref<3x3x128x128xbf16, #tpu.memory_space<vmem>>, vector<1x1x128x128xbf16>
    %135 = vector.shape_cast %134 : vector<1x1x128x128xbf16> to vector<128x128xbf16>
    %cst_113 = arith.constant dense<0.000000e+00> : vector<160x128xf32>
    %136 = tpu.matmul %133, %135, %cst_113 {dimension_numbers = #tpu.dot_dimension_numbers<[1], [0], [0], [1], [0, 0, 1, 1], [], []>} : vector<160x128xbf16>, vector<128x128xbf16>, vector<160x128xf32> -> vector<160x128xf32>
    %137 = arith.addf %132, %136 : vector<160x128xf32>
    %c22_114 = arith.constant 22 : index
    %c0_115 = arith.constant 0 : index
    %138 = vector.load %arg10[%c22_114, %c0_115] : memref<202x128xbf16, #tpu.memory_space<vmem>>, vector<160x128xbf16>
    %c1_116 = arith.constant 1 : index
    %c2_117 = arith.constant 2 : index
    %c0_118 = arith.constant 0 : index
    %c0_119 = arith.constant 0 : index
    %139 = vector.load %arg5[%c1_116, %c2_117, %c0_118, %c0_119] : memref<3x3x128x128xbf16, #tpu.memory_space<vmem>>, vector<1x1x128x128xbf16>
    %140 = vector.shape_cast %139 : vector<1x1x128x128xbf16> to vector<128x128xbf16>
    %cst_120 = arith.constant dense<0.000000e+00> : vector<160x128xf32>
    %141 = tpu.matmul %138, %140, %cst_120 {dimension_numbers = #tpu.dot_dimension_numbers<[1], [0], [0], [1], [0, 0, 1, 1], [], []>} : vector<160x128xbf16>, vector<128x128xbf16>, vector<160x128xf32> -> vector<160x128xf32>
    %142 = arith.addf %137, %141 : vector<160x128xf32>
    %c40_121 = arith.constant 40 : index
    %c0_122 = arith.constant 0 : index
    %143 = vector.load %arg10[%c40_121, %c0_122] : memref<202x128xbf16, #tpu.memory_space<vmem>>, vector<160x128xbf16>
    %c2_123 = arith.constant 2 : index
    %c0_124 = arith.constant 0 : index
    %c0_125 = arith.constant 0 : index
    %c0_126 = arith.constant 0 : index
    %144 = vector.load %arg5[%c2_123, %c0_124, %c0_125, %c0_126] : memref<3x3x128x128xbf16, #tpu.memory_space<vmem>>, vector<1x1x128x128xbf16>
    %145 = vector.shape_cast %144 : vector<1x1x128x128xbf16> to vector<128x128xbf16>
    %cst_127 = arith.constant dense<0.000000e+00> : vector<160x128xf32>
    %146 = tpu.matmul %143, %145, %cst_127 {dimension_numbers = #tpu.dot_dimension_numbers<[1], [0], [0], [1], [0, 0, 1, 1], [], []>} : vector<160x128xbf16>, vector<128x128xbf16>, vector<160x128xf32> -> vector<160x128xf32>
    %147 = arith.addf %142, %146 : vector<160x128xf32>
    %c41_128 = arith.constant 41 : index
    %c0_129 = arith.constant 0 : index
    %148 = vector.load %arg10[%c41_128, %c0_129] : memref<202x128xbf16, #tpu.memory_space<vmem>>, vector<160x128xbf16>
    %c2_130 = arith.constant 2 : index
    %c1_131 = arith.constant 1 : index
    %c0_132 = arith.constant 0 : index
    %c0_133 = arith.constant 0 : index
    %149 = vector.load %arg5[%c2_130, %c1_131, %c0_132, %c0_133] : memref<3x3x128x128xbf16, #tpu.memory_space<vmem>>, vector<1x1x128x128xbf16>
    %150 = vector.shape_cast %149 : vector<1x1x128x128xbf16> to vector<128x128xbf16>
    %cst_134 = arith.constant dense<0.000000e+00> : vector<160x128xf32>
    %151 = tpu.matmul %148, %150, %cst_134 {dimension_numbers = #tpu.dot_dimension_numbers<[1], [0], [0], [1], [0, 0, 1, 1], [], []>} : vector<160x128xbf16>, vector<128x128xbf16>, vector<160x128xf32> -> vector<160x128xf32>
    %152 = arith.addf %147, %151 : vector<160x128xf32>
    %c42_135 = arith.constant 42 : index
    %c0_136 = arith.constant 0 : index
    %153 = vector.load %arg10[%c42_135, %c0_136] : memref<202x128xbf16, #tpu.memory_space<vmem>>, vector<160x128xbf16>
    %c2_137 = arith.constant 2 : index
    %c2_138 = arith.constant 2 : index
    %c0_139 = arith.constant 0 : index
    %c0_140 = arith.constant 0 : index
    %154 = vector.load %arg5[%c2_137, %c2_138, %c0_139, %c0_140] : memref<3x3x128x128xbf16, #tpu.memory_space<vmem>>, vector<1x1x128x128xbf16>
    %155 = vector.shape_cast %154 : vector<1x1x128x128xbf16> to vector<128x128xbf16>
    %cst_141 = arith.constant dense<0.000000e+00> : vector<160x128xf32>
    %156 = tpu.matmul %153, %155, %cst_141 {dimension_numbers = #tpu.dot_dimension_numbers<[1], [0], [0], [1], [0, 0, 1, 1], [], []>} : vector<160x128xbf16>, vector<128x128xbf16>, vector<160x128xf32> -> vector<160x128xf32>
    %157 = arith.addf %152, %156 : vector<160x128xf32>
    %158 = arith.index_cast %11 : i32 to index
    %c42_142 = arith.constant 42 : index
    %c0_143 = arith.constant 0 : index
    %159 = vector.load %arg9[%158, %c42_142, %c0_143] : memref<2x242x128xbf16, #tpu.memory_space<vmem>>, vector<1x160x128xbf16>
    %160 = vector.shape_cast %159 : vector<1x160x128xbf16> to vector<160x128xbf16>
    %161 = arith.extf %160 : vector<160x128xbf16> to vector<160x128xf32>
    %c2_144 = arith.constant 2 : index
    %c0_145 = arith.constant 0 : index
    %162 = vector.load %arg6[%c2_144, %c0_145] : memref<4x128xf32, #tpu.memory_space<vmem>>, vector<1x128xf32>
    %163 = vector.broadcast %162 : vector<1x128xf32> to vector<160x128xf32>
    %164 = arith.mulf %157, %163 : vector<160x128xf32>
    %c3 = arith.constant 3 : index
    %c0_146 = arith.constant 0 : index
    %165 = vector.load %arg6[%c3, %c0_146] : memref<4x128xf32, #tpu.memory_space<vmem>>, vector<1x128xf32>
    %166 = vector.broadcast %165 : vector<1x128xf32> to vector<160x128xf32>
    %167 = arith.addf %164, %166 : vector<160x128xf32>
    %168 = arith.addf %167, %161 : vector<160x128xf32>
    %cst_147 = arith.constant 0.000000e+00 : f32
    %169 = vector.broadcast %cst_147 : f32 to vector<160x128xf32>
    %170 = arith.maximumf %168, %169 : vector<160x128xf32>
    %c0_148 = arith.constant 0 : index
    %c0_149 = arith.constant 0 : index
    %c0_150 = arith.constant 0 : index
    %171 = vector.load %arg8[%c0_148, %c0_149, %c0_150] : memref<1x160x128xf32, #tpu.memory_space<vmem>>, vector<1x160x128xf32>
    %172 = vector.shape_cast %171 : vector<1x160x128xf32> to vector<160x128xf32>
    %173 = vector.shape_cast %170 : vector<160x128xf32> to vector<1x160x128xf32>
    tpu.vector_store %arg8[%c0_148, %c0_149, %c0_150], %173 {strides = array<i32>} : memref<1x160x128xf32, #tpu.memory_space<vmem>>, vector<1x160x128xf32>,
    return
  }
  func.func @transform_1(%arg0: i32, %arg1: i32, %arg2: i32) -> (i32, i32, i32, i32) {
    %c0_i32 = arith.constant 0 : i32
    %c0_i32_0 = arith.constant 0 : i32
    %c0_i32_1 = arith.constant 0 : i32
    %c0_i32_2 = arith.constant 0 : i32
    %c0_i32_3 = arith.constant 0 : i32
    return %c0_i32, %c0_i32_0, %c0_i32_1, %c0_i32_2 : i32, i32, i32, i32
  }
  func.func @transform_2(%arg0: i32, %arg1: i32, %arg2: i32) -> (i32, i32, i32, i32) {
    %c0_i32 = arith.constant 0 : i32
    %c0_i32_0 = arith.constant 0 : i32
    %c0_i32_1 = arith.constant 0 : i32
    %c0_i32_2 = arith.constant 0 : i32
    %c0_i32_3 = arith.constant 0 : i32
    return %c0_i32, %c0_i32_0, %c0_i32_1, %c0_i32_2 : i32, i32, i32, i32
  }
  func.func @transform_3(%arg0: i32, %arg1: i32, %arg2: i32) -> (i32, i32) {
    %c0_i32 = arith.constant 0 : i32
    %c0_i32_0 = arith.constant 0 : i32
    %c0_i32_1 = arith.constant 0 : i32
    return %c0_i32, %c0_i32_0 : i32, i32
  }
  func.func @transform_4(%arg0: i32, %arg1: i32, %arg2: i32) -> (i32, i32) {
    %c0_i32 = arith.constant 0 : i32
    %c0_i32_0 = arith.constant 0 : i32
    %c0_i32_1 = arith.constant 0 : i32
    return %c0_i32, %c0_i32_0 : i32, i32
  }
  func.func @transform_5(%arg0: i32, %arg1: i32, %arg2: i32) -> (i32, i32, i32) {
    %c2_i32 = arith.constant 2 : i32
    %0 = arith.muli %arg1, %c2_i32 : i32
    %1 = arith.addi %0, %arg2 : i32
    %c0_i32 = arith.constant 0 : i32
    %c0_i32_0 = arith.constant 0 : i32
    return %arg0, %1, %c0_i32 : i32, i32, i32
  }
}

</mosaic_0001>

<bundles_post_ra>
// kernel: basic_block_forward.1
= control target key start
LH: loop header
LB: loop body
LE: loop exit
PB: predicated region body
PF: predicated region fallthrough
CT: control target
= control target key end

     0   :  { %s9574_s18 = smov 0   ;;  %s9576_s19 = smov 0   ;;  %s11581_s0 = inlined_call_operand.vmem [shape: bf16[2,400,128], index: 0, kind: input, shape index: {}]   ;;  %s11582_s1 = inlined_call_operand.vmem [shape: bf16[3,3,128,128], index: 1, kind: input, shape index: {}]   ;;  %s11583_s2 = inlined_call_operand.vmem [shape: bf16[3,3,128,128], index: 2, kind: input, shape index: {}]   ;;  %s11584_s3 = inlined_call_operand.vmem [shape: f32[4,128], index: 3, kind: input, shape index: {}]   ;;  %s11585_s4 = inlined_call_operand.vmem [shape: s32[200,1], index: 4, kind: input, shape index: {}]   ;;  %s11586_s5 = inlined_call_operand.vmem [shape: f32[2,320,128], index: 5, kind: output, shape index: {}]  }
   0x1   :  { %s9578_s20 = smov 0   ;;  %s9580_s21 = smov 0  }
   0x2   :  { %s9582_s22 = smov 0  }
   0x3 LB: > { %s27_s23 = sadd.s32 1, %s9531_s20  ;;  %s34_s24 = sadd.s32 1, %s9535_s21  ;;  %s9539_s22 = sphi %s9582_s22, %s15_s22   ;;  %s9535_s21 = sphi %s9580_s21, %s11681_s21   ;;  %s9531_s20 = sphi %s9578_s20, %s11680_s20   ;;  %s9527_s19 = sphi %s9576_s19, %s11679_s19   ;;  %s9523_s18 = sphi %s9574_s18, %s11678_s18  }
   0x4   : > { %p28_p0 = scmp.ge.s32.totalorder %s27_s23, 2  ;;  %p6664_p1 = scmp.ge.s32.totalorder %s9539_s22, 1 }
   0x5   : > { %p178_p2 = scmp.lt.s32.totalorder %s9539_s22, 5 }
   0x6   : > { %s11683_s23 = smov (%p28_p0, %s27_s23), 0  ;;  %s11685_s24 = smov (!%p28_p0, %s34_s24), %s9535_s21 }
   0x7   : > { %p179_p3 = pnand %p6664_p1, %p178_p2  ;;  %p36_p4 = scmp.ge.s32.totalorder %s11685_s24, 2 }
   0x9   : > { %s11687_s24 = smov (%p36_p4, %s11685_s24), 0  ;;  %182 = sbr.rel (%p179_p3) target bundleno = 1554 (0x612), region = 36 }
  0x10   : > { %s207_s25 = smul.u32 20, %s9523_s18  ;;  %p208_p5 = scmp.lt.s32.totalorder %s9527_s19, 1 }
  0x11   : > { %s223_s26 = ssub.s32 0, %s9523_s18  ;;  %p222_p7 = scmp.lt.s32.totalorder %s9523_s18, 0 }
  0x12   : > { %s209_s27 = scalar_select %p208_p5, %s9527_s19, 1 }
  0x13   : > { %p210_p6 = scmp.lt.s32.totalorder %s207_s25, 39  ;;  %s6666_s28 = smin.u32 %s9523_s18, %s223_s26 }
  0x14   : > { %s9190_s29 = smul.u32 40, %s209_s27  ;;  %s225_s30 = sand.u32 1, %s6666_s28  }
  0x15   : > { %s11689_s25 = smov (!%p210_p6, %s207_s25), 39  ;;  %s226_s7 = ssub.s32 0, %s225_s30 }
  0x16   : > { %s213_s6 = sadd.s32 %s9190_s29, %s11689_s25  ;;  %s11691_s7 = smov (!%p222_p7, %s226_s7), %s225_s30 }
  0x17   : > { %s6665_s8 = sshll.u32 %s213_s6, 3  ;;  %p6668_p8 = scmp.lt.s32.totalorder %s11691_s7, 0 }
  0x18   : > { %s9617_s11 = scalar_lea.vmem %s11586_s5, %s6665_s8  ;;  %s232_s12 = sadd.s32 2, %s11691_s7 }
  0x19   : > { %s11693_s12 = smov (!%p6668_p8, %s232_s12), %s11691_s7  ;;  %p6669_p9 = scmp.ne.s32.totalorder %s9523_s18, 0 }
  0x1a   : > { %s238_s13 = smul.u32 (!%p6669_p9), 160, %s9523_s18  ;;  %s248_s30 = scalar_lea.sflag (!%p6669_p9), [#allocation4], %s11693_s12 }
  0x1b   : > { %237 = sbr.rel (%p6669_p9) target bundleno = 43 (0x2b), region = 40 }
  0x1c   : > { %s241_s14 = smul.u32 (!%p6669_p9), 50, %s9527_s19  ;;  %s239_s15 = sshra.s32 (!%p6669_p9), %s238_s13, 3 }
  0x1d   : > { %s7215_s16 = smul.u32 (!%p6669_p9), 124, %s11693_s12 }
  0x1e   : > { %s242_s17 = sadd.s32 (!%p6669_p9), %s241_s14, %s239_s15 }
  0x1f   : > { %s6670_s25 = sshll.u32 (!%p6669_p9), %s242_s17, 2  ;;  %s247_s29 = scalar_lea.vmem (!%p6669_p9), [#allocation2], %s7215_s16 }
  0x20   : > { %s244_s28 = scalar_lea.vmem (!%p6669_p9), %s11581_s0, %s6670_s25 }
  0x21   : > { %v281_v0 = vld [vmem:[%s244_s28] sm:$0xff] (!%p6669_p9)  ;;  %v283_v1 = vld [vmem:[%s244_s28 + $0x8] sm:$0xff] (!%p6669_p9)  ;;  %v285_v2 = vld [vmem:[%s244_s28 + $0x10] sm:$0xff] (!%p6669_p9) }
  0x22   : > { %282 = vst [vmem:[%s247_s29] sm:$0xff] %v281_v0  ;;  %284 = vst [vmem:[%s247_s29 + $0x8] sm:$0xff] %v283_v1  ;;  %v287_v3 = vld [vmem:[%s244_s28 + $0x18] sm:$0xff]  ;;  %v289_v4 = vld [vmem:[%s244_s28 + $0x20] sm:$0xff] }
  0x23   : > { %286 = vst [vmem:[%s247_s29 + $0x10] sm:$0xff] %v285_v2  ;;  %v291_v5 = vld [vmem:[%s244_s28 + $0x28] sm:$0xff]  ;;  %288 = vst [vmem:[%s247_s29 + $0x18] sm:$0xff] %v287_v3  ;;  %v293_v6 = vld [vmem:[%s244_s28 + $0x30] sm:$0xff] }
  0x24   : > { %290 = vst [vmem:[%s247_s29 + $0x20] sm:$0xff] %v289_v4  ;;  %292 = vst [vmem:[%s247_s29 + $0x28] sm:$0xff] %v291_v5  ;;  %v295_v7 = vld [vmem:[%s244_s28 + $0x38] sm:$0xff]  ;;  %v297_v8 = vld [vmem:[%s244_s28 + $0x40] sm:$0xff] }
  0x25   : > { %294 = vst [vmem:[%s247_s29 + $0x30] sm:$0xff] %v293_v6  ;;  %296 = vst [vmem:[%s247_s29 + $0x38] sm:$0xff] %v295_v7  ;;  %v299_v9 = vld [vmem:[%s244_s28 + $0x48] sm:$0xff]  ;;  %v301_v10 = vld [vmem:[%s244_s28 + $0x50] sm:$0xff] }
  0x26   : > { %298 = vst [vmem:[%s247_s29 + $0x40] sm:$0xff] %v297_v8  ;;  %v303_v11 = vld [vmem:[%s244_s28 + $0x58] sm:$0xff]  ;;  %300 = vst [vmem:[%s247_s29 + $0x48] sm:$0xff] %v299_v9  ;;  %v305_v12 = vld [vmem:[%s244_s28 + $0x60] sm:$0xff] }
  0x27   : > { %302 = vst [vmem:[%s247_s29 + $0x50] sm:$0xff] %v301_v10  ;;  %304 = vst [vmem:[%s247_s29 + $0x58] sm:$0xff] %v303_v11  ;;  %v307_v13 = vld [vmem:[%s244_s28 + $0x68] sm:$0xff]  ;;  %v309_v14 = vld [vmem:[%s244_s28 + $0x70] sm:$0xff] }
  0x28   : > { %306 = vst [vmem:[%s247_s29 + $0x60] sm:$0xff] %v305_v12  ;;  %308 = vst [vmem:[%s247_s29 + $0x68] sm:$0xff] %v307_v13 }
  0x29   : > { %310 = vst [vmem:[%s247_s29 + $0x70] sm:$0xff] %v309_v14 }
  0x2a   : > { %318 = vsyncadd %s248_s30, 1920 }
  0x2b PF: > { %s319_s6 = sadd.s32 1, %s9523_s18 }
  0x2c   : > { %p6672_p10 = scmp.ge.s32.totalorder %s319_s6, 2 }
  0x2d   : > { %s325_s7 = ssub.s32 (!%p6672_p10), 1, %s11693_s12  ;;  %s326_s8 = smul.u32 (!%p6672_p10), 160, %s319_s6 }
  0x2e   : > { %323 = sbr.rel (%p6672_p10) target bundleno = 62 (0x3e), region = 78 }
  0x2f   : > { %s329_s9 = smul.u32 (!%p6672_p10), 50, %s9527_s19  ;;  %s327_s10 = sshra.s32 (!%p6672_p10), %s326_s8, 3 }
  0x30   : > { %s7216_s13 = smul.u32 (!%p6672_p10), 124, %s325_s7  ;;  %s336_s19 = scalar_lea.sflag (!%p6672_p10), [#allocation4], %s325_s7 }
  0x31   : > { %s330_s14 = sadd.s32 (!%p6672_p10), %s329_s9, %s327_s10 }
  0x32   : > { %s6673_s15 = sshll.u32 (!%p6672_p10), %s330_s14, 2  ;;  %s335_s26 = scalar_lea.vmem (!%p6672_p10), [#allocation2], %s7216_s13 }
  0x33   : > { %s332_s25 = scalar_lea.vmem (!%p6672_p10), %s11581_s0, %s6673_s15 }
  0x34   : > { %v369_v15 = vld [vmem:[%s332_s25] sm:$0xff] (!%p6672_p10)  ;;  %v371_v16 = vld [vmem:[%s332_s25 + $0x8] sm:$0xff] (!%p6672_p10)  ;;  %v373_v17 = vld [vmem:[%s332_s25 + $0x10] sm:$0xff] (!%p6672_p10) }
  0x35   : > { %370 = vst [vmem:[%s335_s26] sm:$0xff] %v369_v15  ;;  %372 = vst [vmem:[%s335_s26 + $0x8] sm:$0xff] %v371_v16  ;;  %v375_v18 = vld [vmem:[%s332_s25 + $0x18] sm:$0xff]  ;;  %v377_v19 = vld [vmem:[%s332_s25 + $0x20] sm:$0xff] }
  0x36   : > { %374 = vst [vmem:[%s335_s26 + $0x10] sm:$0xff] %v373_v17  ;;  %v379_v20 = vld [vmem:[%s332_s25 + $0x28] sm:$0xff]  ;;  %376 = vst [vmem:[%s335_s26 + $0x18] sm:$0xff] %v375_v18  ;;  %v381_v21 = vld [vmem:[%s332_s25 + $0x30] sm:$0xff] }
  0x37   : > { %378 = vst [vmem:[%s335_s26 + $0x20] sm:$0xff] %v377_v19  ;;  %380 = vst [vmem:[%s335_s26 + $0x28] sm:$0xff] %v379_v20  ;;  %v383_v22 = vld [vmem:[%s332_s25 + $0x38] sm:$0xff]  ;;  %v385_v23 = vld [vmem:[%s332_s25 + $0x40] sm:$0xff] }
  0x38   : > { %382 = vst [vmem:[%s335_s26 + $0x30] sm:$0xff] %v381_v21  ;;  %384 = vst [vmem:[%s335_s26 + $0x38] sm:$0xff] %v383_v22  ;;  %v387_v24 = vld [vmem:[%s332_s25 + $0x48] sm:$0xff]  ;;  %v389_v25 = vld [vmem:[%s332_s25 + $0x50] sm:$0xff] }
  0x39   : > { %386 = vst [vmem:[%s335_s26 + $0x40] sm:$0xff] %v385_v23  ;;  %v391_v26 = vld [vmem:[%s332_s25 + $0x58] sm:$0xff]  ;;  %388 = vst [vmem:[%s335_s26 + $0x48] sm:$0xff] %v387_v24  ;;  %v393_v27 = vld [vmem:[%s332_s25 + $0x60] sm:$0xff] }
  0x3a   : > { %390 = vst [vmem:[%s335_s26 + $0x50] sm:$0xff] %v389_v25  ;;  %392 = vst [vmem:[%s335_s26 + $0x58] sm:$0xff] %v391_v26  ;;  %v395_v28 = vld [vmem:[%s332_s25 + $0x68] sm:$0xff]  ;;  %v397_v29 = vld [vmem:[%s332_s25 + $0x70] sm:$0xff] }
  0x3b   : > { %394 = vst [vmem:[%s335_s26 + $0x60] sm:$0xff] %v393_v27  ;;  %396 = vst [vmem:[%s335_s26 + $0x68] sm:$0xff] %v395_v28 }
  0x3c   : > { %398 = vst [vmem:[%s335_s26 + $0x70] sm:$0xff] %v397_v29 }
  0x3d   : > { %406 = vsyncadd %s336_s19, 1920 }
  0x3e PF: > { %s7217_s27 = smul.u32 124, %s11693_s12  ;;  %s410_s29 = scalar_lea.sflag [#allocation4], %s11693_s12 }
  0x40   : > { %s9640_s28 = scalar_lea.vmem [#allocation2], %s7217_s27 }
  0x41   : > { %9519 = dma.done.wait %s410_s29, 1920 }
  0x42   : > { %9520 = vsyncadd %s410_s29, 4294965376  ;;  %v9541_v30 = vmov 0.0   ;;  %vm9542_vm0 = vmmov 0   ;;  %v9236_v31 = vld [vmem:[%s11582_s1 + $0x80] sm:$0xff]   ;;  %v9237_v32 = vld [vmem:[%s11582_s1 + $0x88] sm:$0xff]   ;;  %vm11590_vm1 = vcmask 1046528  }
  0x43   : > { %7846 = vmatprep.subr.bf16.mxu0 %v9541_v30  ;;  %7862 = vmatprep.mubr.msk.bf16.mxu0 %vm9542_vm0, %v9541_v30  ;;  %v9238_v33 = vld [vmem:[%s11582_s1 + $0x90] sm:$0xff]   ;;  %v9239_v34 = vld [vmem:[%s11582_s1 + $0x98] sm:$0xff]   ;;  %v9240_v35 = vld [vmem:[%s11582_s1 + $0xa0] sm:$0xff]   ;;  %vm11588_vm2 = vcmask 1045504   ;;  %vm539_vm3 = vsmask.f32 7424 }
  0x44   : > { %7710 = vmatprep.subr.bf16.mxu1 %v9541_v30  ;;  %7726 = vmatprep.mubr.msk.bf16.mxu1 %vm9542_vm0, %v9541_v30  ;;  %v9241_v36 = vld [vmem:[%s11582_s1 + $0xa8] sm:$0xff]   ;;  %v416_v37 = vld [vmem:[%s9640_s28 + $0x4] sm:$0xf]  ;;  %v1038_v38 = vld [vmem:[%s9640_s28] sm:$0xe]  ;;  %vm11589_vm5 = vcmask 1044480  }
  0x45   : > { %7847 = vmatpush3.bf16.msra.mxu0 %v9236_v31  ;;  %v9242_v39 = vld [vmem:[%s11582_s1 + $0xb0] sm:$0xff]   ;;  %v9245_v40 = vld [vmem:[%s9640_s28 + $0x8] sm:$0xff]   ;;  %v6738_v41 = vcombine.low %v1038_v38, %v416_v37  ;;  %v9243_v42 = vld [vmem:[%s11582_s1 + $0xb8] sm:$0xff]   ;;  %vm11587_vm4 = vsmask.f32 5376  ;;  %s6935_s14 = sshll.u32 %s9523_s18, 3 }
  0x46   : > { %7848 = vmatprep.subr.bf16.mxu0 %v9541_v30  ;;  %v1061_v44 = vrot.slane %v9245_v40, 1  ;;  %v9247_v45 = vld [vmem:[%s11582_s1 + $0xc0] sm:$0xff]   ;;  %v9248_v47 = vld [vmem:[%s9640_s28 + $0x10] sm:$0xff]   ;;  %v9250_v50 = vld [vmem:[%s9640_s28 + $0x18] sm:$0xff]   ;;  %s6936_s15 = sadd.s32 4294967295, %s6935_s14 }
  0x47   : > { %v1060_v43 = vrot.slane %v6738_v41, 1  ;;  %v1063_v48 = vrot.slane %v9248_v47, 1  ;;  %v9249_v49 = vld [vmem:[%s11582_s1 + $0xc8] sm:$0xff]   ;;  %v9252_v51 = vld [vmem:[%s11582_s1 + $0xd0] sm:$0xff]   ;;  %v1065_v53 = vrot.slane %v9250_v50, 1  ;;  %v9255_v54 = vld [vmem:[%s11582_s1 + $0xd8] sm:$0xff]  }
  0x48   : > { %v9708_v55 = vld [vmem:[%s9640_s28 + $0x20] sm:$0xff]   ;;  %v9260_v59 = vld [vmem:[%s11582_s1 + $0xe8] sm:$0xff]   ;;  %v9262_v61 = vld [vmem:[%s11582_s1 + $0xf0] sm:$0xff]  }
  0x49   : > { %7849 = vmatpush3.bf16.msra.mxu0 %v9237_v32  ;;  %v1062_v46 = vsel %vm11590_vm1, %v1060_v43, %v1061_v44  ;;  %v1064_v52 = vsel %vm11590_vm1, %v1061_v44, %v1063_v48  ;;  %v9257_v56 = vld [vmem:[%s11582_s1 + $0xe0] sm:$0xff]   ;;  %v1066_v57 = vsel %vm11590_vm1, %v1063_v48, %v1065_v53  ;;  %v1067_v58 = vrot.slane %v9708_v55, 1  ;;  %v9265_v0 = vld [vmem:[%s11582_s1 + $0xf8] sm:$0xff]   ;;  %v9738_v1 = vld [vmem:[%s9640_s28 + $0x30] sm:$0xff]  }
  0x4a   : > { %7850 = vmatprep.subr.bf16.mxu0 %v9541_v30  ;;  %v9723_v60 = vld [vmem:[%s9640_s28 + $0x28] sm:$0xff]   ;;  %v1071_v3 = vrot.slane %v9738_v1, 1  ;;  %v9746_v4 = vld [vmem:[%s9640_s28 + $0x38] sm:$0xff]   ;;  %v9753_v7 = vld [vmem:[%s9640_s28 + $0x40] sm:$0xff]  }
  0x4b   : > { %v1068_v62 = vsel %vm11590_vm1, %v1065_v53, %v1067_v58  ;;  %v1069_v63 = vrot.slane %v9723_v60, 1  ;;  %v1073_v6 = vrot.slane %v9746_v4, 1  ;;  %v1075_v9 = vrot.slane %v9753_v7, 1  ;;  %v9760_v10 = vld [vmem:[%s9640_s28 + $0x48] sm:$0xff]   ;;  %v9767_v13 = vld [vmem:[%s9640_s28 + $0x50] sm:$0xff]   ;;  %v9774_v16 = vld [vmem:[%s9640_s28 + $0x58] sm:$0xff]  }
  0x4c   : > { %v1077_v12 = vrot.slane %v9760_v10, 1  ;;  %v1079_v15 = vrot.slane %v9767_v13, 1  ;;  %v1081_v18 = vrot.slane %v9774_v16, 1  ;;  %v439_v19 = vld [vmem:[%s9640_s28 + $0x60] sm:$0xf]  ;;  %v9796_v27 = vld [vmem:[%s9640_s28 + $0x10] sm:$0xff]  }
  0x4d   : > { %7851 = vmatpush3.bf16.msra.mxu0 %v9238_v33  ;;  %v1070_v2 = vsel %vm11590_vm1, %v1067_v58, %v1069_v63  ;;  %v1072_v5 = vsel %vm11590_vm1, %v1069_v63, %v1071_v3  ;;  %v1074_v8 = vsel %vm11590_vm1, %v1071_v3, %v1073_v6  ;;  %v1076_v11 = vsel %vm11590_vm1, %v1073_v6, %v1075_v9  ;;  %v456_v20 = vld [vmem:[%s9640_s28 + $0x64] sm:$0x1]  ;;  %v1307_v25 = vld [vmem:[%s9640_s28 + $0x8] sm:$0xc]  ;;  %v9793_v26 = vld [vmem:[%s9640_s28 + $0xc] sm:$0xf] }
  0x4e   : > { %7852 = vmatprep.subr.bf16.mxu0 %v9541_v30  ;;  %v1078_v14 = vsel %vm11590_vm1, %v1075_v9, %v1077_v12  ;;  %v1080_v17 = vsel %vm11590_vm1, %v1077_v12, %v1079_v15  ;;  %v1082_v21 = vsel %vm11590_vm1, %v1079_v15, %v1081_v18  ;;  %v9783_v22 = vcombine.low %v439_v19, %v456_v20  ;;  %v9268_v32 = vld [vmem:[%s11582_s1 + $0x100] sm:$0xff]   ;;  %v9809_v33 = vld [vmem:[%s9640_s28 + $0x18] sm:$0xff]   ;;  %v9851_v48 = vld [vmem:[%s9640_s28 + $0x30] sm:$0xff]  }
  0x4f   : > { %v9799_v28 = vcombine.low %v1307_v25, %v9793_v26  ;;  %v1417_v31 = vrot.slane %v9796_v27, 2  ;;  %v9820_v37 = vld [vmem:[%s9640_s28 + $0x20] sm:$0xff]   ;;  %v9273_v38 = vld [vmem:[%s11582_s1 + $0x110] sm:$0xff]   ;;  %v1425_v50 = vrot.slane %v9851_v48, 2 }
  0x50   : > { %v1083_v23 = vrot.slane %v9783_v22, 1  ;;  %v1421_v40 = vrot.slane %v9820_v37, 2  ;;  %v9276_v41 = vld [vmem:[%s11582_s1 + $0x118] sm:$0xff]   ;;  %v9278_v43 = vld [vmem:[%s11582_s1 + $0x120] sm:$0xff]  }
  0x51   : > { %7853 = vmatpush3.bf16.msra.mxu0 %v9239_v34  ;;  %v1416_v29 = vrot.slane %v9799_v28, 2  ;;  %v9866_v53 = vld [vmem:[%s9640_s28 + $0x38] sm:$0xff]   ;;  %v9878_v58 = vld [vmem:[%s9640_s28 + $0x40] sm:$0xff]  }
  0x52   : > { %7854 = vmatprep.subr.bf16.mxu0 %v9541_v30  ;;  %v1084_v24 = vsel %vm11590_vm1, %v1081_v18, %v1083_v23  ;;  %v415_v9 = vld [vmem:[%s9640_s28] sm:$0xf]  ;;  %v9926_v19 = vld [vmem:[%s9640_s28 + $0x58] sm:$0xff]  }
  0x53   : > { %v1418_v34 = vsel %vm11588_vm2, %v1416_v29, %v1417_v31  ;;  %v1435_v25 = vrot.slane %v9926_v19, 2  ;;  %v9938_v29 = vld [vmem:[%s9640_s28 + $0x8] sm:$0xff]  }
  0x55   : > { %7855 = vmatpush3.bf16.msra.mxu0 %v9240_v35  ;;  %v1419_v35 = vrot.slane %v9809_v33, 2 }
  0x56   : > { %7856 = vmatprep.subr.bf16.mxu0 %v9541_v30 }
  0x57   : > { %v1422_v44 = vsel %vm11588_vm2, %v1419_v35, %v1421_v40 }
  0x59   : > { %7857 = vmatpush3.bf16.msra.mxu0 %v9241_v36  ;;  %v9270_v36 = vld [vmem:[%s11582_s1 + $0x108] sm:$0xff]  }
  0x5a   : > { %7858 = vmatprep.subr.bf16.mxu0 %v9541_v30 }
  0x5d   : > { %7859 = vmatpush3.bf16.msra.mxu0 %v9242_v39  ;;  %v1420_v39 = vsel %vm11588_vm2, %v1417_v31, %v1419_v35  ;;  %v548_v31 = vshll.u32 %v9938_v29, 16 }
  0x5e   : > { %7860 = vmatprep.subr.bf16.mxu0 %v9541_v30 }
  0x61   : > { %7861 = vmatpush3.bf16.msra.mxu0 %v9243_v42  ;;  %v9835_v42 = vld [vmem:[%s9640_s28 + $0x28] sm:$0xff]  }
  0x62   : > { %7914 = vmatprep.subr.bf16.mxu0 %v9541_v30 }
  0x64   : > { %7863 = vmatmul.mubr.bf16.vlgmr.msra.gmra.mrb[0].mxu0 %v1062_v46  ;;  %v9281_v46 = vld [vmem:[%s11582_s1 + $0x128] sm:$0xff]  }
  0x65   : > { %7915 = vmatpush3.bf16.msra.mxu0 %v9247_v45  ;;  %7866 = vmatprep.mubr.msk.bf16.mxu0 %vm9542_vm0, %v9541_v30  ;;  %v1423_v45 = vrot.slane %v9835_v42, 2 }
  0x66   : > { %7916 = vmatprep.subr.bf16.mxu0 %v9541_v30 }
  0x67   : > { %v1424_v47 = vsel %vm11588_vm2, %v1421_v40, %v1423_v45  ;;  %v9951_v40 = vld [vmem:[%s9640_s28 + $0x10] sm:$0xff]  }
  0x69   : > { %7917 = vmatpush3.bf16.msra.mxu0 %v9249_v49  ;;  %v9283_v49 = vld [vmem:[%s11582_s1 + $0x130] sm:$0xff]  }
  0x6a   : > { %7918 = vmatprep.subr.bf16.mxu0 %v9541_v30 }
  0x6c   : > { %7867 = vmatmul.mubr.bf16.gmra.mrb[4].mxu0 %v1064_v52  ;;  %v1426_v52 = vsel %vm11588_vm2, %v1423_v45, %v1425_v50  ;;  %v1332_v45 = vld [vmem:[%s9640_s28 + $0x6c] sm:$0x3] }
  0x6d   : > { %7870 = vmatprep.mubr.msk.bf16.mxu0 %vm9542_vm0, %v9541_v30  ;;  %7919 = vmatpush3.bf16.msra.mxu0 %v9252_v51  ;;  %v9287_v51 = vld [vmem:[%s11582_s1 + $0x138] sm:$0xff]  }
  0x6e   : > { %7920 = vmatprep.subr.bf16.mxu0 %v9541_v30 }
  0x71   : > { %7921 = vmatpush3.bf16.msra.mxu0 %v9255_v54  ;;  %v9293_v54 = vld [vmem:[%s11582_s1 + $0x40] sm:$0xff]  }
  0x72   : > { %7922 = vmatprep.subr.bf16.mxu0 %v9541_v30  ;;  %7711 = vmatpush3.bf16.msra.mxu1 %v9293_v54  ;;  %v9968_v54 = vld [vmem:[%s9640_s28 + $0x18] sm:$0xff]  }
  0x73   : > { %7712 = vmatprep.subr.bf16.mxu1 %v9541_v30 }
  0x74   : > { %7871 = vmatmul.mubr.bf16.gmra.mrb[8].mxu0 %v1066_v57 }
  0x75   : > { %7874 = vmatprep.mubr.msk.bf16.mxu0 %vm9542_vm0, %v9541_v30  ;;  %7923 = vmatpush3.bf16.msra.mxu0 %v9257_v56  ;;  %v1427_v56 = vrot.slane %v9866_v53, 2 }
  0x76   : > { %7924 = vmatprep.subr.bf16.mxu0 %v9541_v30 }
  0x77   : > { %v1428_v57 = vsel %vm11588_vm2, %v1425_v50, %v1427_v56 }
  0x79   : > { %7925 = vmatpush3.bf16.msra.mxu0 %v9260_v59  ;;  %v9295_v59 = vld [vmem:[%s11582_s1 + $0x48] sm:$0xff]  }
  0x7a   : > { %7926 = vmatprep.subr.bf16.mxu0 %v9541_v30  ;;  %7713 = vmatpush3.bf16.msra.mxu1 %v9295_v59 }
  0x7b   : > { %7714 = vmatprep.subr.bf16.mxu1 %v9541_v30 }
  0x7c   : > { %7875 = vmatmul.mubr.bf16.gmra.mrb[12].mxu0 %v1068_v62  ;;  %v9296_v62 = vld [vmem:[%s11582_s1 + $0x50] sm:$0xff]  }
  0x7d   : > { %7878 = vmatprep.mubr.msk.bf16.mxu0 %vm9542_vm0, %v9541_v30  ;;  %7927 = vmatpush3.bf16.msra.mxu0 %v9262_v61  ;;  %v1429_v61 = vrot.slane %v9878_v58, 2 }
  0x7e   : > { %7928 = vmatprep.subr.bf16.mxu0 %v9541_v30  ;;  %7715 = vmatpush3.bf16.msra.mxu1 %v9296_v62 }
  0x7f   : > { %v1430_v63 = vsel %vm11588_vm2, %v1427_v56, %v1429_v61  ;;  %7716 = vmatprep.subr.bf16.mxu1 %v9541_v30  ;;  %v564_v56 = vshll.u32 %v9968_v54, 16 }
  0x81   : > { %7929 = vmatpush3.bf16.msra.mxu0 %v9265_v0  ;;  %v9892_v0 = vld [vmem:[%s9640_s28 + $0x48] sm:$0xff]  }
  0x82   : > { %7982 = vmatprep.subr.bf16.mxu0 %v9541_v30  ;;  %v1431_v3 = vrot.slane %v9892_v0, 2 }
  0x84   : > { %7879 = vmatmul.mubr.bf16.gmra.mrb[16].mxu0 %v1070_v2  ;;  %v9297_v2 = vld [vmem:[%s11582_s1 + $0x58] sm:$0xff]   ;;  %v1432_v6 = vsel %vm11588_vm2, %v1429_v61, %v1431_v3  ;;  %v566_v61 = vrot.slane %v564_v56, 1  ;;  %v1715_v56 = vshll.u32 %v9820_v37, 16 }
  0x85   : > { %7882 = vmatprep.mubr.msk.bf16.mxu0 %vm9542_vm0, %v9541_v30  ;;  %7717 = vmatpush3.bf16.msra.mxu1 %v9297_v2  ;;  %v568_v2 = vshrl.u32 %v9968_v54, 16 }
  0x86   : > { %7718 = vmatprep.subr.bf16.mxu1 %v9541_v30 }
  0x8c   : > { %7883 = vmatmul.mubr.bf16.gmra.mrb[20].mxu0 %v1072_v5  ;;  %v9298_v5 = vld [vmem:[%s11582_s1 + $0x60] sm:$0xff]  }
  0x8d   : > { %7886 = vmatprep.mubr.msk.bf16.mxu0 %vm9542_vm0, %v9541_v30  ;;  %7719 = vmatpush3.bf16.msra.mxu1 %v9298_v5  ;;  %v1686_v5 = vshrl.u32 %v9799_v28, 16 }
  0x8e   : > { %7720 = vmatprep.subr.bf16.mxu1 %v9541_v30 }
  0x94   : > { %7887 = vmatmul.mubr.bf16.gmra.mrb[24].mxu0 %v1074_v8  ;;  %v9907_v8 = vld [vmem:[%s9640_s28 + $0x50] sm:$0xff]  }
  0x95   : > { %7890 = vmatprep.mubr.msk.bf16.mxu0 %vm9542_vm0, %v9541_v30  ;;  %v1433_v12 = vrot.slane %v9907_v8, 2 }
  0x97   : > { %v1434_v18 = vsel %vm11588_vm2, %v1431_v3, %v1433_v12  ;;  %v1436_v35 = vsel %vm11588_vm2, %v1433_v12, %v1435_v25  ;;  %v572_v3 = vshll.u32 %v9708_v55, 16  ;;  %v570_v12 = vor.u32 %v568_v2, %v566_v61  ;;  %v9290_v2 = vld [vmem:[%s11582_s1 + $0x150] sm:$0xff]  }
  0x9c   : > { %7891 = vmatmul.mubr.bf16.gmra.mrb[28].mxu0 %v1076_v11  ;;  %v9300_v11 = vld [vmem:[%s11582_s1 + $0x68] sm:$0xff]  }
  0x9d   : > { %7894 = vmatprep.mubr.msk.bf16.mxu0 %vm9542_vm0, %v9541_v30  ;;  %7721 = vmatpush3.bf16.msra.mxu1 %v9300_v11  ;;  %v1697_v11 = vshll.u32 %v9796_v27, 16 }
  0x9e   : > { %7722 = vmatprep.subr.bf16.mxu1 %v9541_v30 }
  0x9f   : > { %v1699_v55 = vrot.slane %v1697_v11, 3  ;;  %v1724_v11 = vshll.u32 %v9835_v42, 16 }
  0xa4   : > { %7895 = vmatmul.mubr.bf16.gmra.mrb[32].mxu0 %v1078_v14  ;;  %v9484_v14 = vld [vmem:[%s9640_s28 + $0x4] sm:$0xf] }
  0xa5   : > { %7898 = vmatprep.mubr.msk.bf16.mxu0 %vm9542_vm0, %v9541_v30  ;;  %v9918_v15 = vcombine.low %v415_v9, %v9484_v14  ;;  %v1694_v9 = vshrl.u32 %v9796_v27, 16  ;;  %v574_v14 = vrot.slane %v572_v3, 1  ;;  %v592_v3 = vshrl.u32 %v9738_v1, 16 }
  0xa7   : > { %v543_v20 = vshll.u32 %v9918_v15, 16 }
  0xac   : > { %7899 = vmatmul.mubr.bf16.gmra.mrb[36].mxu0 %v1080_v17  ;;  %v9301_v17 = vld [vmem:[%s11582_s1 + $0x70] sm:$0xff]  }
  0xad   : > { %7902 = vmatprep.mubr.msk.bf16.mxu0 %vm9542_vm0, %v9541_v30  ;;  %7723 = vmatpush3.bf16.msra.mxu1 %v9301_v17  ;;  %v575_v17 = vsel %vm539_vm3, %v570_v12, %v574_v14  ;;  %v9291_v12 = vld [vmem:[%s11582_s1 + $0x158] sm:$0xff]  }
  0xae   : > { %7724 = vmatprep.subr.bf16.mxu1 %v9541_v30 }
  0xb4   : > { %7903 = vmatmul.mubr.bf16.gmra.mrb[40].mxu0 %v1082_v21  ;;  %v9302_v21 = vld [vmem:[%s11582_s1 + $0x78] sm:$0xff]  }
  0xb5   : > { %7906 = vmatprep.mubr.msk.bf16.mxu0 %vm9542_vm0, %v9541_v30  ;;  %7725 = vmatpush3.bf16.msra.mxu1 %v9302_v21  ;;  %v1696_v21 = vrot.slane %v1694_v9, 2  ;;  %v1721_v9 = vshrl.u32 %v9835_v42, 16 }
  0xb6   : > { %7778 = vmatprep.subr.bf16.mxu1 %v9541_v30 }
  0xbc   : > { %7907 = vmatmul.mubr.bf16.gmra.mrb[44].mxu0 %v1084_v24  ;;  %v545_v24 = vrot.slane %v543_v20, 1 }
  0xbd   : > { %7910 = vmatprep.mubr.msk.bf16.mxu0 %vm9542_vm0, %v9541_v30 }
  0xc4   : > { %7911 = vmatmul.mubr.bf16.gmra.mrb[48].mxu0 %v1083_v23  ;;  %v541_v23 = vshrl.u32 %v9918_v15, 16 }
  0xc5   : > { %7930 = vmatprep.mubr.msk.bf16.mxu0 %vm9542_vm0, %v9541_v30 }
  0xcc   : > { %7931 = vmatmul.mubr.bf16.vlgmr.msra.gmra.mrb[0].mxu0 %v1418_v34  ;;  %v550_v34 = vrot.slane %v548_v31, 1  ;;  %v1700_v31 = vor.u32 %v1699_v55, %v1696_v21  ;;  %v1726_v21 = vrot.slane %v1724_v11, 3  ;;  %v9292_v55 = vld [vmem:[%s11582_s1 + $0x160] sm:$0xff]  }
  0xcd   : > { %7983 = vmatpush3.bf16.msra.mxu0 %v9268_v32  ;;  %7934 = vmatprep.mubr.msk.bf16.mxu0 %vm9542_vm0, %v9541_v30  ;;  %v546_v32 = vor.u32 %v545_v24, %v541_v23  ;;  %v9989_v23 = vld [vmem:[%s9640_s28 + $0x20] sm:$0xff]   ;;  %v580_v24 = vshll.u32 %v9723_v60, 16 }
  0xce   : > { %7984 = vmatprep.subr.bf16.mxu0 %v9541_v30 }
  0xd1   : > { %7985 = vmatpush3.bf16.msra.mxu0 %v9270_v36  ;;  %v9944_v36 = vld [vmem:[%s9640_s28 + $0x60] sm:$0xff]  }
  0xd2   : > { %7986 = vmatprep.subr.bf16.mxu0 %v9541_v30 }
  0xd4   : > { %7935 = vmatmul.mubr.bf16.gmra.mrb[4].mxu0 %v1420_v39  ;;  %v552_v39 = vshrl.u32 %v9938_v29, 16 }
  0xd5   : > { %7938 = vmatprep.mubr.msk.bf16.mxu0 %vm9542_vm0, %v9541_v30  ;;  %7987 = vmatpush3.bf16.msra.mxu0 %v9273_v38  ;;  %v551_v38 = vsel %vm539_vm3, %v546_v32, %v550_v34  ;;  %v1703_v32 = vshrl.u32 %v9809_v33, 16 }
  0xd6   : > { %7988 = vmatprep.subr.bf16.mxu0 %v9541_v30  ;;  %7727 = vmatmul.mubr.bf16.vlgmr.msra.gmra.mrb[0].mxu1 %v551_v38  ;;  %v582_v38 = vrot.slane %v580_v24, 1  ;;  %v604_v24 = vshll.u32 %v9753_v7, 16 }
  0xd7   : > { %7730 = vmatprep.mubr.msk.bf16.mxu1 %vm9542_vm0, %v9541_v30 }
  0xd9   : > { %7989 = vmatpush3.bf16.msra.mxu0 %v9276_v41  ;;  %v556_v41 = vshll.u32 %v9951_v40, 16 }
  0xda   : > { %7990 = vmatprep.subr.bf16.mxu0 %v9541_v30 }
  0xdc   : > { %7939 = vmatmul.mubr.bf16.gmra.mrb[8].mxu0 %v1422_v44  ;;  %v9958_v44 = vld [vmem:[%s9640_s28 + $0x68] sm:$0xf] }
  0xdd   : > { %7942 = vmatprep.mubr.msk.bf16.mxu0 %vm9542_vm0, %v9541_v30  ;;  %7991 = vmatpush3.bf16.msra.mxu0 %v9278_v43  ;;  %v1437_v43 = vrot.slane %v9944_v36, 2 }
  0xde   : > { %7992 = vmatprep.subr.bf16.mxu0 %v9541_v30 }
  0xdf   : > { %v1438_v50 = vsel %vm11588_vm2, %v1435_v25, %v1437_v43 }
  0xe1   : > { %7993 = vmatpush3.bf16.msra.mxu0 %v9281_v46  ;;  %v554_v46 = vor.u32 %v552_v39, %v550_v34  ;;  %v1706_v34 = vshll.u32 %v9809_v33, 16 }
  0xe2   : > { %7994 = vmatprep.subr.bf16.mxu0 %v9541_v30 }
  0xe4   : > { %7943 = vmatmul.mubr.bf16.gmra.mrb[12].mxu0 %v1424_v47  ;;  %v558_v47 = vrot.slane %v556_v41, 1 }
  0xe5   : > { %7946 = vmatprep.mubr.msk.bf16.mxu0 %vm9542_vm0, %v9541_v30  ;;  %7995 = vmatpush3.bf16.msra.mxu0 %v9283_v49 }
  0xe6   : > { %7996 = vmatprep.subr.bf16.mxu0 %v9541_v30  ;;  %v559_v49 = vsel %vm539_vm3, %v554_v46, %v558_v47  ;;  %v1708_v46 = vrot.slane %v1706_v34, 3  ;;  %v9294_v34 = vld [vmem:[%s11582_s1 + $0x168] sm:$0xff]  }
  0xe7   : > { %7731 = vmatmul.mubr.bf16.gmra.mrb[4].mxu1 %v559_v49  ;;  %v588_v49 = vshll.u32 %v9738_v1, 16 }
  0xe8   : > { %7734 = vmatprep.mubr.msk.bf16.mxu1 %vm9542_vm0, %v9541_v30 }
  0xe9   : > { %7997 = vmatpush3.bf16.msra.mxu0 %v9287_v51  ;;  %v6775_v51 = vcombine.low %v9958_v44, %v1332_v45  ;;  %v1705_v45 = vrot.slane %v1703_v32, 2  ;;  %v1733_v32 = vshll.u32 %v9851_v48, 16 }
  0xea   : > { %8050 = vmatprep.subr.bf16.mxu0 %v9541_v30 }
  0xec   : > { %7947 = vmatmul.mubr.bf16.gmra.mrb[16].mxu0 %v1426_v52  ;;  %v560_v52 = vshrl.u32 %v9951_v40, 16 }
  0xed   : > { %7950 = vmatprep.mubr.msk.bf16.mxu0 %vm9542_vm0, %v9541_v30 }
  0xee   : > { %v562_v59 = vor.u32 %v560_v52, %v558_v47  ;;  %v584_v47 = vshrl.u32 %v9723_v60, 16  ;;  %v1712_v52 = vshrl.u32 %v9820_v37, 16 }
  0xf0   : > { %v567_v62 = vsel %vm539_vm3, %v562_v59, %v566_v61  ;;  %v590_v59 = vrot.slane %v588_v49, 1 }
  0xf1   : > { %7735 = vmatmul.mubr.bf16.gmra.mrb[8].mxu1 %v567_v62  ;;  %v1714_v62 = vrot.slane %v1712_v52, 2  ;;  %v9303_v52 = vld [vmem:[%s11582_s1 + $0x178] sm:$0xff]  }
  0xf2   : > { %7738 = vmatprep.mubr.msk.bf16.mxu1 %vm9542_vm0, %v9541_v30 }
  0xf4   : > { %7951 = vmatmul.mubr.bf16.gmra.mrb[20].mxu0 %v1428_v57  ;;  %v1439_v57 = vrot.slane %v6775_v51, 2  ;;  %v9289_v51 = vld [vmem:[%s11582_s1 + $0x148] sm:$0xff]  }
  0xf5   : > { %7954 = vmatprep.mubr.msk.bf16.mxu0 %vm9542_vm0, %v9541_v30 }
  0xf9   : > { %7739 = vmatmul.mubr.bf16.gmra.mrb[12].mxu1 %v575_v17 }
  0xfa   : > { %7742 = vmatprep.mubr.msk.bf16.mxu1 %vm9542_vm0, %v9541_v30 }
  0xfc   : > { %7955 = vmatmul.mubr.bf16.gmra.mrb[24].mxu0 %v1430_v63  ;;  %v1440_v63 = vsel %vm11588_vm2, %v1437_v43, %v1439_v57  ;;  %v9288_v43 = vld [vmem:[%s11582_s1 + $0x140] sm:$0xff]  }
  0xfd   : > { %7958 = vmatprep.mubr.msk.bf16.mxu0 %vm9542_vm0, %v9541_v30 }
 0x104   : > { %7959 = vmatmul.mubr.bf16.gmra.mrb[28].mxu0 %v1432_v6  ;;  %v1689_v6 = vshll.u32 %v9799_v28, 16  ;;  %v576_v28 = vshrl.u32 %v9989_v23, 16 }
 0x105   : > { %7962 = vmatprep.mubr.msk.bf16.mxu0 %vm9542_vm0, %v9541_v30 }
 0x106   : > { %v1691_v20 = vrot.slane %v1689_v6, 3 }
 0x10c   : > { %7963 = vmatmul.mubr.bf16.gmra.mrb[32].mxu0 %v1434_v18  ;;  %v1688_v18 = vrot.slane %v1686_v5, 2  ;;  %v596_v5 = vshll.u32 %v9746_v4, 16 }
 0x10d   : > { %7966 = vmatprep.mubr.msk.bf16.mxu0 %vm9542_vm0, %v9541_v30 }
 0x10e   : > { %v1692_v25 = vor.u32 %v1691_v20, %v1688_v18  ;;  %v598_v17 = vrot.slane %v596_v5, 1  ;;  %v1723_v20 = vrot.slane %v1721_v9, 2  ;;  %v1748_v5 = vshrl.u32 %v9878_v58, 16 }
 0x110   : > { %v1701_v41 = vsel %vm11587_vm4, %v1692_v25, %v1700_v31  ;;  %v1727_v25 = vor.u32 %v1726_v21, %v1723_v20  ;;  %v628_v20 = vshll.u32 %v9774_v16, 16 }
 0x114   : > { %7967 = vmatmul.mubr.bf16.gmra.mrb[36].mxu0 %v1436_v35  ;;  %v578_v35 = vor.u32 %v576_v28, %v574_v14  ;;  %v594_v14 = vor.u32 %v592_v3, %v590_v59  ;;  %v600_v28 = vshrl.u32 %v9746_v4, 16 }
 0x115   : > { %7970 = vmatprep.mubr.msk.bf16.mxu0 %vm9542_vm0, %v9541_v30 }
 0x116   : > { %v583_v39 = vsel %vm539_vm3, %v578_v35, %v582_v38  ;;  %v599_v1 = vsel %vm539_vm3, %v594_v14, %v598_v17  ;;  %v602_v35 = vor.u32 %v600_v28, %v598_v17  ;;  %v1750_v14 = vrot.slane %v1748_v5, 2 }
 0x117   : > { %7743 = vmatmul.mubr.bf16.gmra.mrb[16].mxu1 %v583_v39  ;;  %v1760_v28 = vshll.u32 %v9892_v0, 16 }
 0x118   : > { %7746 = vmatprep.mubr.msk.bf16.mxu1 %vm9542_vm0, %v9541_v30 }
 0x11c   : > { %7971 = vmatmul.mubr.bf16.gmra.mrb[40].mxu0 %v1438_v50  ;;  %v1709_v50 = vor.u32 %v1708_v46, %v1705_v45  ;;  %v9299_v45 = vld [vmem:[%s11582_s1 + $0x170] sm:$0xff]   ;;  %v608_v46 = vshrl.u32 %v9753_v7, 16 }
 0x11d   : > { %7974 = vmatprep.mubr.msk.bf16.mxu0 %vm9542_vm0, %v9541_v30 }
 0x11e   : > { %v1710_v61 = vsel %vm11587_vm4, %v1700_v31, %v1709_v50  ;;  %v1730_v31 = vshrl.u32 %v9851_v48, 16 }
 0x124   : > { %7975 = vmatmul.mubr.bf16.gmra.mrb[44].mxu0 %v1440_v63  ;;  %v1717_v63 = vrot.slane %v1715_v56, 3 }
 0x125   : > { %7978 = vmatprep.mubr.msk.bf16.mxu0 %vm9542_vm0, %v9541_v30 }
 0x126   : > { %v1718_v6 = vor.u32 %v1717_v63, %v1714_v62  ;;  %v616_v62 = vshrl.u32 %v9760_v10, 16  ;;  %v620_v63 = vshll.u32 %v9767_v13, 16 }
 0x128   : > { %v1719_v18 = vsel %vm11587_vm4, %v1709_v50, %v1718_v6  ;;  %v1728_v39 = vsel %vm11587_vm4, %v1718_v6, %v1727_v25  ;;  %v1739_v50 = vshrl.u32 %v9866_v53, 16  ;;  %v1751_v6 = vshll.u32 %v9878_v58, 16 }
 0x129   : > { %v622_v11 = vrot.slane %v620_v63, 1 }
 0x12a   : > { %v1753_v17 = vrot.slane %v1751_v6, 3  ;;  %v1784_v6 = vshrl.u32 %v9944_v36, 16 }
 0x12c   : > { %7979 = vmatmul.mubr.bf16.gmra.mrb[48].mxu0 %v1439_v57  ;;  %v586_v57 = vor.u32 %v584_v47, %v582_v38  ;;  %v606_v38 = vrot.slane %v604_v24, 1  ;;  %v612_v47 = vshll.u32 %v9760_v10, 16  ;;  %v1754_v21 = vor.u32 %v1753_v17, %v1750_v14 }
 0x12d   : > { %7998 = vmatprep.mubr.msk.bf16.mxu0 %vm9542_vm0, %v9541_v30  ;;  %v1786_v14 = vrot.slane %v1784_v6, 2  ;;  %v10314_v6 = vld [vmem:[%s11582_s1 + $0x220] sm:$0xff]  }
 0x12e   : > { %v591_v60 = vsel %vm539_vm3, %v586_v57, %v590_v59  ;;  %v607_v4 = vsel %vm539_vm3, %v602_v35, %v606_v38  ;;  %v610_v56 = vor.u32 %v608_v46, %v606_v38  ;;  %v614_v57 = vrot.slane %v612_v47, 1  ;;  %v9314_v38 = vld [vmem:[%s11582_s1 + $0x18] sm:$0xff]  }
 0x12f   : > { %7747 = vmatmul.mubr.bf16.gmra.mrb[20].mxu1 %v591_v60  ;;  %v1741_v60 = vrot.slane %v1739_v50, 2  ;;  %v1762_v35 = vrot.slane %v1760_v28, 3 }
 0x130   : > { %7750 = vmatprep.mubr.msk.bf16.mxu1 %vm9542_vm0, %v9541_v30  ;;  %v615_v7 = vsel %vm539_vm3, %v610_v56, %v614_v57  ;;  %v618_v9 = vor.u32 %v616_v62, %v614_v57  ;;  %v9317_v56 = vld [vmem:[%s11582_s1 + $0x28] sm:$0xff]   ;;  %v640_v57 = vshrl.u32 %v9783_v22, 16  ;;  %v9318_v62 = vld [vmem:[%s11582_s1 + $0x30] sm:$0xff]  }
 0x132   : > { %v623_v10 = vsel %vm539_vm3, %v618_v9, %v622_v11  ;;  %v1787_v9 = vshll.u32 %v9944_v36, 16 }
 0x134   : > { %7999 = vmatmul.mubr.bf16.vlgmr.msra.gmra.mrb[0].mxu0 %v1701_v41  ;;  %v1732_v41 = vrot.slane %v1730_v31, 2  ;;  %v9313_v31 = vld [vmem:[%s11582_s1 + $0x10] sm:$0xff]   ;;  %v1789_v17 = vrot.slane %v1787_v9, 3 }
 0x135   : > { %8051 = vmatpush3.bf16.msra.mxu0 %v9288_v43  ;;  %8002 = vmatprep.mubr.msk.bf16.mxu0 %vm9542_vm0, %v9541_v30  ;;  %v1735_v43 = vrot.slane %v1733_v32, 3  ;;  %v10319_v9 = vld [vmem:[%s9640_s28 + $0x2c] sm:$0xff]  }
 0x136   : > { %8052 = vmatprep.subr.bf16.mxu0 %v9541_v30 }
 0x137   : > { %7751 = vmatmul.mubr.bf16.gmra.mrb[24].mxu1 %v599_v1  ;;  %v1736_v49 = vor.u32 %v1735_v43, %v1732_v41  ;;  %v9312_v1 = vld [vmem:[%s11582_s1 + $0x8] sm:$0xff]   ;;  %v1766_v43 = vshrl.u32 %v9907_v8, 16 }
 0x138   : > { %7754 = vmatprep.mubr.msk.bf16.mxu1 %vm9542_vm0, %v9541_v30 }
 0x139   : > { %8053 = vmatpush3.bf16.msra.mxu0 %v9289_v51  ;;  %v1742_v51 = vshll.u32 %v9866_v53, 16  ;;  %v1737_v59 = vsel %vm11587_vm4, %v1727_v25, %v1736_v49  ;;  %v630_v25 = vrot.slane %v628_v20, 1 }
 0x13a   : > { %8054 = vmatprep.subr.bf16.mxu0 %v9541_v30 }
 0x13c   : > { %8003 = vmatmul.mubr.bf16.gmra.mrb[4].mxu0 %v1710_v61  ;;  %v1744_v61 = vrot.slane %v1742_v51, 3  ;;  %v1768_v51 = vrot.slane %v1766_v43, 2  ;;  %v9316_v43 = vld [vmem:[%s11582_s1 + $0x1b0] sm:$0xff]  }
 0x13d   : > { %8006 = vmatprep.mubr.msk.bf16.mxu0 %vm9542_vm0, %v9541_v30  ;;  %8055 = vmatpush3.bf16.msra.mxu0 %v9290_v2  ;;  %v9310_v2 = vld [vmem:[%s11582_s1] sm:$0xff]  }
 0x13e   : > { %8056 = vmatprep.subr.bf16.mxu0 %v9541_v30  ;;  %v1745_v3 = vor.u32 %v1744_v61, %v1741_v60  ;;  %7779 = vmatpush3.bf16.msra.mxu1 %v9310_v2  ;;  %v1778_v60 = vshll.u32 %v9926_v19, 16 }
 0x13f   : > { %7755 = vmatmul.mubr.bf16.gmra.mrb[28].mxu1 %v607_v4  ;;  %7780 = vmatprep.subr.bf16.mxu1 %v9541_v30  ;;  %v632_v4 = vshrl.u32 %v9774_v16, 16 }
 0x140   : > { %7758 = vmatprep.mubr.msk.bf16.mxu1 %vm9542_vm0, %v9541_v30  ;;  %v1755_v32 = vsel %vm11587_vm4, %v1745_v3, %v1754_v21  ;;  %v1780_v2 = vrot.slane %v1778_v60, 3 }
 0x141   : > { %8057 = vmatpush3.bf16.msra.mxu0 %v9291_v12  ;;  %v1746_v12 = vsel %vm11587_vm4, %v1736_v49, %v1745_v3  ;;  %v634_v46 = vor.u32 %v632_v4, %v630_v25  ;;  %v9315_v49 = vld [vmem:[%s11582_s1 + $0x20] sm:$0xff]   ;;  %v9319_v3 = vld [vmem:[%s11582_s1 + $0x38] sm:$0xff]   ;;  %v9490_v4 = vld [vmem:[%s9640_s28 + $0x30] sm:$0xff]  }
 0x142   : > { %8058 = vmatprep.subr.bf16.mxu0 %v9541_v30  ;;  %7781 = vmatpush3.bf16.msra.mxu1 %v9312_v1  ;;  %v1790_v1 = vor.u32 %v1789_v17, %v1786_v14  ;;  %v9355_v17 = vld [vmem:[%s9640_s28 + $0x34] sm:$0xff]  }
 0x143   : > { %7782 = vmatprep.subr.bf16.mxu1 %v9541_v30 }
 0x144   : > { %8007 = vmatmul.mubr.bf16.gmra.mrb[8].mxu0 %v1719_v18  ;;  %v624_v18 = vshrl.u32 %v9767_v13, 16 }
 0x145   : > { %8010 = vmatprep.mubr.msk.bf16.mxu0 %vm9542_vm0, %v9541_v30  ;;  %8059 = vmatpush3.bf16.msra.mxu0 %v9292_v55  ;;  %v1757_v55 = vshrl.u32 %v9892_v0, 16 }
 0x146   : > { %8060 = vmatprep.subr.bf16.mxu0 %v9541_v30  ;;  %v626_v24 = vor.u32 %v624_v18, %v622_v11  ;;  %7783 = vmatpush3.bf16.msra.mxu1 %v9313_v31  ;;  %v1663_v11 = vld [vmem:[%s9640_s28 + $0x6c] sm:$0x7] }
 0x147   : > { %7759 = vmatmul.mubr.bf16.gmra.mrb[32].mxu1 %v615_v7  ;;  %7784 = vmatprep.subr.bf16.mxu1 %v9541_v30 }
 0x148   : > { %7762 = vmatprep.mubr.msk.bf16.mxu1 %vm9542_vm0, %v9541_v30  ;;  %v631_v13 = vsel %vm539_vm3, %v626_v24, %v630_v25  ;;  %v2046_v25 = vrot.slane %v9796_v27, 3  ;;  %v2048_v27 = vrot.slane %v9809_v33, 3  ;;  %v2050_v33 = vrot.slane %v9820_v37, 3 }
 0x149   : > { %8061 = vmatpush3.bf16.msra.mxu0 %v9294_v34  ;;  %v1759_v34 = vrot.slane %v1757_v55, 2  ;;  %v2052_v37 = vrot.slane %v9835_v42, 3  ;;  %v2054_v42 = vrot.slane %v9851_v48, 3  ;;  %v2056_v48 = vrot.slane %v9866_v53, 3 }
 0x14a   : > { %8062 = vmatprep.subr.bf16.mxu0 %v9541_v30  ;;  %7785 = vmatpush3.bf16.msra.mxu1 %v9314_v38  ;;  %v9309_v38 = vld [vmem:[%s11582_s1 + $0x1a0] sm:$0xff]   ;;  %v2060_v53 = vrot.slane %v9892_v0, 3  ;;  %v2064_v0 = vrot.slane %v9926_v19, 3 }
 0x14b   : > { %v1763_v41 = vor.u32 %v1762_v35, %v1759_v34  ;;  %7786 = vmatprep.subr.bf16.mxu1 %v9541_v30  ;;  %v9308_v34 = vld [vmem:[%s11582_s1 + $0x198] sm:$0xff]   ;;  %v2051_v35 = vsel %vm11589_vm5, %v2048_v27, %v2050_v33 }
 0x14c   : > { %8011 = vmatmul.mubr.bf16.gmra.mrb[12].mxu0 %v1728_v39  ;;  %v636_v39 = vshll.u32 %v9783_v22, 16 }
 0x14d   : > { %8014 = vmatprep.mubr.msk.bf16.mxu0 %vm9542_vm0, %v9541_v30  ;;  %8063 = vmatpush3.bf16.msra.mxu0 %v9299_v45  ;;  %v1769_v45 = vshll.u32 %v9907_v8, 16  ;;  %v1764_v16 = vsel %vm11587_vm4, %v1754_v21, %v1763_v41 }
 0x14e   : > { %8064 = vmatprep.subr.bf16.mxu0 %v9541_v30  ;;  %v638_v47 = vrot.slane %v636_v39, 1  ;;  %7787 = vmatpush3.bf16.msra.mxu1 %v9315_v49  ;;  %v9311_v39 = vld [vmem:[%s11582_s1 + $0x1a8] sm:$0xff]   ;;  %v9492_v49 = vld [vmem:[%s9640_s28 + $0x40] sm:$0xff]  }
 0x14f   : > { %7763 = vmatmul.mubr.bf16.gmra.mrb[36].mxu1 %v623_v10  ;;  %7788 = vmatprep.subr.bf16.mxu1 %v9541_v30  ;;  %v10149_v10 = vcombine.low %v9958_v44, %v1663_v11  ;;  %v10325_v11 = vld [vmem:[%s11582_s1 + $0x228] sm:$0xff]  }
 0x150   : > { %7766 = vmatprep.mubr.msk.bf16.mxu1 %vm9542_vm0, %v9541_v30  ;;  %v639_v50 = vsel %vm539_vm3, %v634_v46, %v638_v47  ;;  %v642_v61 = vor.u32 %v640_v57, %v638_v47  ;;  %v9320_v46 = vld [vmem:[%s11582_s1 + $0x1b8] sm:$0xff]   ;;  %v2055_v47 = vsel %vm11589_vm5, %v2052_v37, %v2054_v42 }
 0x151   : > { %8065 = vmatpush3.bf16.msra.mxu0 %v9303_v52  ;;  %v1771_v52 = vrot.slane %v1769_v45, 3  ;;  %v1793_v18 = vshrl.u32 %v10149_v10, 16  ;;  %v1796_v44 = vshll.u32 %v10149_v10, 16  ;;  %v9491_v45 = vld [vmem:[%s9640_s28 + $0x38] sm:$0xff]  }
 0x152   : > { %8118 = vmatprep.subr.bf16.mxu0 %v9541_v30  ;;  %7789 = vmatpush3.bf16.msra.mxu1 %v9317_v56  ;;  %v9494_v56 = vld [vmem:[%s9640_s28 + $0x50] sm:$0xff]  }
 0x153   : > { %v1772_v7 = vor.u32 %v1771_v52, %v1768_v51  ;;  %7790 = vmatprep.subr.bf16.mxu1 %v9541_v30  ;;  %v1795_v21 = vrot.slane %v1793_v18, 2  ;;  %v1798_v55 = vrot.slane %v1796_v44, 3  ;;  %v2058_v51 = vrot.slane %v9878_v58, 3  ;;  %v10346_v18 = vld [vmem:[%s11582_s1 + $0x238] sm:$0xff]  }
 0x154   : > { %8015 = vmatmul.mubr.bf16.gmra.mrb[16].mxu0 %v1737_v59  ;;  %v1775_v59 = vshrl.u32 %v9926_v19, 16  ;;  %v2062_v58 = vrot.slane %v9907_v8, 3  ;;  %v10278_v8 = vld [vmem:[%s11582_s1 + $0x200] sm:$0xff]  }
 0x155   : > { %8018 = vmatprep.mubr.msk.bf16.mxu0 %vm9542_vm0, %v9541_v30  ;;  %v1773_v63 = vsel %vm11587_vm4, %v1763_v41, %v1772_v7  ;;  %v2053_v41 = vsel %vm11589_vm5, %v2050_v33, %v2052_v37  ;;  %v2059_v52 = vsel %vm11589_vm5, %v2056_v48, %v2058_v51  ;;  %v2061_v57 = vsel %vm11589_vm5, %v2058_v51, %v2060_v53 }
 0x156   : > { %v1777_v22 = vrot.slane %v1775_v59, 2  ;;  %7791 = vmatpush3.bf16.msra.mxu1 %v9318_v62  ;;  %v9496_v59 = vld [vmem:[%s9640_s28 + $0x60] sm:$0xf]  ;;  %v2065_v62 = vsel %vm11589_vm5, %v2062_v58, %v2064_v0 }
 0x157   : > { %7767 = vmatmul.mubr.bf16.gmra.mrb[40].mxu1 %v631_v13  ;;  %7792 = vmatprep.subr.bf16.mxu1 %v9541_v30  ;;  %v2049_v13 = vsel %vm11589_vm5, %v2046_v25, %v2048_v27  ;;  %v6713_v60 = vcombine.low %v9496_v59, %v9496_v59  ;;  %v9341_v59 = vld [vmem:[%s11582_s1 + $0x1f8] sm:$0xff]  }
 0x158   : > { %7770 = vmatprep.mubr.msk.bf16.mxu1 %vm9542_vm0, %v9541_v30  ;;  %v1781_v5 = vor.u32 %v1780_v2, %v1777_v22  ;;  %v10287_v22 = vld [vmem:[%s11582_s1 + $0x208] sm:$0xff]   ;;  %v10299_v2 = vld [vmem:[%s11582_s1 + $0x210] sm:$0xff]  }
 0x15a   : > { %7793 = vmatpush3.bf16.msra.mxu1 %v9319_v3  ;;  %v1791_v20 = vsel %vm11587_vm4, %v1781_v5, %v1790_v1  ;;  %v10305_v3 = vld [vmem:[%s11582_s1 + $0x218] sm:$0xff]  }
 0x15b   : > { %8646 = vmatprep.subr.bf16.mxu1 %v9541_v30 }
 0x15c   : > { %8019 = vmatmul.mubr.bf16.gmra.mrb[20].mxu0 %v1746_v12  ;;  %v1782_v12 = vsel %vm11587_vm4, %v1772_v7, %v1781_v5  ;;  %v9495_v7 = vld [vmem:[%s9640_s28 + $0x58] sm:$0xff]  }
 0x15d   : > { %8022 = vmatprep.mubr.msk.bf16.mxu0 %vm9542_vm0, %v9541_v30 }
 0x15f   : > { %7771 = vmatmul.mubr.bf16.gmra.mrb[44].mxu1 %v639_v50  ;;  %v2057_v50 = vsel %vm11589_vm5, %v2054_v42, %v2056_v48 }
 0x160   : > { %7774 = vmatprep.mubr.msk.bf16.mxu1 %vm9542_vm0, %v9541_v30 }
 0x164   : > { %8023 = vmatmul.mubr.bf16.gmra.mrb[24].mxu0 %v1755_v32  ;;  %v9489_v32 = vld [vmem:[%s9640_s28 + $0x28] sm:$0xff]  }
 0x165   : > { %8026 = vmatprep.mubr.msk.bf16.mxu0 %vm9542_vm0, %v9541_v30 }
 0x167   : > { %7775 = vmatmul.mubr.bf16.gmra.mrb[48].mxu1 %v642_v61  ;;  %v2063_v61 = vsel %vm11589_vm5, %v2060_v53, %v2062_v58  ;;  %v9337_v53 = vld [vmem:[%s11582_s1 + $0x1f0] sm:$0xff]  }
 0x168   : > { %7794 = vmatprep.mubr.msk.bf16.mxu1 %vm9542_vm0, %v9541_v30 }
 0x16c   : > { %8027 = vmatmul.mubr.bf16.gmra.mrb[28].mxu0 %v1764_v16  ;;  %v9493_v16 = vld [vmem:[%s9640_s28 + $0x48] sm:$0xff]  }
 0x16d   : > { %8030 = vmatprep.mubr.msk.bf16.mxu0 %vm9542_vm0, %v9541_v30 }
 0x16f   : > { %7795 = vmatmul.mubr.bf16.vlgmr.msra.gmra.mrb[0].mxu1 %v9918_v15  ;;  %v1799_v15 = vor.u32 %v1798_v55, %v1795_v21  ;;  %v9321_v21 = vld [vmem:[%s9640_s28 + $0x14] sm:$0xff]   ;;  %v9322_v55 = vld [vmem:[%s11582_s1 + $0x1c0] sm:$0xff]  }
 0x170   : > { %7798 = vmatprep.mubr.msk.bf16.mxu1 %vm9542_vm0, %v9541_v30  ;;  %8654 = vmatpush3.bf16.msra.mxu1 %v10278_v8 }
 0x171   : > { %v1800_v28 = vsel %vm11587_vm4, %v1790_v1, %v1799_v15  ;;  %8647 = vmatprep.subr.bf16.mxu1 %v9541_v30  ;;  %v2755_v1 = vshrl.u32 %v10319_v9, 16 }
 0x174   : > { %8031 = vmatmul.mubr.bf16.gmra.mrb[32].mxu0 %v1773_v63  ;;  %v2066_v63 = vrot.slane %v9944_v36, 3  ;;  %8655 = vmatpush3.bf16.msra.mxu1 %v10287_v22  ;;  %v2068_v36 = vrot.slane %v10149_v10, 3  ;;  %v2751_v10 = vshll.u32 %v10319_v9, 16 }
 0x175   : > { %8034 = vmatprep.mubr.msk.bf16.mxu0 %vm9542_vm0, %v9541_v30  ;;  %8648 = vmatprep.subr.bf16.mxu1 %v9541_v30 }
 0x176   : > { %v2067_v19 = vsel %vm11589_vm5, %v2064_v0, %v2066_v63  ;;  %v2069_v5 = vsel %vm11589_vm5, %v2066_v63, %v2068_v36  ;;  %v10338_v14 = vrot.slane %v2751_v10, 1 }
 0x177   : > { %7799 = vmatmul.mubr.bf16.gmra.mrb[4].mxu1 %v9938_v29  ;;  %v2023_v29 = vld [vmem:[%s9640_s28 + $0x8] sm:$0x8] }
 0x178   : > { %7802 = vmatprep.mubr.msk.bf16.mxu1 %vm9542_vm0, %v9541_v30  ;;  %v6825_v24 = vcombine.low %v2023_v29, %v9793_v26  ;;  %v9305_v26 = vld [vmem:[%s11582_s1 + $0x180] sm:$0xff]   ;;  %8656 = vmatpush3.bf16.msra.mxu1 %v10299_v2  ;;  %v2757_v44 = vor.u32 %v2755_v1, %v10338_v14  ;;  %v3078_v29 = vrot.slane %v10319_v9, 1 }
 0x179   : > { %8649 = vmatprep.subr.bf16.mxu1 %v9541_v30  ;;  %v9360_v1 = vld [vmem:[%s9640_s28 + $0x5c] sm:$0xff]  }
 0x17c   : > { %8035 = vmatmul.mubr.bf16.gmra.mrb[36].mxu0 %v1782_v12  ;;  %8657 = vmatpush3.bf16.msra.mxu1 %v10305_v3  ;;  %v10334_v12 = vld [vmem:[%s11582_s1 + $0x230] sm:$0xff]  }
 0x17d   : > { %8038 = vmatprep.mubr.msk.bf16.mxu0 %vm9542_vm0, %v9541_v30  ;;  %8650 = vmatprep.subr.bf16.mxu1 %v9541_v30 }
 0x17f   : > { %7803 = vmatmul.mubr.bf16.gmra.mrb[8].mxu1 %v9951_v40  ;;  %v2045_v40 = vrot.slane %v6825_v24, 3  ;;  %v3080_v24 = vrot.slane %v9355_v17, 1 }
 0x180   : > { %7806 = vmatprep.mubr.msk.bf16.mxu1 %vm9542_vm0, %v9541_v30  ;;  %8658 = vmatpush3.bf16.msra.mxu1 %v10314_v6 }
 0x181   : > { %v2047_v31 = vsel %vm11589_vm5, %v2045_v40, %v2046_v25  ;;  %8651 = vmatprep.subr.bf16.mxu1 %v9541_v30  ;;  %v9324_v40 = vld [vmem:[%s11582_s1 + $0x1c8] sm:$0xff]   ;;  %v3081_v25 = vsel %vm11590_vm1, %v3078_v29, %v3080_v24 }
 0x184   : > { %8039 = vmatmul.mubr.bf16.gmra.mrb[40].mxu0 %v1791_v20  ;;  %8659 = vmatpush3.bf16.msra.mxu1 %v10325_v11  ;;  %v2759_v20 = vshll.u32 %v9355_v17, 16 }
 0x185   : > { %8042 = vmatprep.mubr.msk.bf16.mxu0 %vm9542_vm0, %v9541_v30  ;;  %8652 = vmatprep.subr.bf16.mxu1 %v9541_v30 }
 0x187   : > { %7807 = vmatmul.mubr.bf16.gmra.mrb[12].mxu1 %v9968_v54  ;;  %v9306_v54 = vld [vmem:[%s11582_s1 + $0x188] sm:$0xff]  }
 0x188   : > { %7810 = vmatprep.mubr.msk.bf16.mxu1 %vm9542_vm0, %v9541_v30  ;;  %8660 = vmatpush3.bf16.msra.mxu1 %v10334_v12 }
 0x189   : > { %8653 = vmatprep.subr.bf16.mxu1 %v9541_v30 }
 0x18c   : > { %8043 = vmatmul.mubr.bf16.gmra.mrb[44].mxu0 %v1800_v28  ;;  %8661 = vmatpush3.bf16.msra.mxu1 %v10346_v18 }
 0x18d   : > { %8046 = vmatprep.mubr.msk.bf16.mxu0 %vm9542_vm0, %v9541_v30 }
 0x18f   : > { %7811 = vmatmul.mubr.bf16.gmra.mrb[16].mxu1 %v9989_v23  ;;  %v9307_v23 = vld [vmem:[%s11582_s1 + $0x190] sm:$0xff]  }
 0x190   : > { %7814 = vmatprep.mubr.msk.bf16.mxu1 %vm9542_vm0, %v9541_v30 }
 0x194   : > { %8047 = vmatmul.mubr.bf16.gmra.mrb[48].mxu0 %v1799_v15  ;;  %v2761_v15 = vrot.slane %v2759_v20, 1 }
 0x195   : > { %8066 = vmatprep.mubr.msk.bf16.mxu0 %vm9542_vm0, %v9541_v30 }
 0x196   : > { %v10356_v28 = vsel %vm539_vm3, %v2757_v44, %v2761_v15 }
 0x197   : > { %7815 = vmatmul.mubr.bf16.gmra.mrb[20].mxu1 %v9489_v32 }
 0x198   : > { %7818 = vmatprep.mubr.msk.bf16.mxu1 %vm9542_vm0, %v9541_v30 }
 0x19c   : > { %8067 = vmatmul.mubr.bf16.vlgmr.msra.gmra.mrb[0].mxu0 %v2047_v31  ;;  %v9356_v31 = vld [vmem:[%s9640_s28 + $0x3c] sm:$0xff]  }
 0x19d   : > { %8119 = vmatpush3.bf16.msra.mxu0 %v9305_v26  ;;  %8070 = vmatprep.mubr.msk.bf16.mxu0 %vm9542_vm0, %v9541_v30  ;;  %v2763_v26 = vshrl.u32 %v9355_v17, 16  ;;  %v2771_v37 = vshrl.u32 %v9356_v31, 16 }
 0x19e   : > { %8120 = vmatprep.subr.bf16.mxu0 %v9541_v30 }
 0x19f   : > { %7819 = vmatmul.mubr.bf16.gmra.mrb[24].mxu1 %v9490_v4  ;;  %v2765_v27 = vor.u32 %v2763_v26, %v2761_v15  ;;  %v9357_v4 = vld [vmem:[%s9640_s28 + $0x44] sm:$0xff]   ;;  %v2803_v26 = vshrl.u32 %v9360_v1, 16 }
 0x1a0   : > { %7822 = vmatprep.mubr.msk.bf16.mxu1 %vm9542_vm0, %v9541_v30 }
 0x1a1   : > { %8121 = vmatpush3.bf16.msra.mxu0 %v9306_v54  ;;  %v2767_v54 = vshll.u32 %v9356_v31, 16 }
 0x1a2   : > { %8122 = vmatprep.subr.bf16.mxu0 %v9541_v30 }
 0x1a3   : > { %v2769_v32 = vrot.slane %v2767_v54, 1 }
 0x1a4   : > { %8071 = vmatmul.mubr.bf16.gmra.mrb[4].mxu0 %v2049_v13  ;;  %v9323_v13 = vld [vmem:[%s9640_s28 + $0x1c] sm:$0xff]  }
 0x1a5   : > { %8074 = vmatprep.mubr.msk.bf16.mxu0 %vm9542_vm0, %v9541_v30  ;;  %8123 = vmatpush3.bf16.msra.mxu0 %v9307_v23  ;;  %v9327_v23 = vld [vmem:[%s11582_s1 + $0x1d0] sm:$0xff]   ;;  %v10377_v33 = vsel %vm539_vm3, %v2765_v27, %v2769_v32 }
 0x1a6   : > { %8124 = vmatprep.subr.bf16.mxu0 %v9541_v30 }
 0x1a7   : > { %7823 = vmatmul.mubr.bf16.gmra.mrb[28].mxu1 %v9491_v45  ;;  %v9332_v45 = vld [vmem:[%s11582_s1 + $0x1e0] sm:$0xff]  }
 0x1a8   : > { %7826 = vmatprep.mubr.msk.bf16.mxu1 %vm9542_vm0, %v9541_v30 }
 0x1a9   : > { %8125 = vmatpush3.bf16.msra.mxu0 %v9308_v34  ;;  %v3082_v34 = vrot.slane %v9356_v31, 1  ;;  %v9361_v31 = vld [vmem:[%s9640_s28 + $0x64] sm:$0xff]  }
 0x1aa   : > { %8126 = vmatprep.subr.bf16.mxu0 %v9541_v30  ;;  %v2807_v54 = vshll.u32 %v9361_v31, 16 }
 0x1ac   : > { %8075 = vmatmul.mubr.bf16.gmra.mrb[8].mxu0 %v2051_v35  ;;  %v9330_v35 = vld [vmem:[%s11582_s1 + $0x1d8] sm:$0xff]  }
 0x1ad   : > { %8078 = vmatprep.mubr.msk.bf16.mxu0 %vm9542_vm0, %v9541_v30  ;;  %8127 = vmatpush3.bf16.msra.mxu0 %v9309_v38  ;;  %v3083_v38 = vsel %vm11590_vm1, %v3080_v24, %v3082_v34 }
 0x1ae   : > { %8128 = vmatprep.subr.bf16.mxu0 %v9541_v30 }
 0x1af   : > { %7827 = vmatmul.mubr.bf16.gmra.mrb[32].mxu1 %v9492_v49  ;;  %v9335_v49 = vld [vmem:[%s11582_s1 + $0x1e8] sm:$0xff]  }
 0x1b0   : > { %7830 = vmatprep.mubr.msk.bf16.mxu1 %vm9542_vm0, %v9541_v30 }
 0x1b1   : > { %8129 = vmatpush3.bf16.msra.mxu0 %v9311_v39  ;;  %v2773_v39 = vor.u32 %v2771_v37, %v2769_v32 }
 0x1b2   : > { %8130 = vmatprep.subr.bf16.mxu0 %v9541_v30 }
 0x1b4   : > { %8079 = vmatmul.mubr.bf16.gmra.mrb[12].mxu0 %v2053_v41  ;;  %v2775_v41 = vshll.u32 %v9357_v4, 16 }
 0x1b5   : > { %8082 = vmatprep.mubr.msk.bf16.mxu0 %vm9542_vm0, %v9541_v30  ;;  %8131 = vmatpush3.bf16.msra.mxu0 %v9316_v43  ;;  %v9325_v43 = vld [vmem:[%s9640_s28 + $0x24] sm:$0xff]  }
 0x1b6   : > { %8132 = vmatprep.subr.bf16.mxu0 %v9541_v30  ;;  %v2777_v42 = vrot.slane %v2775_v41, 1  ;;  %v9333_v41 = vld [vmem:[%s9640_s28 + $0x4c] sm:$0xff]  }
 0x1b7   : > { %7831 = vmatmul.mubr.bf16.gmra.mrb[36].mxu1 %v9493_v16  ;;  %v2779_v16 = vshrl.u32 %v9357_v4, 16 }
 0x1b8   : > { %7834 = vmatprep.mubr.msk.bf16.mxu1 %vm9542_vm0, %v9541_v30 }
 0x1b9   : > { %8133 = vmatpush3.bf16.msra.mxu0 %v9320_v46  ;;  %v10395_v46 = vsel %vm539_vm3, %v2773_v39, %v2777_v42  ;;  %v2781_v51 = vor.u32 %v2779_v16, %v2777_v42 }
 0x1ba   : > { %8186 = vmatprep.subr.bf16.mxu0 %v9541_v30 }
 0x1bc   : > { %8083 = vmatmul.mubr.bf16.gmra.mrb[16].mxu0 %v2055_v47  ;;  %v3084_v47 = vrot.slane %v9357_v4, 1  ;;  %v2811_v4 = vshrl.u32 %v9361_v31, 16 }
 0x1bd   : > { %8086 = vmatprep.mubr.msk.bf16.mxu0 %vm9542_vm0, %v9541_v30 }
 0x1be   : > { %v3085_v48 = vsel %vm11590_vm1, %v3082_v34, %v3084_v47  ;;  %v3092_v34 = vrot.slane %v9361_v31, 1 }
 0x1bf   : > { %7835 = vmatmul.mubr.bf16.gmra.mrb[40].mxu1 %v9494_v56  ;;  %v9326_v56 = vld [vmem:[%s9640_s28 + $0x2c] sm:$0xff]  }
 0x1c0   : > { %7838 = vmatprep.mubr.msk.bf16.mxu1 %vm9542_vm0, %v9541_v30 }
 0x1c4   : > { %8087 = vmatmul.mubr.bf16.gmra.mrb[20].mxu0 %v2057_v50  ;;  %v9358_v50 = vld [vmem:[%s9640_s28 + $0x4c] sm:$0xff]  }
 0x1c5   : > { %8090 = vmatprep.mubr.msk.bf16.mxu0 %vm9542_vm0, %v9541_v30  ;;  %v3086_v58 = vrot.slane %v9358_v50, 1  ;;  %v2787_v0 = vshrl.u32 %v9358_v50, 16 }
 0x1c7   : > { %7839 = vmatmul.mubr.bf16.gmra.mrb[44].mxu1 %v9495_v7 }
 0x1c8   : > { %7842 = vmatprep.mubr.msk.bf16.mxu1 %vm9542_vm0, %v9541_v30 }
 0x1cc   : > { %8091 = vmatmul.mubr.bf16.gmra.mrb[24].mxu0 %v2059_v52  ;;  %v2783_v52 = vshll.u32 %v9358_v50, 16 }
 0x1cd   : > { %8094 = vmatprep.mubr.msk.bf16.mxu0 %vm9542_vm0, %v9541_v30 }
 0x1cf   : > { %7843 = vmatmul.mubr.bf16.gmra.mrb[48].mxu1 %v6713_v60  ;;  %v3087_v60 = vsel %vm11590_vm1, %v3084_v47, %v3086_v58 }
 0x1d0   : > { %8282 = vmatprep.mubr.msk.bf16.mxu1 %vm9542_vm0, %v9541_v30 }
 0x1d4   : > { %8095 = vmatmul.mubr.bf16.gmra.mrb[28].mxu0 %v2061_v57  ;;  %v2785_v57 = vrot.slane %v2783_v52, 1 }
 0x1d5   : > { %8098 = vmatprep.mubr.msk.bf16.mxu0 %vm9542_vm0, %v9541_v30 }
 0x1d6   : > { %v10413_v7 = vsel %vm539_vm3, %v2781_v51, %v2785_v57  ;;  %v9334_v51 = vld [vmem:[%s9640_s28 + $0x54] sm:$0xff]  }
 0x1d7   : > { %8283 = vmatmul.mubr.bf16.vlgmr.msra.gmra.mrb[52].mxu1 %v3081_v25 }
 0x1d8   : > { %8286 = vmatprep.mubr.msk.bf16.mxu1 %vm9542_vm0, %v9541_v30 }
 0x1dc   : > { %8099 = vmatmul.mubr.bf16.gmra.mrb[32].mxu0 %v2063_v61  ;;  %v9359_v61 = vld [vmem:[%s9640_s28 + $0x54] sm:$0xff]  }
 0x1dd   : > { %8102 = vmatprep.mubr.msk.bf16.mxu0 %vm9542_vm0, %v9541_v30  ;;  %v2791_v63 = vshll.u32 %v9359_v61, 16  ;;  %v3088_v10 = vrot.slane %v9359_v61, 1  ;;  %v2795_v44 = vshrl.u32 %v9359_v61, 16  ;;  %v9543_v61 = vmov 0  }
 0x1de   : > { %9234 = vset.pattern.permute.xlu0 %v9543_v61  ;;  %3809 = vst [vmem:[#allocation3 + $0x64] sm:$0x1] %v9543_v61  ;;  %9235 = vset.pattern.permute.xlu1 %v9543_v61 }
 0x1df   : > { %8287 = vmatmul.mubr.bf16.gmra.mrb[56].mxu1 %v3083_v38  ;;  %v3089_v17 = vsel %vm11590_vm1, %v3086_v58, %v3088_v10  ;;  %v9362_v38 = vld [vmem:[%s9640_s28 + $0x6c] sm:$0xff]   ;;  %v9336_v58 = vld [vmem:[%s9640_s28 + $0x5c] sm:$0xff]  }
 0x1e0   : > { %8290 = vmatprep.mubr.msk.bf16.mxu1 %vm9542_vm0, %v9541_v30  ;;  %v2815_v39 = vshll.u32 %v9362_v38, 16  ;;  %v3094_v42 = vrot.slane %v9362_v38, 1 }
 0x1e2   : > { %v3095_v47 = vsel %vm11590_vm1, %v3092_v34, %v3094_v42 }
 0x1e4   : > { %8103 = vmatmul.mubr.bf16.gmra.mrb[36].mxu0 %v2065_v62  ;;  %v2789_v62 = vor.u32 %v2787_v0, %v2785_v57 }
 0x1e5   : > { %8106 = vmatprep.mubr.msk.bf16.mxu0 %vm9542_vm0, %v9541_v30 }
 0x1e7   : > { %8291 = vmatmul.mubr.bf16.gmra.mrb[60].mxu1 %v3085_v48  ;;  %v2819_v48 = vshrl.u32 %v9362_v38, 16 }
 0x1e8   : > { %8294 = vmatprep.mubr.msk.bf16.mxu1 %vm9542_vm0, %v9541_v30 }
 0x1ec   : > { %8107 = vmatmul.mubr.bf16.gmra.mrb[40].mxu0 %v2067_v19  ;;  %v9328_v19 = vld [vmem:[%s9640_s28 + $0x34] sm:$0xff]  }
 0x1ed   : > { %8110 = vmatprep.mubr.msk.bf16.mxu0 %vm9542_vm0, %v9541_v30 }
 0x1ef   : > { %8295 = vmatmul.mubr.bf16.gmra.mrb[64].mxu1 %v3087_v60 }
 0x1f0   : > { %8298 = vmatprep.mubr.msk.bf16.mxu1 %vm9542_vm0, %v9541_v30 }
 0x1f4   : > { %8111 = vmatmul.mubr.bf16.gmra.mrb[44].mxu0 %v2069_v5 }
 0x1f5   : > { %8114 = vmatprep.mubr.msk.bf16.mxu0 %vm9542_vm0, %v9541_v30 }
 0x1f7   : > { %8299 = vmatmul.mubr.bf16.gmra.mrb[68].mxu1 %v3089_v17  ;;  %v3407_v17 = vld [vmem:[%s11585_s4 + $0x10] sm:$0xff] }
 0x1f8   : > { %8302 = vmatprep.mubr.msk.bf16.mxu1 %vm9542_vm0, %v9541_v30 }
 0x1fc   : > { %8115 = vmatmul.mubr.bf16.gmra.mrb[48].mxu0 %v2068_v36  ;;  %v2793_v36 = vrot.slane %v2791_v63, 1  ;;  %v10495_v63 = vstv %s6936_s15 }
 0x1fd   : > { %8134 = vmatprep.mubr.msk.bf16.mxu0 %vm9542_vm0, %v9541_v30 }
 0x1fe   : > { %v10428_v5 = vsel %vm539_vm3, %v2789_v62, %v2793_v36  ;;  %v2797_v20 = vor.u32 %v2795_v44, %v2793_v36  ;;  %v3405_v62 = vld [vmem:[%s11585_s4] sm:$0xff]  ;;  %v2619_v44 = vld [vmem:[%s9640_s28 + $0x14] sm:$0xf] }
 0x204   : > { %8135 = vmatmul.mubr.bf16.vlgmr.msra.gmra.mrb[0].mxu0 %v9321_v21  ;;  %v2799_v21 = vshll.u32 %v9360_v1, 16 }
 0x205   : > { %8187 = vmatpush3.bf16.msra.mxu0 %v9322_v55  ;;  %8138 = vmatprep.mubr.msk.bf16.mxu0 %vm9542_vm0, %v9541_v30  ;;  %v9329_v55 = vld [vmem:[%s9640_s28 + $0x3c] sm:$0xff]  }
 0x206   : > { %8188 = vmatprep.subr.bf16.mxu0 %v9541_v30  ;;  %v2801_v15 = vrot.slane %v2799_v21, 1  ;;  %v10509_v21 = vld [vmem:[%s9640_s28 + $0x18] sm:$0xf] }
 0x208   : > { %v10438_v24 = vsel %vm539_vm3, %v2797_v20, %v2801_v15  ;;  %v2805_v27 = vor.u32 %v2803_v26, %v2801_v15  ;;  %v3406_v20 = vld [vmem:[%s11585_s4 + $0x8] sm:$0xff] }
 0x209   : > { %8189 = vmatpush3.bf16.msra.mxu0 %v9324_v40  ;;  %v3090_v40 = vrot.slane %v9360_v1, 1  ;;  %v3435_v1 = vadd.s32 %v10495_v63, %v3407_v17  ;;  %v3434_v15 = vadd.s32 %v10495_v63, %v3406_v20  ;;  %v10560_v20 = vld [vmem:[%s9640_s28 + $0x24] sm:$0xff]  }
 0x20a   : > { %8190 = vmatprep.subr.bf16.mxu0 %v9541_v30 }
 0x20b   : > { %v3091_v25 = vsel %vm11590_vm1, %v3088_v10, %v3090_v40  ;;  %v3433_v10 = vadd.s32 %v10495_v63, %v3405_v62  ;;  %vm3460_vm9 = vcmp.ge.s32.totalorder %v3435_v1, 0  ;;  %vm3485_vm10 = vcmp.lt.s32.totalorder %v3435_v1, 16 }
 0x20c   : > { %8139 = vmatmul.mubr.bf16.gmra.mrb[4].mxu0 %v9323_v13  ;;  %8303 = vmatmul.mubr.bf16.gmra.mrb[72].mxu1 %v3091_v25  ;;  %v9331_v13 = vld [vmem:[%s9640_s28 + $0x44] sm:$0xff]   ;;  %vm3510_vm11 = vmand %vm3460_vm9, %vm3485_vm10  ;;  %vm3459_vm12 = vcmp.ge.s32.totalorder %v3434_v15, 0  ;;  %vm3484_vm13 = vcmp.lt.s32.totalorder %v3434_v15, 16 }
 0x20d   : > { %8142 = vmatprep.mubr.msk.bf16.mxu0 %vm9542_vm0, %v9541_v30  ;;  %8191 = vmatpush3.bf16.msra.mxu0 %v9327_v23  ;;  %v2809_v23 = vrot.slane %v2807_v54, 1  ;;  %vm3458_vm6 = vcmp.ge.s32.totalorder %v3433_v10, 0  ;;  %vm3483_vm7 = vcmp.lt.s32.totalorder %v3433_v10, 16  ;;  %v6887_v54 = vcombine.low %v2619_v44, %v10509_v21  ;;  %vm3509_vm14 = vmand %vm3459_vm12, %vm3484_vm13 }
 0x20e   : > { %8192 = vmatprep.subr.bf16.mxu0 %v9541_v30  ;;  %8306 = vmatprep.mubr.msk.bf16.mxu1 %vm9542_vm0, %v9541_v30  ;;  %vm3508_vm8 = vmand %vm3458_vm6, %vm3483_vm7  ;;  %v3534_v38 = vsel %vm3509_vm14, 1, %v9543_v61 }
 0x20f   : > { %v10448_v32 = vsel %vm539_vm3, %v2805_v27, %v2809_v23  ;;  %v2813_v37 = vor.u32 %v2811_v4, %v2809_v23  ;;  %v3535_v27 = vsel %vm3510_vm11, 1, %v9543_v61  ;;  %v3409_v23 = vld [vmem:[%s11585_s4 + $0x20] sm:$0xff] }
 0x210   : > { %3565 = vperm.xlu1 %9235, %v3535_v27   ;;  %v3437_v4 = vadd.s32 %v10495_v63, %v3409_v23  ;;  %v3415_v27 = vld [vmem:[%s11585_s4 + $0x50] sm:$0xff] }
 0x211   : > { %8193 = vmatpush3.bf16.msra.mxu0 %v9330_v35  ;;  %v3093_v35 = vsel %vm11590_vm1, %v3090_v40, %v3092_v34  ;;  %v3408_v40 = vld [vmem:[%s11585_s4 + $0x18] sm:$0xff]  ;;  %v9340_v34 = vld [vmem:[%s9640_s28 + $0x6c] sm:$0xff]  }
 0x212   : > { %8194 = vmatprep.subr.bf16.mxu0 %v9541_v30  ;;  %v3436_v31 = vadd.s32 %v10495_v63, %v3408_v40  ;;  %vm3487_vm9 = vcmp.lt.s32.totalorder %v3437_v4, 16 }
 0x214   : > { %8143 = vmatmul.mubr.bf16.gmra.mrb[8].mxu0 %v9325_v43  ;;  %8307 = vmatmul.mubr.bf16.gmra.mrb[76].mxu1 %v3093_v35  ;;  %v2817_v43 = vrot.slane %v2815_v39, 1  ;;  %vm3461_vm15 = vcmp.ge.s32.totalorder %v3436_v31, 0  ;;  %vm3486_vm6 = vcmp.lt.s32.totalorder %v3436_v31, 16  ;;  %v3410_v39 = vld [vmem:[%s11585_s4 + $0x28] sm:$0xff] }
 0x215   : > { %8146 = vmatprep.mubr.msk.bf16.mxu0 %vm9542_vm0, %v9541_v30  ;;  %8195 = vmatpush3.bf16.msra.mxu0 %v9332_v45  ;;  %vm3511_vm7 = vmand %vm3461_vm15, %vm3486_vm6 }
 0x216   : > { %8196 = vmatprep.subr.bf16.mxu0 %v9541_v30  ;;  %8310 = vmatprep.mubr.msk.bf16.mxu1 %vm9542_vm0, %v9541_v30  ;;  %v10458_v45 = vsel %vm539_vm3, %v2813_v37, %v2817_v43  ;;  %v2821_v50 = vor.u32 %v2819_v48, %v2817_v43  ;;  %v3536_v37 = vsel %vm3511_vm7, 1, %v9543_v61  ;;  %v2730_v43 = vshll.u32 %v6887_v54, 16 }
 0x217   : > { %3568 = vperm.xlu1 %9235, %v3536_v37   ;;  %v3417_v37 = vld [vmem:[%s11585_s4 + $0x60] sm:$0xff] }
 0x219   : > { %8197 = vmatpush3.bf16.msra.mxu0 %v9335_v49  ;;  %v10464_v49 = vld [vmem:[%s9640_s28 + $0x74] sm:$0x1f]  }
 0x21a   : > { %8198 = vmatprep.subr.bf16.mxu0 %v9541_v30  ;;  %v2823_v16 = vshll.u32 %v10464_v49, 16 }
 0x21c   : > { %8147 = vmatmul.mubr.bf16.gmra.mrb[12].mxu0 %v9326_v56  ;;  %8311 = vmatmul.mubr.bf16.gmra.mrb[80].mxu1 %v3095_v47  ;;  %v10470_v52 = vrot.slane %v2823_v16, 1  ;;  %v10540_v47 = vld [vmem:[%s9640_s28 + $0x1c] sm:$0xff]  }
 0x21d   : > { %8150 = vmatprep.mubr.msk.bf16.mxu0 %vm9542_vm0, %v9541_v30  ;;  %8199 = vmatpush3.bf16.msra.mxu0 %v9337_v53  ;;  %v3096_v53 = vrot.slane %v10464_v49, 1  ;;  %v3412_v16 = vld [vmem:[%s11585_s4 + $0x38] sm:$0xff]  ;;  %v2735_v10 = vshll.u32 %v10540_v47, 16  ;;  %v2739_v23 = vshrl.u32 %v10540_v47, 16 }
 0x21e   : > { %8200 = vmatprep.subr.bf16.mxu0 %v9541_v30  ;;  %8314 = vmatprep.mubr.msk.bf16.mxu1 %vm9542_vm0, %v9541_v30  ;;  %v10474_v56 = vsel %vm539_vm3, %v2821_v50, %v10470_v52 }
 0x21f   : > { %v3097_v57 = vsel %vm11590_vm1, %v3094_v42, %v3096_v53  ;;  %v3411_v42 = vld [vmem:[%s11585_s4 + $0x30] sm:$0xff]  ;;  %v2737_v40 = vrot.slane %v2735_v10, 1 }
 0x220   : > { %v3439_v50 = vadd.s32 %v10495_v63, %v3411_v42 }
 0x221   : > { %8201 = vmatpush3.bf16.msra.mxu0 %v9341_v59 }
 0x222   : > { %8254 = vmatprep.subr.bf16.mxu0 %v9541_v30  ;;  %vm3464_vm14 = vcmp.ge.s32.totalorder %v3439_v50, 0  ;;  %vm3489_vm15 = vcmp.lt.s32.totalorder %v3439_v50, 16 }
 0x223   : > { %vm3514_vm6 = vmand %vm3464_vm14, %vm3489_vm15 }
 0x224   : > { %8151 = vmatmul.mubr.bf16.gmra.mrb[16].mxu0 %v9328_v19  ;;  %8315 = vmatmul.mubr.bf16.gmra.mrb[84].mxu1 %v3097_v57  ;;  %v9338_v19 = vld [vmem:[%s9640_s28 + $0x64] sm:$0xff]   ;;  %v3539_v1 = vsel %vm3514_vm6, 1, %v9543_v61 }
 0x225   : > { %8154 = vmatprep.mubr.msk.bf16.mxu0 %vm9542_vm0, %v9541_v30  ;;  %8318 = vmatprep.mubr.msk.bf16.mxu1 %vm9542_vm0, %v9541_v30 }
 0x22c   : > { %8155 = vmatmul.mubr.bf16.gmra.mrb[20].mxu0 %v9329_v55  ;;  %8319 = vmatmul.mubr.bf16.gmra.mrb[88].mxu1 %v3096_v53  ;;  %v3533_v55 = vsel %vm3508_vm8, 1, %v9543_v61  ;;  %vm3462_vm8 = vcmp.ge.s32.totalorder %v3437_v4, 0  ;;  %v3440_v53 = vadd.s32 %v10495_v63, %v3412_v16  ;;  %v3420_v16 = vld [vmem:[%s11585_s4 + $0x78] sm:$0xff] }
 0x22d   : > { %8158 = vmatprep.mubr.msk.bf16.mxu0 %vm9542_vm0, %v9541_v30  ;;  %3559 = vperm.xlu0 %9234, %v3533_v55   ;;  %vm3512_vm10 = vmand %vm3462_vm8, %vm3487_vm9  ;;  %v3413_v55 = vld [vmem:[%s11585_s4 + $0x40] sm:$0xff]  ;;  %v3448_v10 = vadd.s32 %v10495_v63, %v3420_v16 }
 0x22e   : > { %v3537_v48 = vsel %vm3512_vm10, 1, %v9543_v61  ;;  %vm3465_vm7 = vcmp.ge.s32.totalorder %v3440_v53, 0  ;;  %vm3490_vm8 = vcmp.lt.s32.totalorder %v3440_v53, 16  ;;  %v3441_v31 = vadd.s32 %v10495_v63, %v3413_v55 }
 0x22f   : > { %vm3515_vm9 = vmand %vm3465_vm7, %vm3490_vm8  ;;  %v2743_v53 = vshll.u32 %v10560_v20, 16  ;;  %v2741_v55 = vor.u32 %v2739_v23, %v2737_v40 }
 0x230   : > { %v3540_v44 = vsel %vm3515_vm9, 1, %v9543_v61  ;;  %vm3466_vm10 = vcmp.ge.s32.totalorder %v3441_v31, 0 }
 0x231   : > { %3562 = vperm.xlu0 %9234, %v3534_v38   ;;  %v3443_v38 = vadd.s32 %v10495_v63, %v3415_v27 }
 0x233   : > { %vm3468_vm15 = vcmp.ge.s32.totalorder %v3443_v38, 0  ;;  %vm3493_vm6 = vcmp.lt.s32.totalorder %v3443_v38, 16 }
 0x234   : > { %8159 = vmatmul.mubr.bf16.gmra.mrb[24].mxu0 %v9331_v13 }
 0x235   : > { %8162 = vmatprep.mubr.msk.bf16.mxu0 %vm9542_vm0, %v9541_v30  ;;  %3571 = vperm.xlu0 %9234, %v3537_v48   ;;  %v3419_v48 = vld [vmem:[%s11585_s4 + $0x70] sm:$0xff] }
 0x239   : > { %3577 = vperm.xlu0 %9234, %v3539_v1  }
 0x23c   : > { %8163 = vmatmul.mubr.bf16.gmra.mrb[28].mxu0 %v9333_v41  ;;  %v3438_v41 = vadd.s32 %v10495_v63, %v3410_v39  ;;  %v3418_v39 = vld [vmem:[%s11585_s4 + $0x68] sm:$0xff] }
 0x23d   : > { %8166 = vmatprep.mubr.msk.bf16.mxu0 %vm9542_vm0, %v9541_v30  ;;  %v3446_v42 = vadd.s32 %v10495_v63, %v3418_v39 }
 0x23e   : > { %vm3463_vm11 = vcmp.ge.s32.totalorder %v3438_v41, 0  ;;  %vm3488_vm12 = vcmp.lt.s32.totalorder %v3438_v41, 16 }
 0x23f   : > { %vm3513_vm13 = vmand %vm3463_vm11, %vm3488_vm12  ;;  %vm3491_vm11 = vcmp.lt.s32.totalorder %v3441_v31, 16  ;;  %vm3471_vm5 = vcmp.ge.s32.totalorder %v3446_v42, 0  ;;  %vm3496_vm1 = vcmp.lt.s32.totalorder %v3446_v42, 16  ;;  %v2747_v42 = vshrl.u32 %v10560_v20, 16 }
 0x240   : > { %vm3516_vm12 = vmand %vm3466_vm10, %vm3491_vm11 }
 0x241   : > { %vm3518_vm10 = vmand %vm3468_vm15, %vm3493_vm6 }
 0x242   : > { %v10485_v59 = vpop.f32.mrb[0].mxu1  ;;  %v3543_v1 = vsel %vm3518_vm10, 1, %v9543_v61 }
 0x243   : > { %v7796_v60 = vpop.f32.mrb[1].mxu1 }
 0x244   : > { %8167 = vmatmul.mubr.bf16.gmra.mrb[32].mxu0 %v9334_v51  ;;  %v10490_v0 = vpop.f32.mrb[2].mxu1  ;;  %v9342_v60 = vld [vmem:[%s9640_s28 + $0x74] ss:$0 sps:$4 sm:$0xff]  }
 0x245   : > { %8170 = vmatprep.mubr.msk.bf16.mxu0 %vm9542_vm0, %v9541_v30  ;;  %v7797_v36 = vpop.f32.mrb[3].mxu1 }
 0x246   : > { %v2732_v36 = vrot.slane %v2730_v43, 1  ;;  %v3445_v43 = vadd.s32 %v10495_v63, %v3417_v37  ;;  %v3424_v37 = vld [vmem:[%s11585_s4 + $0x98] sm:$0xff] }
 0x247   : > { %v3452_v16 = vadd.s32 %v10495_v63, %v3424_v37 }
 0x248   : > { %vm3470_vm11 = vcmp.ge.s32.totalorder %v3445_v43, 0  ;;  %vm3495_vm4 = vcmp.lt.s32.totalorder %v3445_v43, 16 }
 0x24a   : > { %v10518_v25 = vpop.f32.mrb[4].mxu1 }
 0x24b   : > { %v7800_v26 = vpop.f32.mrb[5].mxu1 }
 0x24c   : > { %8171 = vmatmul.mubr.bf16.gmra.mrb[36].mxu0 %v9336_v58  ;;  %v10523_v13 = vpop.f32.mrb[6].mxu1  ;;  %v3538_v58 = vsel %vm3513_vm13, 1, %v9543_v61  ;;  %v3414_v26 = vld [vmem:[%s11585_s4 + $0x48] sm:$0xff] }
 0x24d   : > { %8174 = vmatprep.mubr.msk.bf16.mxu0 %vm9542_vm0, %v9541_v30  ;;  %v7801_v35 = vpop.f32.mrb[7].mxu1  ;;  %3574 = vperm.xlu1 %9235, %v3538_v58   ;;  %v3541_v58 = vsel %vm3516_vm12, 1, %v9543_v61  ;;  %vm10614_vm12 = vmand %vm3470_vm11, %vm3495_vm4  ;;  %vm3498_vm4 = vcmp.lt.s32.totalorder %v3448_v10, 16 }
 0x24e   : > { %v3442_v35 = vadd.s32 %v10495_v63, %v3414_v26  ;;  %3583 = vperm.xlu0 %9234, %v3541_v58  }
 0x250   : > { %vm3467_vm13 = vcmp.ge.s32.totalorder %v3442_v35, 0  ;;  %vm3492_vm14 = vcmp.lt.s32.totalorder %v3442_v35, 16  ;;  %v3423_v35 = vld [vmem:[%s11585_s4 + $0x90] sm:$0xff] }
 0x251   : > { %3580 = vperm.xlu1 %9235, %v3540_v44   ;;  %vm3517_vm7 = vmand %vm3467_vm13, %vm3492_vm14  ;;  %v3422_v44 = vld [vmem:[%s11585_s4 + $0x88] sm:$0xff] }
 0x252   : > { %v10549_v51 = vpop.f32.mrb[8].mxu1  ;;  %vm10624_vm13 = vmand %vm3471_vm5, %vm3496_vm1  ;;  %3589 = vperm.xlu0 %9234, %v3543_v1  }
 0x253   : > { %v7804_v57 = vpop.f32.mrb[9].mxu1  ;;  %v3546_v43 = vsel %vm10624_vm13, 1, %v9543_v61 }
 0x254   : > { %8175 = vmatmul.mubr.bf16.gmra.mrb[40].mxu0 %v9338_v19  ;;  %v10554_v62 = vpop.f32.mrb[10].mxu1  ;;  %v2728_v19 = vshrl.u32 %v6887_v54, 16  ;;  %v3416_v54 = vld [vmem:[%s11585_s4 + $0x58] sm:$0xff] }
 0x255   : > { %8178 = vmatprep.mubr.msk.bf16.mxu0 %vm9542_vm0, %v9541_v30  ;;  %v7805_v17 = vpop.f32.mrb[11].mxu1  ;;  %v3444_v4 = vadd.s32 %v10495_v63, %v3416_v54 }
 0x256   : > { %v2733_v15 = vor.u32 %v2732_v36, %v2728_v19  ;;  %v3542_v19 = vsel %vm3517_vm7, 1, %v9543_v61  ;;  %v3447_v36 = vadd.s32 %v10495_v63, %v3419_v48  ;;  %v3421_v17 = vld [vmem:[%s11585_s4 + $0x80] sm:$0xff]  ;;  %v3451_v48 = vadd.s32 %v10495_v63, %v3423_v35 }
 0x257   : > { %vm3469_vm8 = vcmp.ge.s32.totalorder %v3444_v4, 0  ;;  %vm3494_vm9 = vcmp.lt.s32.totalorder %v3444_v4, 16  ;;  %3586 = vperm.xlu1 %9235, %v3542_v19   ;;  %v3545_v4 = vsel %vm10614_vm12, 1, %v9543_v61  ;;  %v3429_v35 = vld [vmem:[%s11585_s4 + $0xc0] sm:$0xff] }
 0x258   : > { %vm3519_vm2 = vmand %vm3469_vm8, %vm3494_vm9  ;;  %vm3472_vm14 = vcmp.ge.s32.totalorder %v3447_v36, 0  ;;  %vm3497_vm15 = vcmp.lt.s32.totalorder %v3447_v36, 16  ;;  %3595 = vperm.xlu0 %9234, %v3545_v4   ;;  %vm3476_vm12 = vcmp.ge.s32.totalorder %v3451_v48, 0  ;;  %vm3501_vm13 = vcmp.lt.s32.totalorder %v3451_v48, 16 }
 0x259   : > { %v3544_v31 = vsel %vm3519_vm2, 1, %v9543_v61  ;;  %vm3473_vm2 = vcmp.ge.s32.totalorder %v3448_v10, 0  ;;  %vm3522_vm1 = vmand %vm3472_vm14, %vm3497_vm15  ;;  %vm3477_vm14 = vcmp.ge.s32.totalorder %v3452_v16, 0  ;;  %vm3502_vm15 = vcmp.lt.s32.totalorder %v3452_v16, 16 }
 0x25a   : > { %vm3523_vm5 = vmand %vm3473_vm2, %vm3498_vm4  ;;  %v3457_v37 = vadd.s32 %v10495_v63, %v3429_v35 }
 0x25b   : > { %3592 = vperm.xlu1 %9235, %v3544_v31   ;;  %v3548_v58 = vsel %vm3523_vm5, 1, %v9543_v61  ;;  %v3428_v31 = vld [vmem:[%s11585_s4 + $0xb8] sm:$0xff]  ;;  %vm3526_vm2 = vmand %vm3476_vm12, %vm3501_vm13 }
 0x25c   : > { %8179 = vmatmul.mubr.bf16.gmra.mrb[44].mxu0 %v9340_v34  ;;  %v10578_v34 = vpop.f32.mrb[12].mxu1  ;;  %vm3527_vm4 = vmand %vm3477_vm14, %vm3502_vm15 }
 0x25d   : > { %8182 = vmatprep.mubr.msk.bf16.mxu0 %vm9542_vm0, %v9541_v30  ;;  %v7808_v41 = vpop.f32.mrb[13].mxu1 }
 0x25e   : > { %v10594_v50 = vpop.f32.mrb[14].mxu1 }
 0x25f   : > { %v7809_v57 = vpop.f32.mrb[15].mxu1  ;;  %3598 = vperm.xlu1 %9235, %v3546_v43  }
 0x260   : > { %v3426_v57 = vld [vmem:[%s11585_s4 + $0xa8] sm:$0xff] }
 0x262   : > { %v10621_v27 = vpop.f32.mrb[16].mxu1 }
 0x263   : > { %v7812_v23 = vpop.f32.mrb[17].mxu1  ;;  %3604 = vperm.xlu1 %9235, %v3548_v58  }
 0x264   : > { %8183 = vmatmul.mubr.bf16.gmra.mrb[48].mxu0 %v9342_v60  ;;  %v2738_v60 = vsel %vm539_vm3, %v2733_v15, %v2737_v40  ;;  %v2745_v15 = vrot.slane %v2743_v53, 1  ;;  %v3449_v40 = vadd.s32 %v10495_v63, %v3421_v17  ;;  %v10634_v38 = vpop.f32.mrb[18].mxu1  ;;  %v3425_v53 = vld [vmem:[%s11585_s4 + $0xa0] sm:$0xff] }
 0x265   : > { %8202 = vmatprep.mubr.msk.bf16.mxu0 %vm9542_vm0, %v9541_v30  ;;  %v7813_v41 = vpop.f32.mrb[19].mxu1  ;;  %v3453_v17 = vadd.s32 %v10495_v63, %v3425_v53 }
 0x266   : > { %v2746_v39 = vsel %vm539_vm3, %v2741_v55, %v2745_v15  ;;  %vm3474_vm6 = vcmp.ge.s32.totalorder %v3449_v40, 0  ;;  %vm3499_vm7 = vcmp.lt.s32.totalorder %v3449_v40, 16  ;;  %v2749_v19 = vor.u32 %v2747_v42, %v2745_v15 }
 0x267   : > { %vm10661_vm10 = vmand %vm3474_vm6, %vm3499_vm7  ;;  %vm3503_vm5 = vcmp.lt.s32.totalorder %v3453_v17, 16 }
 0x268   : > { %v3549_v15 = vsel %vm10661_vm10, 1, %v9543_v61  ;;  %v2754_v40 = vsel %vm539_vm3, %v2749_v19, %v10338_v14  ;;  %v3551_v14 = vsel %vm3526_vm2, 1, %v9543_v61  ;;  %vm3482_vm2 = vcmp.ge.s32.totalorder %v3457_v37, 0 }
 0x26a   : > { %v10668_v36 = vpop.f32.mrb[20].mxu1 }
 0x26b   : > { %v7816_v1 = vpop.f32.mrb[21].mxu1 }
 0x26c   : > { %8203 = vmatmul.mubr.bf16.vlgmr.msra.gmra.mrb[0].mxu0 %v2738_v60  ;;  %v10680_v55 = vpop.f32.mrb[22].mxu1 }
 0x26d   : > { %8255 = vmatpush3.bf16.msra.mxu0 %v10278_v8  ;;  %8206 = vmatprep.mubr.msk.bf16.mxu0 %vm9542_vm0, %v9541_v30  ;;  %v3450_v8 = vadd.s32 %v10495_v63, %v3422_v44  ;;  %v3454_v44 = vadd.s32 %v10495_v63, %v3426_v57  ;;  %v7817_v26 = vpop.f32.mrb[23].mxu1 }
 0x26e   : > { %8256 = vmatprep.subr.bf16.mxu0 %v9541_v30 }
 0x26f   : > { %vm3475_vm8 = vcmp.ge.s32.totalorder %v3450_v8, 0  ;;  %vm3500_vm9 = vcmp.lt.s32.totalorder %v3450_v8, 16  ;;  %vm3479_vm6 = vcmp.ge.s32.totalorder %v3454_v44, 0  ;;  %vm3504_vm7 = vcmp.lt.s32.totalorder %v3454_v44, 16 }
 0x270   : > { %vm10670_vm11 = vmand %vm3475_vm8, %vm3500_vm9  ;;  %v3456_v8 = vadd.s32 %v10495_v63, %v3428_v31 }
 0x271   : > { %8257 = vmatpush3.bf16.msra.mxu0 %v10287_v22  ;;  %v3547_v22 = vsel %vm3522_vm1, 1, %v9543_v61  ;;  %v3550_v54 = vsel %vm10670_vm11, 1, %v9543_v61  ;;  %vm3478_vm1 = vcmp.ge.s32.totalorder %v3453_v17, 0  ;;  %vm3529_vm9 = vmand %vm3479_vm6, %vm3504_vm7 }
 0x272   : > { %8258 = vmatprep.subr.bf16.mxu0 %v9541_v30  ;;  %3601 = vperm.xlu0 %9234, %v3547_v22   ;;  %vm3528_vm8 = vmand %vm3478_vm1, %vm3503_vm5  ;;  %v10707_v4 = vpop.f32.mrb[24].mxu1  ;;  %vm3481_vm12 = vcmp.ge.s32.totalorder %v3456_v8, 0  ;;  %vm3506_vm13 = vcmp.lt.s32.totalorder %v3456_v8, 16  ;;  %v3074_v8 = vrot.slane %v10540_v47, 1  ;;  %vm11600_vm5 = vcmask 1046528  }
 0x273   : > { %3610 = vperm.xlu1 %9235, %v3550_v54   ;;  %v3553_v43 = vsel %vm3528_vm8, 1, %v9543_v61  ;;  %vm3531_vm15 = vmand %vm3481_vm12, %vm3506_vm13 }
 0x274   : > { %8207 = vmatmul.mubr.bf16.gmra.mrb[4].mxu0 %v2746_v39  ;;  %v7820_v39 = vpop.f32.mrb[25].mxu1  ;;  %v3556_v48 = vsel %vm3531_vm15, 1, %v9543_v61  ;;  %vm11601_vm6 = vmmov %vm11600_vm5  ;;  %vm11606_vm15 = vcmask 1044480  }
 0x275   : > { %8210 = vmatprep.mubr.msk.bf16.mxu0 %vm9542_vm0, %v9541_v30  ;;  %8259 = vmatpush3.bf16.msra.mxu0 %v10299_v2  ;;  %v3427_v2 = vld [vmem:[%s11585_s4 + $0xb0] sm:$0xff]  ;;  %v10711_v41 = vpop.f32.mrb[26].mxu1  ;;  %vm11602_vm7 = vmmov %vm11600_vm5 }
 0x276   : > { %8260 = vmatprep.subr.bf16.mxu0 %v9541_v30  ;;  %v3455_v23 = vadd.s32 %v10495_v63, %v3427_v2  ;;  %3607 = vperm.xlu0 %9234, %v3549_v15   ;;  %v7821_v42 = vpop.f32.mrb[27].mxu1 }
 0x278   : > { %vm3480_vm10 = vcmp.ge.s32.totalorder %v3455_v23, 0  ;;  %vm3505_vm11 = vcmp.lt.s32.totalorder %v3455_v23, 16 }
 0x279   : > { %8261 = vmatpush3.bf16.msra.mxu0 %v10305_v3  ;;  %v3552_v3 = vsel %vm3527_vm4, 1, %v9543_v61  ;;  %vm3530_vm14 = vmand %vm3480_vm10, %vm3505_vm11  ;;  %vm3507_vm4 = vcmp.lt.s32.totalorder %v3457_v37, 16 }
 0x27a   : > { %8262 = vmatprep.subr.bf16.mxu0 %v9541_v30  ;;  %3613 = vperm.xlu0 %9234, %v3551_v14   ;;  %v3555_v63 = vsel %vm3530_vm14, 1, %v9543_v61  ;;  %vm3532_vm1 = vmand %vm3482_vm2, %vm3507_vm4 }
 0x27b   : > { %3616 = vperm.xlu1 %9235, %v3552_v3   ;;  %v3557_v22 = vsel %vm3532_vm1, 1, %v9543_v61 }
 0x27c   : > { %8211 = vmatmul.mubr.bf16.gmra.mrb[8].mxu0 %v2754_v40  ;;  %v3052_v40 = vld [vmem:[%s9640_s28 + $0x14] sm:$0xe] }
 0x27d   : > { %8214 = vmatprep.mubr.msk.bf16.mxu0 %vm9542_vm0, %v9541_v30  ;;  %8263 = vmatpush3.bf16.msra.mxu0 %v10314_v6  ;;  %v3554_v6 = vsel %vm3529_vm9, 1, %v9543_v61 }
 0x27e   : > { %8264 = vmatprep.subr.bf16.mxu0 %v9541_v30  ;;  %3619 = vperm.xlu0 %9234, %v3553_v43  }
 0x27f   : > { %3622 = vperm.xlu1 %9235, %v3554_v6  }
 0x281   : > { %8265 = vmatpush3.bf16.msra.mxu0 %v10325_v11  ;;  %v10723_v11 = vpop.f32.mrb[28].mxu1 }
 0x282   : > { %8266 = vmatprep.subr.bf16.mxu0 %v9541_v30  ;;  %v7824_v16 = vpop.f32.mrb[29].mxu1  ;;  %3625 = vperm.xlu0 %9234, %v3555_v63  }
 0x283   : > { %v10726_v53 = vpop.f32.mrb[30].mxu1  ;;  %3628 = vperm.xlu1 %9235, %v3556_v48  }
 0x284   : > { %8215 = vmatmul.mubr.bf16.gmra.mrb[12].mxu0 %v10356_v28  ;;  %v7825_v28 = vpop.f32.mrb[31].mxu1 }
 0x285   : > { %8218 = vmatprep.mubr.msk.bf16.mxu0 %vm9542_vm0, %v9541_v30  ;;  %8267 = vmatpush3.bf16.msra.mxu0 %v10334_v12  ;;  %v10733_v12 = vpop.f32.mrb[32].mxu1 }
 0x286   : > { %8268 = vmatprep.subr.bf16.mxu0 %v9541_v30  ;;  %3631 = vperm.xlu0 %9234, %v3557_v22   ;;  %v7828_v57 = vpop.f32.mrb[33].mxu1 }
 0x287   : > { %v10735_v58 = vpop.f32.mrb[34].mxu1 }
 0x288   : > { %v7829_v60 = vpop.f32.mrb[35].mxu1 }
 0x289   : > { %8269 = vmatpush3.bf16.msra.mxu0 %v10346_v18 }
 0x28a   : > { %v10740_v61 = vpop.f32.mrb[36].mxu1 }
 0x28b   : > { %v7832_v18 = vpop.f32.mrb[37].mxu1 }
 0x28c   : > { %8219 = vmatmul.mubr.bf16.gmra.mrb[16].mxu0 %v10377_v33  ;;  %v10742_v19 = vpop.f32.mrb[38].mxu1 }
 0x28d   : > { %8222 = vmatprep.mubr.msk.bf16.mxu0 %vm9542_vm0, %v9541_v30  ;;  %v7833_v33 = vpop.f32.mrb[39].mxu1 }
 0x292   : > { %v10747_v10 = vpop.f32.mrb[40].mxu1 }
 0x293   : > { %v7836_v17 = vpop.f32.mrb[41].mxu1 }
 0x294   : > { %8223 = vmatmul.mubr.bf16.gmra.mrb[20].mxu0 %v10395_v46  ;;  %v10749_v1 = vpop.f32.mrb[42].mxu1 }
 0x295   : > { %8226 = vmatprep.mubr.msk.bf16.mxu0 %vm9542_vm0, %v9541_v30  ;;  %v7837_v46 = vpop.f32.mrb[43].mxu1 }
 0x29a   : > { %v10754_v44 = vpop.f32.mrb[44].mxu1 }
 0x29b   : > { %v7840_v2 = vpop.f32.mrb[45].mxu1 }
 0x29c   : > { %8227 = vmatmul.mubr.bf16.gmra.mrb[24].mxu0 %v10413_v7  ;;  %v10756_v15 = vpop.f32.mrb[46].mxu1  ;;  %v9365_v2 = vld [vmem:[%s11583_s2 + $0x40] sm:$0xff]  }
 0x29d   : > { %8230 = vmatprep.mubr.msk.bf16.mxu0 %vm9542_vm0, %v9541_v30  ;;  %v7841_v7 = vpop.f32.mrb[47].mxu1  ;;  %8322 = vmatprep.subr.bf16.mxu1 %v9365_v2 }
 0x29e   : > { %8323 = vmatpush3.bf16.msra.mxu1 %v9365_v2 }
 0x2a2   : > { %v10761_v31 = vpop.f32.mrb[48].mxu1 }
 0x2a3   : > { %v7844_v26 = vpop.f32.mrb[49].mxu1 }
 0x2a4   : > { %8231 = vmatmul.mubr.bf16.gmra.mrb[28].mxu0 %v10428_v5  ;;  %v1035_v54 = vpop.f32.mrb[50].mxu1 }
 0x2a5   : > { %8234 = vmatprep.mubr.msk.bf16.mxu0 %vm9542_vm0, %v9541_v30  ;;  %v7845_v5 = vpop.f32.mrb[51].mxu1 }
 0x2ac   : > { %8235 = vmatmul.mubr.bf16.gmra.mrb[32].mxu0 %v10438_v24  ;;  %v2827_v24 = vshrl.u32 %v10464_v49, 16  ;;  %v3076_v49 = vrot.slane %v10560_v20, 1 }
 0x2ad   : > { %8238 = vmatprep.mubr.msk.bf16.mxu0 %vm9542_vm0, %v9541_v30 }
 0x2ae   : > { %v2829_v23 = vor.u32 %v2827_v24, %v10470_v52  ;;  %v10784_v52 = vpop.f32.mrb[52].mxu1  ;;  %v3079_v47 = vsel %vm11602_vm7, %v3076_v49, %v3078_v29  ;;  %v9366_v24 = vld [vmem:[%s11583_s2 + $0x48] sm:$0xff]  }
 0x2af   : > { %8324 = vmatprep.subr.bf16.mxu1 %v9366_v24 }
 0x2b0   : > { %8325 = vmatpush3.bf16.msra.mxu1 %v9366_v24 }
 0x2b4   : > { %8239 = vmatmul.mubr.bf16.gmra.mrb[36].mxu0 %v10448_v32  ;;  %v6924_v32 = vcombine.low %v3052_v40, %v10509_v21  ;;  %v8284_v21 = vpop.f32.mrb[53].mxu1 }
 0x2b5   : > { %8242 = vmatprep.mubr.msk.bf16.mxu0 %vm9542_vm0, %v9541_v30  ;;  %v10786_v14 = vpop.f32.mrb[54].mxu1 }
 0x2b6   : > { %v8285_v3 = vpop.f32.mrb[55].mxu1 }
 0x2b7   : > { %v10793_v37 = vpop.f32.mrb[56].mxu1 }
 0x2b8   : > { %v8288_v39 = vpop.f32.mrb[57].mxu1 }
 0x2b9   : > { %v10795_v20 = vpop.f32.mrb[58].mxu1 }
 0x2ba   : > { %v8289_v43 = vpop.f32.mrb[59].mxu1 }
 0x2bb   : > { %v10797_v42 = vpop.f32.mrb[60].mxu1 }
 0x2bc   : > { %8243 = vmatmul.mubr.bf16.gmra.mrb[40].mxu0 %v10458_v45  ;;  %v3073_v45 = vrot.slane %v6924_v32, 1  ;;  %v8292_v6 = vpop.f32.mrb[61].mxu1 }
 0x2bd   : > { %8246 = vmatprep.mubr.msk.bf16.mxu0 %vm9542_vm0, %v9541_v30  ;;  %v10799_v63 = vpop.f32.mrb[62].mxu1  ;;  %v9368_v6 = vld [vmem:[%s11583_s2 + $0x58] sm:$0xff]  }
 0x2be   : > { %v3075_v35 = vsel %vm11600_vm5, %v3073_v45, %v3074_v8  ;;  %v8293_v48 = vpop.f32.mrb[63].mxu1 }
 0x2bf   : > { %v9369_v48 = vld [vmem:[%s11583_s2 + $0x60] sm:$0xff]  }
 0x2c2   : > { %v10801_v16 = vpop.f32.mrb[64].mxu1 }
 0x2c4   : > { %8247 = vmatmul.mubr.bf16.gmra.mrb[44].mxu0 %v10474_v56  ;;  %v3077_v56 = vsel %vm11601_vm6, %v3074_v8, %v3076_v49 }
 0x2c5   : > { %8250 = vmatprep.mubr.msk.bf16.mxu0 %vm9542_vm0, %v9541_v30 }
 0x2cc   : > { %8251 = vmatmul.mubr.bf16.gmra.mrb[48].mxu0 %v2829_v23 }
 0x2cd   : > { %8270 = vmatprep.mubr.msk.bf16.mxu0 %vm9542_vm0, %v9541_v30 }
 0x2d4   : > { %8271 = vmatmul.mubr.bf16.vlgmr.msra.gmra.mrb[0].mxu0 %v3075_v35  ;;  %v9367_v35 = vld [vmem:[%s11583_s2 + $0x50] sm:$0xff]  }
 0x2d5   : > { %8274 = vmatprep.mubr.msk.bf16.mxu0 %vm9542_vm0, %v9541_v30  ;;  %8326 = vmatprep.subr.bf16.mxu1 %v9367_v35 }
 0x2d6   : > { %8327 = vmatpush3.bf16.msra.mxu1 %v9367_v35 }
 0x2d7   : > { %8328 = vmatprep.subr.bf16.mxu1 %v9368_v6 }
 0x2da   : > { %8329 = vmatpush3.bf16.msra.mxu1 %v9368_v6  ;;  %v10880_v6 = vld [vmem:[%s11584_s3 + $0x1] ss:$0 sm:$0xff] }
 0x2db   : > { %8330 = vmatprep.subr.bf16.mxu1 %v9369_v48 }
 0x2dc   : > { %8275 = vmatmul.mubr.bf16.gmra.mrb[4].mxu0 %v3077_v56 }
 0x2dd   : > { %8278 = vmatprep.mubr.msk.bf16.mxu0 %vm9542_vm0, %v9541_v30  ;;  %v8296_v30 = vpop.f32.mrb[65].mxu1 }
 0x2de   : > { %v10803_v22 = vpop.f32.mrb[66].mxu1  ;;  %8331 = vmatpush3.bf16.msra.mxu1 %v9369_v48  ;;  %v9370_v30 = vld [vmem:[%s11583_s2 + $0x68] sm:$0xff]  }
 0x2df   : > { %v8297_v9 = vpop.f32.mrb[67].mxu1  ;;  %8332 = vmatprep.subr.bf16.mxu1 %v9370_v30 }
 0x2e0   : > { %v10805_v29 = vpop.f32.mrb[68].mxu1  ;;  %v9371_v9 = vld [vmem:[%s11583_s2 + $0x70] sm:$0xff]  }
 0x2e1   : > { %v8300_v28 = vpop.f32.mrb[69].mxu1 }
 0x2e2   : > { %v10807_v57 = vpop.f32.mrb[70].mxu1  ;;  %8333 = vmatpush3.bf16.msra.mxu1 %v9370_v30  ;;  %v9372_v28 = vld [vmem:[%s11583_s2 + $0x78] sm:$0xff]  }
 0x2e3   : > { %v8301_v60 = vpop.f32.mrb[71].mxu1  ;;  %8334 = vmatprep.subr.bf16.mxu1 %v9371_v9 }
 0x2e4   : > { %8279 = vmatmul.mubr.bf16.gmra.mrb[8].mxu0 %v3079_v47  ;;  %v10809_v18 = vpop.f32.mrb[72].mxu1  ;;  %v10851_v60 = vpop.permute.xlu0 %3559 }
 0x2e5   : > { %v8304_v33 = vpop.f32.mrb[73].mxu1 }
 0x2e6   : > { %v10811_v17 = vpop.f32.mrb[74].mxu1  ;;  %8335 = vmatpush3.bf16.msra.mxu1 %v9371_v9  ;;  %v10853_v33 = vpop.permute.xlu1 %3565 }
 0x2e7   : > { %v8305_v46 = vpop.f32.mrb[75].mxu1  ;;  %8336 = vmatprep.subr.bf16.mxu1 %v9372_v28 }
 0x2e8   : > { %v10816_v7 = vpop.f32.mrb[76].mxu1  ;;  %v10855_v46 = vpop.permute.xlu0 %3562 }
 0x2e9   : > { %v8308_v26 = vpop.f32.mrb[77].mxu1 }
 0x2ea   : > { %v10818_v54 = vpop.f32.mrb[78].mxu1  ;;  %8337 = vmatpush3.bf16.msra.mxu1 %v9372_v28  ;;  %v10857_v2 = vpop.permute.xlu1 %3568  ;;  %v10862_v26 = vld [vmem:[%s11583_s2] sm:$0xff]  }
 0x2eb   : > { %v8309_v5 = vpop.f32.mrb[79].mxu1  ;;  %11603 = vst [vmem:[#allocation8_spill] sm:$0xff] %v10862_v26  ;;  %8358 = vmatprep.subr.bf16.mxu1 %v10862_v26 }
 0x2ec   : > { %v10865_v24 = vpop.permute.xlu0 %3571 }
 0x2ed   : > { %11604 = vst [vmem:[#allocation9_spill] sm:$0xff] %v10865_v24 }
 0x2ee   : > { %v10868_v35 = vpop.permute.xlu1 %3574 }
 0x2ef   : > { %v10823_v40 = vpop.f32.mrb[80].mxu1  ;;  %11605 = vst [vmem:[#allocation10_spill] sm:$0xff] %v10868_v35 }
 0x2f0   : > { %v8312_v23 = vpop.f32.mrb[81].mxu1  ;;  %v3578_v9 = vpop.permute.xlu0 %3577 }
 0x2f1   : > { %v10825_v32 = vpop.f32.mrb[82].mxu1  ;;  %vm3639_vm0 = vcmp.eq.s32.totalorder %v3578_v9, 1 }
 0x2f2   : > { %v8313_v45 = vpop.f32.mrb[83].mxu1 }
 0x2f7   : > { %v10827_v8 = vpop.f32.mrb[84].mxu1 }
 0x2f8   : > { %v8316_v49 = vpop.f32.mrb[85].mxu1 }
 0x2f9   : > { %v10832_v56 = vpop.f32.mrb[86].mxu1 }
 0x2fa   : > { %v8317_v21 = vpop.f32.mrb[87].mxu1 }
 0x2fb   : > { %v10873_v21 = vld [vmem:[%s11584_s3] ss:$0 sm:$0xff] }
 0x2ff   : > { %v10834_v3 = vpop.f32.mrb[88].mxu1 }
 0x300   : > { %v8320_v47 = vpop.f32.mrb[89].mxu1 }
 0x301   : > { %v3292_v39 = vpop.f32.mrb[90].mxu1 }
 0x302   : > { %v8321_v43 = vpop.f32.mrb[91].mxu1 }
 0x357   : > { %v2949_v5 = vpop.f32.mrb[12].mxu0 }
 0x358   : > { %v8668_v23 = vadd.f32 %v2949_v5, %v10578_v34  ;;  %v8216_v45 = vpop.f32.mrb[13].mxu0  ;;  %v3581_v5 = vpop.permute.xlu1 %3580 }
 0x359   : > { %v2952_v49 = vpop.f32.mrb[14].mxu0  ;;  %vm3640_vm8 = vcmp.eq.s32.totalorder %v3581_v5, 1 }
 0x35a   : > { %v8670_v47 = vadd.f32 %v2952_v49, %v10594_v50  ;;  %v8669_v39 = vadd.f32 %v8668_v23, %v10784_v52  ;;  %v8217_v43 = vpop.f32.mrb[15].mxu0 }
 0x35c   : > { %v3331_v34 = vmul.f32 %v8669_v39, %v10873_v21  ;;  %v8671_v48 = vadd.f32 %v8670_v47, %v10786_v14  ;;  %v3587_v9 = vpop.permute.xlu1 %3586 }
 0x35d   : > { %vm3642_vm10 = vcmp.eq.s32.totalorder %v3587_v9, 1 }
 0x35e   : > { %v3332_v30 = vmul.f32 %v8671_v48, %v10873_v21  ;;  %v3361_v28 = vadd.f32 %v10880_v6, %v3331_v34 }
 0x35f   : > { %v2957_v45 = vpop.f32.mrb[16].mxu0 }
 0x360   : > { %v8672_v50 = vadd.f32 %v2957_v45, %v10621_v27  ;;  %v3386_v52 = vmax.f32 %v3361_v28, 0.0  ;;  %v8220_v23 = vpop.f32.mrb[17].mxu0  ;;  %v3362_v49 = vadd.f32 %v10880_v6, %v3332_v30  ;;  %v3584_v45 = vpop.permute.xlu0 %3583 }
 0x361   : > { %v2960_v43 = vpop.f32.mrb[18].mxu0  ;;  %vm3641_vm9 = vcmp.eq.s32.totalorder %v3584_v45, 1 }
 0x362   : > { %v8674_v39 = vadd.f32 %v2960_v43, %v10634_v38  ;;  %v8673_v14 = vadd.f32 %v8672_v50, %v10793_v37  ;;  %v3387_v47 = vmax.f32 %v3362_v49, 0.0  ;;  %v8221_v48 = vpop.f32.mrb[19].mxu0  ;;  %v3664_v26 = vsel %vm3639_vm0, %v3386_v52, 0.0 }
 0x364   : > { %v3333_v34 = vmul.f32 %v8673_v14, %v10873_v21  ;;  %v3665_v35 = vsel %vm3640_vm8, %v3387_v47, 0.0  ;;  %v8675_v24 = vadd.f32 %v8674_v39, %v10795_v20  ;;  %v3590_v48 = vpop.permute.xlu0 %3589 }
 0x365   : > { %v7261_v27 = vpack.c.bf16 %v3665_v35, %v3664_v26  ;;  %vm3643_vm11 = vcmp.eq.s32.totalorder %v3590_v48, 1 }
 0x366   : > { %v3334_v28 = vmul.f32 %v8675_v24, %v10873_v21  ;;  %v3363_v30 = vadd.f32 %v10880_v6, %v3333_v34 }
 0x367   : > { %7341 = vst [vmem:[#allocation3 + $0x18] sm:$0xff] %v7261_v27   ;;  %v2965_v5 = vpop.f32.mrb[20].mxu0  ;;  %v3593_v27 = vpop.permute.xlu1 %3592 }
 0x368   : > { %v8676_v38 = vadd.f32 %v2965_v5, %v10668_v36  ;;  %v3388_v37 = vmax.f32 %v3363_v30, 0.0  ;;  %v8224_v50 = vpop.f32.mrb[21].mxu0  ;;  %v3364_v52 = vadd.f32 %v10880_v6, %v3334_v28  ;;  %vm3644_vm12 = vcmp.eq.s32.totalorder %v3593_v27, 1 }
 0x369   : > { %v2968_v23 = vpop.f32.mrb[22].mxu0 }
 0x36a   : > { %v8678_v20 = vadd.f32 %v2968_v23, %v10680_v55  ;;  %v8677_v26 = vadd.f32 %v8676_v38, %v10797_v42  ;;  %v3389_v24 = vmax.f32 %v3364_v52, 0.0  ;;  %v8225_v35 = vpop.f32.mrb[23].mxu0  ;;  %v3666_v49 = vsel %vm3641_vm9, %v3388_v37, 0.0 }
 0x36c   : > { %v3335_v43 = vmul.f32 %v8677_v26, %v10873_v21  ;;  %v3667_v39 = vsel %vm3642_vm10, %v3389_v24, 0.0  ;;  %v8679_v14 = vadd.f32 %v8678_v20, %v10799_v63  ;;  %v3596_v24 = vpop.permute.xlu0 %3595 }
 0x36d   : > { %v7266_v36 = vpack.c.bf16 %v3667_v39, %v3666_v49  ;;  %v3599_v49 = vpop.permute.xlu1 %3598  ;;  %vm3645_vm13 = vcmp.eq.s32.totalorder %v3596_v24, 1 }
 0x36e   : > { %v3336_v47 = vmul.f32 %v8679_v14, %v10873_v21  ;;  %v3365_v34 = vadd.f32 %v10880_v6, %v3335_v43  ;;  %vm3646_vm14 = vcmp.eq.s32.totalorder %v3599_v49, 1 }
 0x36f   : > { %7342 = vst [vmem:[#allocation3 + $0x20] sm:$0xff] %v7266_v36   ;;  %v2973_v28 = vpop.f32.mrb[24].mxu0 }
 0x370   : > { %v8680_v55 = vadd.f32 %v2973_v28, %v10707_v4  ;;  %v3390_v42 = vmax.f32 %v3365_v34, 0.0  ;;  %v8228_v45 = vpop.f32.mrb[25].mxu0  ;;  %v3366_v30 = vadd.f32 %v10880_v6, %v3336_v47  ;;  %v10912_v47 = vld [vmem:[#allocation3 + $0x18] sm:$0xff]  }
 0x371   : > { %v2976_v9 = vpop.f32.mrb[26].mxu0 }
 0x372   : > { %v8682_v63 = vadd.f32 %v2976_v9, %v10711_v41  ;;  %v8681_v5 = vadd.f32 %v8680_v55, %v10801_v16  ;;  %v3391_v38 = vmax.f32 %v3366_v30, 0.0  ;;  %v8229_v37 = vpop.f32.mrb[27].mxu0  ;;  %v3668_v50 = vsel %vm3643_vm11, %v3390_v42, 0.0 }
 0x373   : > { %v5213_v9 = vrot.slane %v10912_v47, 3  ;;  %v3605_v37 = vpop.permute.xlu1 %3604 }
 0x374   : > { %v3337_v52 = vmul.f32 %v8681_v5, %v10873_v21  ;;  %v3669_v23 = vsel %vm3644_vm12, %v3391_v38, 0.0  ;;  %v8683_v20 = vadd.f32 %v8682_v63, %v10803_v22  ;;  %v3602_v38 = vpop.permute.xlu0 %3601  ;;  %vm3648_vm4 = vcmp.eq.s32.totalorder %v3605_v37, 1 }
 0x375   : > { %v7271_v4 = vpack.c.bf16 %v3669_v23, %v3668_v50  ;;  %vm3647_vm2 = vcmp.eq.s32.totalorder %v3602_v38, 1  ;;  %vm3633_vm12 = vcmp.eq.s32.totalorder %v10851_v60, 1 }
 0x376   : > { %v3338_v26 = vmul.f32 %v8683_v20, %v10873_v21  ;;  %v3367_v35 = vadd.f32 %v10880_v6, %v3337_v52  ;;  %v10914_v22 = vld [vmem:[#allocation3 + $0x20] sm:$0xff]  }
 0x377   : > { %7343 = vst [vmem:[#allocation3 + $0x28] sm:$0xff] %v7271_v4   ;;  %v2981_v43 = vpop.f32.mrb[28].mxu0  ;;  %v5215_v63 = vrot.slane %v10914_v22, 3 }
 0x378   : > { %v8684_v41 = vadd.f32 %v2981_v43, %v10723_v11  ;;  %v3392_v16 = vmax.f32 %v3367_v35, 0.0  ;;  %v8232_v39 = vpop.f32.mrb[29].mxu0  ;;  %v3368_v14 = vadd.f32 %v10880_v6, %v3338_v26 }
 0x379   : > { %v2984_v36 = vpop.f32.mrb[30].mxu0  ;;  %v10929_v50 = vsel %vm11606_vm15, %v5213_v9, %v5215_v63 }
 0x37a   : > { %v8686_v48 = vadd.f32 %v2984_v36, %v10726_v53  ;;  %v8685_v34 = vadd.f32 %v8684_v41, %v10805_v29  ;;  %v3393_v27 = vmax.f32 %v3368_v14, 0.0  ;;  %v8233_v28 = vpop.f32.mrb[31].mxu0  ;;  %v3670_v55 = vsel %vm3645_vm13, %v3392_v16, 0.0  ;;  %v3608_v36 = vpop.permute.xlu0 %3607 }
 0x37b   : > { %vm3649_vm1 = vcmp.eq.s32.totalorder %v3608_v36, 1  ;;  %vm3634_vm13 = vcmp.eq.s32.totalorder %v10855_v46, 1 }
 0x37c   : > { %v3339_v11 = vmul.f32 %v8685_v34, %v10873_v21  ;;  %v3671_v42 = vsel %vm3646_vm14, %v3393_v27, 0.0  ;;  %v8687_v45 = vadd.f32 %v8686_v48, %v10807_v57  ;;  %v3611_v34 = vpop.permute.xlu1 %3610  ;;  %vm11607_vm14 = vmmov %vm11606_vm15 }
 0x37d   : > { %v7276_v30 = vpack.c.bf16 %v3671_v42, %v3670_v55  ;;  %vm3650_vm5 = vcmp.eq.s32.totalorder %v3611_v34, 1  ;;  %vm11608_vm15 = vmmov %vm11607_vm14 }
 0x37e   : > { %v3340_v5 = vmul.f32 %v8687_v45, %v10873_v21  ;;  %v3369_v53 = vadd.f32 %v10880_v6, %v3339_v11 }
 0x37f   : > { %7344 = vst [vmem:[#allocation3 + $0x30] sm:$0xff] %v7276_v30   ;;  %v2989_v29 = vpop.f32.mrb[32].mxu0 }
 0x380   : > { %v8688_v57 = vadd.f32 %v2989_v29, %v10733_v12  ;;  %v3394_v52 = vmax.f32 %v3369_v53, 0.0  ;;  %v8236_v23 = vpop.f32.mrb[33].mxu0  ;;  %v3370_v20 = vadd.f32 %v10880_v6, %v3340_v5 }
 0x381   : > { %v2992_v4 = vpop.f32.mrb[34].mxu0  ;;  %v3617_v23 = vpop.permute.xlu1 %3616 }
 0x382   : > { %v8690_v26 = vadd.f32 %v2992_v4, %v10735_v58  ;;  %v8689_v24 = vadd.f32 %v8688_v57, %v10809_v18  ;;  %v3395_v35 = vmax.f32 %v3370_v20, 0.0  ;;  %v8237_v49 = vpop.f32.mrb[35].mxu0  ;;  %v3672_v43 = vsel %vm3647_vm2, %v3394_v52, 0.0  ;;  %v3614_v57 = vpop.permute.xlu0 %3613  ;;  %vm11609_vm2 = vmmov %vm11607_vm14 }
 0x383   : > { %vm3651_vm6 = vcmp.eq.s32.totalorder %v3614_v57, 1  ;;  %vm3652_vm7 = vcmp.eq.s32.totalorder %v3617_v23, 1 }
 0x384   : > { %v3341_v41 = vmul.f32 %v8689_v24, %v10873_v21  ;;  %v3673_v16 = vsel %vm3648_vm4, %v3395_v35, 0.0  ;;  %v8691_v39 = vadd.f32 %v8690_v26, %v10811_v17  ;;  %vm11610_vm4 = vmmov %vm11609_vm2 }
 0x385   : > { %v7281_v12 = vpack.c.bf16 %v3673_v16, %v3672_v43  ;;  %v3623_v34 = vpop.permute.xlu1 %3622 }
 0x386   : > { %v3342_v14 = vmul.f32 %v8691_v39, %v10873_v21  ;;  %v3371_v48 = vadd.f32 %v10880_v6, %v3341_v41  ;;  %v3620_v36 = vpop.permute.xlu0 %3619  ;;  %vm3654_vm8 = vcmp.eq.s32.totalorder %v3623_v34, 1 }
 0x387   : > { %7345 = vst [vmem:[#allocation3 + $0x38] sm:$0xff] %v7281_v12   ;;  %v2997_v27 = vpop.f32.mrb[36].mxu0  ;;  %vm3653_vm0 = vcmp.eq.s32.totalorder %v3620_v36, 1 }
 0x388   : > { %v8692_v58 = vadd.f32 %v2997_v27, %v10740_v61  ;;  %v3396_v18 = vmax.f32 %v3371_v48, 0.0  ;;  %v8240_v28 = vpop.f32.mrb[37].mxu0  ;;  %v3372_v55 = vadd.f32 %v10880_v6, %v3342_v14 }
 0x389   : > { %v3000_v11 = vpop.f32.mrb[38].mxu0 }
 0x38a   : > { %v8694_v17 = vadd.f32 %v3000_v11, %v10742_v19  ;;  %v8693_v42 = vadd.f32 %v8692_v58, %v10816_v7  ;;  %v3397_v45 = vmax.f32 %v3372_v55, 0.0  ;;  %v8241_v30 = vpop.f32.mrb[39].mxu0  ;;  %v3674_v5 = vsel %vm3649_vm1, %v3396_v18, 0.0 }
 0x38b   : > { %vm3635_vm1 = vcmp.eq.s32.totalorder %v10853_v33, 1 }
 0x38c   : > { %v3343_v38 = vmul.f32 %v8693_v42, %v10873_v21  ;;  %v3675_v53 = vsel %vm3650_vm5, %v3397_v45, 0.0  ;;  %v8695_v37 = vadd.f32 %v8694_v17, %v10818_v54  ;;  %vm11611_vm5 = vmmov %vm11609_vm2 }
 0x38d   : > { %v7286_v61 = vpack.c.bf16 %v3675_v53, %v3674_v5  ;;  %v3626_v53 = vpop.permute.xlu0 %3625 }
 0x38e   : > { %v3344_v29 = vmul.f32 %v8695_v37, %v10873_v21  ;;  %v3373_v52 = vadd.f32 %v10880_v6, %v3343_v38  ;;  %vm3655_vm9 = vcmp.eq.s32.totalorder %v3626_v53, 1 }
 0x38f   : > { %7346 = vst [vmem:[#allocation3 + $0x40] sm:$0xff] %v7286_v61   ;;  %v3005_v20 = vpop.f32.mrb[40].mxu0  ;;  %v3629_v61 = vpop.permute.xlu1 %3628 }
 0x390   : > { %v8696_v19 = vadd.f32 %v3005_v20, %v10747_v10  ;;  %v3398_v7 = vmax.f32 %v3373_v52, 0.0  ;;  %v8244_v4 = vpop.f32.mrb[41].mxu0  ;;  %v3374_v26 = vadd.f32 %v10880_v6, %v3344_v29  ;;  %vm3656_vm10 = vcmp.eq.s32.totalorder %v3629_v61, 1 }
 0x391   : > { %v3008_v24 = vpop.f32.mrb[42].mxu0 }
 0x392   : > { %v8698_v54 = vadd.f32 %v3008_v24, %v10749_v1  ;;  %v8697_v35 = vadd.f32 %v8696_v19, %v10823_v40  ;;  %v3399_v49 = vmax.f32 %v3374_v26, 0.0  ;;  %v8245_v43 = vpop.f32.mrb[43].mxu0  ;;  %v3676_v41 = vsel %vm3651_vm6, %v3398_v7, 0.0  ;;  %v3632_v24 = vpop.permute.xlu0 %3631  ;;  %vm11612_vm6 = vmmov %vm11609_vm2 }
 0x393   : > { %vm3657_vm11 = vcmp.eq.s32.totalorder %v3632_v24, 1 }
 0x394   : > { %v3345_v16 = vmul.f32 %v8697_v35, %v10873_v21  ;;  %v3677_v39 = vsel %vm3652_vm7, %v3399_v49, 0.0  ;;  %v8699_v12 = vadd.f32 %v8698_v54, %v10825_v32  ;;  %vm3636_vm7 = vcmp.eq.s32.totalorder %v10857_v2, 1 }
 0x395   : > { %v7291_v10 = vpack.c.bf16 %v3677_v39, %v3676_v41  ;;  %v10969_v39 = vld [vmem:[#allocation3 + $0x28] sm:$0xff]  }
 0x396   : > { %v3346_v14 = vmul.f32 %v8699_v12, %v10873_v21  ;;  %v3375_v48 = vadd.f32 %v10880_v6, %v3345_v16  ;;  %v10973_v12 = vld [vmem:[#allocation3 + $0x38] sm:$0xff]  }
 0x397   : > { %7347 = vst [vmem:[#allocation3 + $0x48] sm:$0xff] %v7291_v10   ;;  %v3013_v27 = vpop.f32.mrb[44].mxu0 }
 0x398   : > { %v8700_v1 = vadd.f32 %v3013_v27, %v10754_v44  ;;  %v3400_v40 = vmax.f32 %v3375_v48, 0.0  ;;  %v8248_v58 = vpop.f32.mrb[45].mxu0  ;;  %v3376_v18 = vadd.f32 %v10880_v6, %v3346_v14 }
 0x399   : > { %v3016_v28 = vpop.f32.mrb[46].mxu0 }
 0x39a   : > { %v8702_v32 = vadd.f32 %v3016_v28, %v10756_v15  ;;  %v8701_v55 = vadd.f32 %v8700_v1, %v10827_v8  ;;  %v3401_v11 = vmax.f32 %v3376_v18, 0.0  ;;  %v8249_v17 = vpop.f32.mrb[47].mxu0  ;;  %v3678_v42 = vsel %vm3653_vm0, %v3400_v40, 0.0  ;;  %v10980_v1 = vld [vmem:[#allocation3 + $0x40] sm:$0xff]  }
 0x39b   : > { %v5217_v40 = vrot.slane %v10969_v39, 3  ;;  %v5221_v18 = vrot.slane %v10973_v12, 3 }
 0x39c   : > { %v3347_v45 = vmul.f32 %v8701_v55, %v10873_v21  ;;  %v3679_v30 = vsel %vm3654_vm8, %v3401_v11, 0.0  ;;  %v8703_v5 = vadd.f32 %v8702_v32, %v10832_v56 }
 0x39d   : > { %v7296_v44 = vpack.c.bf16 %v3679_v30, %v3678_v42  ;;  %v10992_v60 = vsel %vm11607_vm14, %v5215_v63, %v5217_v40 }
 0x39e   : > { %v3348_v38 = vmul.f32 %v8703_v5, %v10873_v21  ;;  %v3377_v37 = vadd.f32 %v10880_v6, %v3347_v45  ;;  %v10987_v55 = vld [vmem:[#allocation3 + $0x48] sm:$0xff]  }
 0x39f   : > { %7348 = vst [vmem:[#allocation3 + $0x50] sm:$0xff] %v7296_v44   ;;  %v3021_v29 = vpop.f32.mrb[48].mxu0 }
 0x3a0   : > { %v8704_v15 = vadd.f32 %v3021_v29, %v10761_v31  ;;  %v3402_v8 = vmax.f32 %v3377_v37, 0.0  ;;  %v8252_v57 = vpop.f32.mrb[49].mxu0  ;;  %v3378_v52 = vadd.f32 %v10880_v6, %v3348_v38  ;;  %v5223_v38 = vrot.slane %v10980_v1, 3 }
 0x3a1   : > { %v3024_v23 = vpop.f32.mrb[50].mxu0  ;;  %v5225_v57 = vrot.slane %v10987_v55, 3 }
 0x3a2   : > { %v8705_v56 = vadd.f32 %v8704_v15, %v10834_v3  ;;  %v3403_v20 = vmax.f32 %v3378_v52, 0.0  ;;  %v8253_v19 = vpop.f32.mrb[51].mxu0  ;;  %v3680_v7 = vsel %vm3655_vm9, %v3402_v8, 0.0  ;;  %v10971_v3 = vld [vmem:[#allocation3 + $0x30] sm:$0xff]   ;;  %v11007_v15 = vsel %vm11610_vm4, %v5221_v18, %v5223_v38 }
 0x3a3   : > { %v5219_v58 = vrot.slane %v10971_v3, 3  ;;  %vm11615_vm9 = vcmask 1046528  }
 0x3a4   : > { %v3349_v4 = vmul.f32 %v8705_v56, %v10873_v21  ;;  %v3681_v26 = vsel %vm3656_vm10, %v3403_v20, 0.0  ;;  %vm11616_vm10 = vmmov %vm11615_vm9 }
 0x3a5   : > { %v7301_v54 = vpack.c.bf16 %v3681_v26, %v3680_v7  ;;  %v10995_v11 = vsel %vm11608_vm15, %v5217_v40, %v5219_v58  ;;  %v10998_v17 = vsel %vm11609_vm2, %v5219_v58, %v5221_v18  ;;  %v11614_v40 = vld [vmem:[#allocation10_spill] sm:$0xff]  ;;  %vm11621_vm14 = vmmov %vm11615_vm9 }
 0x3a6   : > { %v3379_v35 = vadd.f32 %v10880_v6, %v3349_v4  ;;  %v11001_v46 = vld [vmem:[#allocation3 + $0x50] sm:$0xff]   ;;  %vm3638_vm8 = vcmp.eq.s32.totalorder %v11614_v40, 1  ;;  %vm11622_vm15 = vmmov %vm11615_vm9 }
 0x3a7   : > { %7349 = vst [vmem:[#allocation3 + $0x58] sm:$0xff] %v7301_v54   ;;  %v3193_v31 = vpop.f32.mrb[0].mxu0  ;;  %v5227_v52 = vrot.slane %v11001_v46, 3 }
 0x3a8   : > { %v8662_v49 = vadd.f32 %v3193_v31, %v10485_v59  ;;  %v3404_v43 = vmax.f32 %v3379_v35, 0.0  ;;  %v8272_v41 = vpop.f32.mrb[1].mxu0 }
 0x3a9   : > { %v3196_v16 = vpop.f32.mrb[2].mxu0  ;;  %v11021_v20 = vsel %vm11612_vm6, %v5225_v57, %v5227_v52 }
 0x3aa   : > { %v3325_v10 = vmul.f32 %v8662_v49, %v10873_v21  ;;  %v3682_v14 = vsel %vm3657_vm11, %v3404_v43, 0.0  ;;  %v8663_v36 = vadd.f32 %v3196_v16, %v10490_v0  ;;  %v8273_v48 = vpop.f32.mrb[3].mxu0  ;;  %vm11617_vm11 = vmmov %vm11609_vm2 }
 0x3ab   : > { %v7242_v34 = vpack.c.bf16 %v3682_v14, %v3682_v14  ;;  %v11613_v48 = vld [vmem:[#allocation9_spill] sm:$0xff] }
 0x3ac   : > { %v3355_v27 = vadd.f32 %v10880_v6, %v3325_v10  ;;  %v3326_v59 = vmul.f32 %v8663_v36, %v10873_v21  ;;  %vm3637_vm0 = vcmp.eq.s32.totalorder %v11613_v48, 1 }
 0x3ad   : > { %3808 = vst [vmem:[#allocation3 + $0x60] sm:$0xf] %v7242_v34 }
 0x3ae   : > { %v3380_v28 = vmax.f32 %v3355_v27, 0.0  ;;  %v3356_v0 = vadd.f32 %v10880_v6, %v3326_v59 }
 0x3af   : > { %v3201_v32 = vpop.f32.mrb[4].mxu0 }
 0x3b0   : > { %v3658_v42 = vsel %vm3633_vm12, %v3380_v28, 0.0  ;;  %v3381_v45 = vmax.f32 %v3356_v0, 0.0  ;;  %v8664_v30 = vadd.f32 %v3201_v32, %v10518_v25  ;;  %v8276_v5 = vpop.f32.mrb[5].mxu0  ;;  %vm11618_vm12 = vmmov %vm11609_vm2 }
 0x3b1   : > { %v3204_v44 = vpop.f32.mrb[6].mxu0  ;;  %vm11623_vm2 = vmmov %vm11615_vm9 }
 0x3b2   : > { %v3659_v53 = vsel %vm3634_vm13, %v3381_v45, 0.0  ;;  %v3327_v63 = vmul.f32 %v8664_v30, %v10873_v21  ;;  %v8665_v37 = vadd.f32 %v3204_v44, %v10523_v13  ;;  %v8277_v61 = vpop.f32.mrb[7].mxu0  ;;  %v11016_v13 = vsel %vm11611_vm5, %v5223_v38, %v5225_v57  ;;  %vm11620_vm13 = vmmov %vm11615_vm9 }
 0x3b3   : > { %v7246_v29 = vpack.c.bf16 %v3659_v53, %v3658_v42  ;;  %v11048_v61 = vld [vmem:[#allocation3 + $0x20] sm:$0xff]   ;;  %vm11624_vm4 = vmmov %vm11623_vm2 }
 0x3b4   : > { %v3357_v8 = vadd.f32 %v10880_v6, %v3327_v63  ;;  %v3328_v25 = vmul.f32 %v8665_v37, %v10873_v21  ;;  %v11045_v63 = vld [vmem:[#allocation3 + $0x18] sm:$0xff]  }
 0x3b5   : > { %7247 = vst [vmem:[#allocation3] sm:$0xff] %v7246_v29  }
 0x3b6   : > { %v3382_v23 = vmax.f32 %v3357_v8, 0.0  ;;  %v3358_v56 = vadd.f32 %v10880_v6, %v3328_v25  ;;  %v3941_v25 = vshll.u32 %v11045_v63, 16 }
 0x3b7   : > { %v3209_v19 = vpop.f32.mrb[8].mxu0 }
 0x3b8   : > { %v3660_v7 = vsel %vm3635_vm1, %v3382_v23, 0.0  ;;  %v3383_v4 = vmax.f32 %v3358_v56, 0.0  ;;  %v8666_v26 = vadd.f32 %v3209_v19, %v10549_v51  ;;  %v8280_v33 = vpop.f32.mrb[9].mxu0  ;;  %vm11625_vm1 = vmmov %vm11623_vm2 }
 0x3b9   : > { %v3212_v24 = vpop.f32.mrb[10].mxu0  ;;  %vm11626_vm5 = vmmov %vm11625_vm1 }
 0x3ba   : > { %v3661_v54 = vsel %vm3636_vm7, %v3383_v4, 0.0  ;;  %v3329_v35 = vmul.f32 %v8666_v26, %v10873_v21  ;;  %v8667_v31 = vadd.f32 %v3212_v24, %v10554_v62  ;;  %v8281_v49 = vpop.f32.mrb[11].mxu0  ;;  %vm11627_vm6 = vmmov %vm11625_vm1  ;;  %vm11628_vm7 = vcmask 1045504  }
 0x3bb   : > { %v7251_v43 = vpack.c.bf16 %v3661_v54, %v3660_v7  ;;  %v11059_v7 = vld [vmem:[#allocation3 + $0x28] sm:$0xff]   ;;  %v9378_v49 = vld [vmem:[%s11583_s2 + $0x8] sm:$0xff]  }
 0x3bc   : > { %v3359_v41 = vadd.f32 %v10880_v6, %v3329_v35  ;;  %v3330_v16 = vmul.f32 %v8667_v31, %v10873_v21  ;;  %v3810_v10 = vld [vmem:[#allocation3] sm:$0xf]  ;;  %v3811_v2 = vld [vmem:[#allocation3 + $0x4] sm:$0xf]  ;;  %v3943_v31 = vrot.slane %v3941_v25, 1 }
 0x3bd   : > { %7339 = vst [vmem:[#allocation3 + $0x8] sm:$0xff] %v7251_v43   ;;  %v11029_v14 = vcombine.low %v3810_v10, %v3811_v2  ;;  %v4343_v34 = vld [vmem:[#allocation3] sm:$0xe]  ;;  %v3949_v43 = vshll.u32 %v11048_v61, 16 }
 0x3be   : > { %v3384_v36 = vmax.f32 %v3359_v41, 0.0  ;;  %v3360_v51 = vadd.f32 %v10880_v6, %v3330_v16  ;;  %v7021_v18 = vcombine.low %v4343_v34, %v3811_v2 }
 0x3bf   : > { %v3920_v62 = vshll.u32 %v11029_v14, 16  ;;  %v3918_v32 = vshrl.u32 %v11029_v14, 16  ;;  %v3951_v34 = vrot.slane %v3949_v43, 1  ;;  %v9389_v43 = vld [vmem:[%s11583_s2 + $0x30] sm:$0xff]  }
 0x3c0   : > { %v3662_v27 = vsel %vm3637_vm0, %v3384_v36, 0.0  ;;  %v3385_v59 = vmax.f32 %v3360_v51, 0.0  ;;  %v4364_v42 = vrot.slane %v7021_v18, 1  ;;  %v3957_v36 = vshll.u32 %v11059_v7, 16  ;;  %v11619_v51 = vld [vmem:[#allocation8_spill] sm:$0xff]  ;;  %vm11629_vm0 = vmmov %vm11628_vm7 }
 0x3c1   : > { %v3922_v0 = vrot.slane %v3920_v62, 1  ;;  %v3945_v62 = vshrl.u32 %v11045_v63, 16 }
 0x3c2   : > { %v3663_v58 = vsel %vm3638_vm8, %v3385_v59, 0.0  ;;  %v11087_v59 = vld [vmem:[#allocation3 + $0x30] sm:$0xff]   ;;  %v3959_v40 = vrot.slane %v3957_v36, 1  ;;  %vm11630_vm8 = vmmov %vm11629_vm0 }
 0x3c3   : > { %v7256_v21 = vpack.c.bf16 %v3663_v58, %v3662_v27  ;;  %v3923_v30 = vor.u32 %v3922_v0, %v3918_v32  ;;  %v9381_v27 = vld [vmem:[%s11583_s2 + $0x10] sm:$0xff]   ;;  %v3947_v18 = vor.u32 %v3945_v62, %v3943_v31  ;;  %v9382_v0 = vld [vmem:[%s11583_s2 + $0x18] sm:$0xff]   ;;  %v3965_v32 = vshll.u32 %v11087_v59, 16 }
 0x3c4   : > { %v11035_v28 = vld [vmem:[#allocation3 + $0x8] sm:$0xff]   ;;  %v11091_v58 = vld [vmem:[#allocation3 + $0x38] sm:$0xff]  }
 0x3c5   : > { %7340 = vst [vmem:[#allocation3 + $0x10] sm:$0xff] %v7256_v21   ;;  %v3925_v6 = vshll.u32 %v11035_v28, 16  ;;  %v4365_v45 = vrot.slane %v11035_v28, 1  ;;  %v11043_v38 = vld [vmem:[#allocation3 + $0xc] sm:$0xf]  ;;  %v3929_v23 = vshrl.u32 %v11035_v28, 16 }
 0x3c6   : > { %v5189_v53 = vld [vmem:[#allocation3 + $0x8] sm:$0x8] }
 0x3c7   : > { %v3927_v5 = vrot.slane %v3925_v6, 1  ;;  %v11041_v44 = vsel %vm11615_vm9, %v4364_v42, %v4365_v45  ;;  %v7106_v29 = vcombine.low %v5189_v53, %v11043_v38  ;;  %v3952_v6 = vsel %vm539_vm3, %v3947_v18, %v3951_v34  ;;  %v11103_v53 = vld [vmem:[#allocation3 + $0x40] sm:$0xff]   ;;  %v9392_v18 = vld [vmem:[%s11583_s2 + $0x80] sm:$0xff]   ;;  %vm11631_vm9 = vmmov %vm11629_vm0 }
 0x3c8   : > { %v3985_v36 = vshrl.u32 %v11103_v53, 16 }
 0x3c9   : > { %v3928_v37 = vsel %vm539_vm3, %v3923_v30, %v3927_v5  ;;  %v5210_v4 = vrot.slane %v7106_v29, 3  ;;  %v3931_v33 = vor.u32 %v3929_v23, %v3927_v5  ;;  %v3967_v30 = vrot.slane %v3965_v32, 1  ;;  %v9385_v5 = vld [vmem:[%s11583_s2 + $0x20] sm:$0xff]  }
 0x3ca   : > { %8338 = vmatprep.mubr.bf16.mxu1 %v3928_v37  ;;  %v3961_v37 = vshrl.u32 %v11059_v7, 16  ;;  %v3969_v29 = vshrl.u32 %v11087_v59, 16  ;;  %v11107_v23 = vld [vmem:[#allocation3 + $0x48] sm:$0xff]  }
 0x3cc   : > { %v11051_v8 = vld [vmem:[#allocation3 + $0x10] sm:$0xff]  }
 0x3cd   : > { %v11054_v57 = vld [vmem:[#allocation3 + $0x10] sm:$0xff]   ;;  %v3933_v56 = vshll.u32 %v11051_v8, 16  ;;  %v4367_v19 = vrot.slane %v11051_v8, 1  ;;  %v3937_v54 = vshrl.u32 %v11051_v8, 16 }
 0x3ce   : > { %v5211_v26 = vrot.slane %v11054_v57, 3 }
 0x3cf   : > { %v3935_v24 = vrot.slane %v3933_v56, 1  ;;  %v11066_v35 = vsel %vm11616_vm10, %v4365_v45, %v4367_v19  ;;  %v3973_v45 = vshll.u32 %v11091_v58, 16  ;;  %v3963_v56 = vor.u32 %v3961_v37, %v3959_v40  ;;  %v9400_v37 = vld [vmem:[%s11583_s2 + $0xb8] sm:$0xff]   ;;  %vm11632_vm10 = vmmov %vm11629_vm0 }
 0x3d0   : > { %v11074_v10 = vsel %vm11617_vm11, %v5210_v4, %v5211_v26  ;;  %v11079_v2 = vsel %vm11618_vm12, %v5211_v26, %v5213_v9  ;;  %v3953_v9 = vshrl.u32 %v11048_v61, 16  ;;  %v3971_v4 = vor.u32 %v3969_v29, %v3967_v30  ;;  %v9401_v29 = vld [vmem:[%s11583_s2 + $0xc0] sm:$0xff]   ;;  %vm11633_vm11 = vmmov %vm11629_vm0 }
 0x3d1   : > { %v3936_v41 = vsel %vm539_vm3, %v3931_v33, %v3935_v24  ;;  %v3939_v16 = vor.u32 %v3937_v54, %v3935_v24  ;;  %v3975_v25 = vrot.slane %v3973_v45, 1  ;;  %v3981_v26 = vshll.u32 %v11103_v53, 16  ;;  %v9388_v33 = vld [vmem:[%s11583_s2 + $0x28] sm:$0xff]   ;;  %v9394_v45 = vld [vmem:[%s11583_s2 + $0x90] sm:$0xff]   ;;  %vm11634_vm12 = vmmov %vm11629_vm0 }
 0x3d2   : > { %8339 = vmatmul.mubr.bf16.vlgmr.msra.gmra.mrb[92].mxu1 %v3936_v41  ;;  %v3955_v21 = vor.u32 %v3953_v9, %v3951_v34  ;;  %v3968_v24 = vsel %vm539_vm3, %v3963_v56, %v3967_v30  ;;  %v3977_v41 = vshrl.u32 %v11091_v58, 16  ;;  %v9397_v30 = vld [vmem:[%s11583_s2 + $0xa8] sm:$0xff]  }
 0x3d3   : > { %8359 = vmatpush3.bf16.msra.mxu1 %v11619_v51  ;;  %v3944_v48 = vsel %vm539_vm3, %v3939_v16, %v3943_v31  ;;  %v3976_v54 = vsel %vm539_vm3, %v3971_v4, %v3975_v25  ;;  %v3989_v31 = vshll.u32 %v11107_v23, 16  ;;  %v11120_v16 = vld [vmem:[#allocation3 + $0x50] ss:$0 sps:$4 sm:$0x11]  }
 0x3d4   : > { %8342 = vmatprep.mubr.bf16.mxu1 %v3944_v48  ;;  %8360 = vmatprep.subr.bf16.mxu1 %v9378_v49  ;;  %v3960_v42 = vsel %vm539_vm3, %v3955_v21, %v3959_v40  ;;  %v3979_v48 = vor.u32 %v3977_v41, %v3975_v25  ;;  %v3997_v9 = vshll.u32 %v11120_v16, 16  ;;  %v3993_v21 = vshrl.u32 %v11107_v23, 16  ;;  %v9402_v56 = vld [vmem:[%s11583_s2 + $0xc8] sm:$0xff]  }
 0x3d5   : > { %v3991_v51 = vrot.slane %v3989_v31, 1  ;;  %v4369_v25 = vrot.slane %v11045_v63, 1 }
 0x3d7   : > { %8361 = vmatpush3.bf16.msra.mxu1 %v9378_v49  ;;  %v3983_v49 = vrot.slane %v3981_v26, 1  ;;  %v3995_v32 = vor.u32 %v3993_v21, %v3991_v51  ;;  %v4370_v4 = vsel %vm11620_vm13, %v4367_v19, %v4369_v25  ;;  %v9403_v26 = vld [vmem:[%s11583_s2 + $0xd0] sm:$0xff]   ;;  %vm11635_vm13 = vmmov %vm11629_vm0 }
 0x3d8   : > { %8362 = vmatprep.subr.bf16.mxu1 %v9381_v27 }
 0x3d9   : > { %v3987_v34 = vor.u32 %v3985_v36, %v3983_v49  ;;  %v3984_v62 = vsel %vm539_vm3, %v3979_v48, %v3983_v49  ;;  %v4381_v49 = vrot.slane %v11107_v23, 1  ;;  %v4576_v36 = vld [vmem:[#allocation3 + $0x8] sm:$0xc] }
 0x3da   : > { %8343 = vmatmul.mubr.bf16.gmra.mrb[96].mxu1 %v3952_v6  ;;  %v11208_v48 = vcombine.low %v4576_v36, %v11043_v38  ;;  %v4672_v38 = vrot.slane %v10914_v22, 2  ;;  %v4674_v22 = vrot.slane %v10969_v39, 2 }
 0x3db   : > { %8346 = vmatprep.mubr.bf16.mxu1 %v3960_v42  ;;  %8363 = vmatpush3.bf16.msra.mxu1 %v9381_v27  ;;  %v9391_v27 = vld [vmem:[%s11583_s2 + $0x38] sm:$0xff]   ;;  %v3992_v40 = vsel %vm539_vm3, %v3987_v34, %v3991_v51  ;;  %v9393_v42 = vld [vmem:[%s11583_s2 + $0x88] sm:$0xff]   ;;  %v4668_v34 = vrot.slane %v11054_v57, 2 }
 0x3dc   : > { %8364 = vmatprep.subr.bf16.mxu1 %v9382_v0 }
 0x3df   : > { %8365 = vmatpush3.bf16.msra.mxu1 %v9382_v0  ;;  %v3999_v0 = vrot.slane %v3997_v9, 1 }
 0x3e0   : > { %8366 = vmatprep.subr.bf16.mxu1 %v9385_v5 }
 0x3e1   : > { %v4000_v6 = vsel %vm539_vm3, %v3995_v32, %v3999_v0  ;;  %v9417_v0 = vld [vmem:[%s11583_s2 + $0x110] sm:$0xff]   ;;  %v9418_v32 = vld [vmem:[%s11583_s2 + $0x118] sm:$0xff]  }
 0x3e2   : > { %8347 = vmatmul.mubr.bf16.gmra.mrb[100].mxu1 %v3968_v24  ;;  %v9406_v24 = vld [vmem:[%s11583_s2 + $0xe8] sm:$0xff]  }
 0x3e3   : > { %8350 = vmatprep.mubr.bf16.mxu1 %v3976_v54  ;;  %8367 = vmatpush3.bf16.msra.mxu1 %v9385_v5  ;;  %v9398_v5 = vld [vmem:[%s11583_s2 + $0xb0] sm:$0xff]  }
 0x3e4   : > { %8368 = vmatprep.subr.bf16.mxu1 %v9388_v33 }
 0x3e7   : > { %8369 = vmatpush3.bf16.msra.mxu1 %v9388_v33  ;;  %v4377_v33 = vrot.slane %v11091_v58, 1 }
 0x3e8   : > { %8370 = vmatprep.subr.bf16.mxu1 %v9389_v43 }
 0x3ea   : > { %8351 = vmatmul.mubr.bf16.gmra.mrb[104].mxu1 %v3984_v62 }
 0x3eb   : > { %8354 = vmatprep.mubr.bf16.mxu1 %v3992_v40  ;;  %8371 = vmatpush3.bf16.msra.mxu1 %v9389_v43  ;;  %v9410_v43 = vld [vmem:[%s11583_s2 + $0xf8] sm:$0xff]   ;;  %v4670_v40 = vrot.slane %v10912_v47, 2  ;;  %v4676_v47 = vrot.slane %v10971_v3, 2 }
 0x3ec   : > { %8372 = vmatprep.subr.bf16.mxu1 %v9391_v27 }
 0x3ed   : > { %v4673_v21 = vsel %vm11630_vm8, %v4670_v40, %v4672_v38 }
 0x3ef   : > { %8373 = vmatpush3.bf16.msra.mxu1 %v9391_v27  ;;  %v4667_v27 = vrot.slane %v11208_v48, 2 }
 0x3f0   : > { %8394 = vmatprep.subr.bf16.mxu1 %v9392_v18 }
 0x3f1   : > { %v4669_v9 = vsel %vm11628_vm7, %v4667_v27, %v4668_v34 }
 0x3f2   : > { %8355 = vmatmul.mubr.bf16.gmra.mrb[108].mxu1 %v4000_v6  ;;  %v4675_v6 = vsel %vm11631_vm9, %v4672_v38, %v4674_v22  ;;  %v4936_v38 = vshrl.u32 %v10969_v39, 16 }
 0x3f3   : > { %8374 = vmatprep.mubr.bf16.mxu1 %v11029_v14  ;;  %v9395_v14 = vld [vmem:[%s11583_s2 + $0x98] sm:$0xff]  }
 0x3fa   : > { %8375 = vmatmul.mubr.bf16.vlgmr.msra.gmra.mrb[92].mxu1 %v11035_v28  ;;  %v9396_v28 = vld [vmem:[%s11583_s2 + $0xa0] sm:$0xff]  }
 0x3fb   : > { %8378 = vmatprep.mubr.bf16.mxu1 %v11051_v8  ;;  %8395 = vmatpush3.bf16.msra.mxu1 %v9392_v18  ;;  %v4671_v18 = vsel %vm11629_vm0, %v4668_v34, %v4670_v40  ;;  %v4939_v40 = vshll.u32 %v10969_v39, 16  ;;  %v9430_v39 = vld [vmem:[%s11583_s2 + $0x150] sm:$0xff]  }
 0x3fc   : > { %8396 = vmatprep.subr.bf16.mxu1 %v9393_v42 }
 0x3ff   : > { %8397 = vmatpush3.bf16.msra.mxu1 %v9393_v42  ;;  %v4677_v42 = vsel %vm11632_vm10, %v4674_v22, %v4676_v47  ;;  %v9429_v22 = vld [vmem:[%s11583_s2 + $0x148] sm:$0xff]  }
 0x400   : > { %8398 = vmatprep.subr.bf16.mxu1 %v9394_v45 }
 0x402   : > { %8379 = vmatmul.mubr.bf16.gmra.mrb[96].mxu1 %v11045_v63  ;;  %v4373_v63 = vrot.slane %v11059_v7, 1 }
 0x403   : > { %8382 = vmatprep.mubr.bf16.mxu1 %v11048_v61  ;;  %8399 = vmatpush3.bf16.msra.mxu1 %v9394_v45  ;;  %v9421_v45 = vld [vmem:[%s11583_s2 + $0x120] sm:$0xff]  }
 0x404   : > { %8400 = vmatprep.subr.bf16.mxu1 %v9395_v14 }
 0x407   : > { %8401 = vmatpush3.bf16.msra.mxu1 %v9395_v14  ;;  %v4678_v14 = vrot.slane %v10973_v12, 2 }
 0x408   : > { %8402 = vmatprep.subr.bf16.mxu1 %v9396_v28 }
 0x40a   : > { %8383 = vmatmul.mubr.bf16.gmra.mrb[100].mxu1 %v11059_v7  ;;  %v4375_v7 = vrot.slane %v11087_v59, 1 }
 0x40b   : > { %8386 = vmatprep.mubr.bf16.mxu1 %v11087_v59  ;;  %8403 = vmatpush3.bf16.msra.mxu1 %v9396_v28  ;;  %v9407_v59 = vld [vmem:[%s11583_s2 + $0xf0] sm:$0xff]   ;;  %v4680_v28 = vrot.slane %v10980_v1, 2 }
 0x40c   : > { %8404 = vmatprep.subr.bf16.mxu1 %v9397_v30  ;;  %v4376_v54 = vsel %vm11623_vm2, %v4373_v63, %v4375_v7  ;;  %v4378_v31 = vsel %vm11624_vm4, %v4375_v7, %v4377_v33  ;;  %vm11638_vm2 = vsmask.f32 5376 }
 0x40d   : > { %vm11639_vm4 = vmmov %vm11638_vm2 }
 0x40f   : > { %8405 = vmatpush3.bf16.msra.mxu1 %v9397_v30  ;;  %v9424_v30 = vld [vmem:[%s11583_s2 + $0x128] sm:$0xff]  }
 0x410   : > { %8406 = vmatprep.subr.bf16.mxu1 %v9398_v5 }
 0x412   : > { %8387 = vmatmul.mubr.bf16.gmra.mrb[104].mxu1 %v11091_v58  ;;  %v4379_v58 = vrot.slane %v11103_v53, 1 }
 0x413   : > { %8390 = vmatprep.mubr.bf16.mxu1 %v11103_v53  ;;  %8407 = vmatpush3.bf16.msra.mxu1 %v9398_v5  ;;  %v9412_v53 = vld [vmem:[%s11583_s2 + $0x100] sm:$0xff]   ;;  %v4679_v5 = vsel %vm11633_vm11, %v4676_v47, %v4678_v14  ;;  %vm11648_vm11 = vcmask 1044480  }
 0x414   : > { %8408 = vmatprep.subr.bf16.mxu1 %v9400_v37  ;;  %v4380_v41 = vsel %vm11625_vm1, %v4377_v33, %v4379_v58  ;;  %v4382_v51 = vsel %vm11626_vm5, %v4379_v58, %v4381_v49  ;;  %v9497_v58 = vld [vmem:[#allocation3 + $0x20] sm:$0xff]   ;;  %vm11640_vm1 = vmmov %vm11638_vm2 }
 0x415   : > { %vm11641_vm5 = vmmov %vm11640_vm1 }
 0x416   : > { %vm11643_vm7 = vmmov %vm11640_vm1 }
 0x417   : > { %8409 = vmatpush3.bf16.msra.mxu1 %v9400_v37  ;;  %v4681_v37 = vsel %vm11634_vm12, %v4678_v14, %v4680_v28  ;;  %vm11649_vm12 = vcmask 1046528  }
 0x418   : > { %8430 = vmatprep.subr.bf16.mxu1 %v9401_v29 }
 0x41a   : > { %8391 = vmatmul.mubr.bf16.gmra.mrb[108].mxu1 %v11107_v23  ;;  %v4383_v23 = vrot.slane %v11120_v16, 1  ;;  %v9414_v16 = vld [vmem:[%s11583_s2 + $0x108] sm:$0xff]  }
 0x41b   : > { %8410 = vmatprep.mubr.bf16.mxu1 %v11041_v44  ;;  %v4371_v44 = vrot.slane %v11048_v61, 1  ;;  %v9405_v61 = vld [vmem:[%s11583_s2 + $0xe0] sm:$0xff]  }
 0x41c   : > { %v4384_v62 = vsel %vm11627_vm6, %v4381_v49, %v4383_v23  ;;  %v4927_v49 = vshrl.u32 %v9497_v58, 16  ;;  %vm11642_vm6 = vmmov %vm11640_vm1 }
 0x41d   : > { %v4372_v8 = vsel %vm11621_vm14, %v4369_v25, %v4371_v44  ;;  %v4374_v19 = vsel %vm11622_vm15, %v4371_v44, %v4373_v63  ;;  %v4682_v25 = vrot.slane %v10987_v55, 2  ;;  %v4901_v44 = vshrl.u32 %v11208_v48, 16  ;;  %vm11636_vm14 = vmmov %vm11629_vm0 }
 0x41e   : > { %v4904_v63 = vshll.u32 %v11208_v48, 16  ;;  %vm11637_vm15 = vmmov %vm11629_vm0  ;;  %v4929_v34 = vrot.slane %v4927_v49, 2 }
 0x41f   : > { %vm11644_vm0 = vmmov %vm11640_vm1 }
 0x420   : > { %vm11645_vm8 = vmmov %vm11644_vm0 }
 0x421   : > { %vm11646_vm9 = vmmov %vm11644_vm0 }
 0x422   : > { %8411 = vmatmul.mubr.bf16.vlgmr.msra.gmra.mrb[92].mxu1 %v11066_v35  ;;  %v9404_v35 = vld [vmem:[%s11583_s2 + $0xd8] sm:$0xff]   ;;  %vm11647_vm10 = vmmov %vm11644_vm0 }
 0x423   : > { %8414 = vmatprep.mubr.bf16.mxu1 %v4370_v4  ;;  %8431 = vmatpush3.bf16.msra.mxu1 %v9401_v29  ;;  %v9425_v29 = vld [vmem:[%s11583_s2 + $0x130] sm:$0xff]   ;;  %v4909_v4 = vshrl.u32 %v11054_v57, 16 }
 0x424   : > { %8432 = vmatprep.subr.bf16.mxu1 %v9402_v56 }
 0x425   : > { %v4911_v7 = vrot.slane %v4909_v4, 2 }
 0x427   : > { %8433 = vmatpush3.bf16.msra.mxu1 %v9402_v56  ;;  %v4684_v56 = vrot.slane %v11001_v46, 2 }
 0x428   : > { %8434 = vmatprep.subr.bf16.mxu1 %v9403_v26 }
 0x42a   : > { %8415 = vmatmul.mubr.bf16.gmra.mrb[96].mxu1 %v4372_v8  ;;  %v4683_v8 = vsel %vm11635_vm13, %v4680_v28, %v4682_v25  ;;  %v4954_v28 = vshrl.u32 %v10973_v12, 16  ;;  %vm11650_vm13 = vmmov %vm11649_vm12 }
 0x42b   : > { %8418 = vmatprep.mubr.bf16.mxu1 %v4374_v19  ;;  %8435 = vmatpush3.bf16.msra.mxu1 %v9403_v26  ;;  %v4912_v26 = vshll.u32 %v11054_v57, 16  ;;  %v9426_v19 = vld [vmem:[#allocation3 + $0x58] ss:$0 sps:$4 sm:$0x33]   ;;  %v4903_v57 = vrot.slane %v4901_v44, 2 }
 0x42c   : > { %8436 = vmatprep.subr.bf16.mxu1 %v9404_v35  ;;  %v4956_v4 = vrot.slane %v4954_v28, 2 }
 0x42d   : > { %v4914_v33 = vrot.slane %v4912_v26, 3 }
 0x42f   : > { %8437 = vmatpush3.bf16.msra.mxu1 %v9404_v35  ;;  %v9427_v35 = vld [vmem:[%s11583_s2 + $0x138] sm:$0xff]  }
 0x430   : > { %8438 = vmatprep.subr.bf16.mxu1 %v9405_v61 }
 0x432   : > { %8419 = vmatmul.mubr.bf16.gmra.mrb[100].mxu1 %v4376_v54  ;;  %v9428_v54 = vld [vmem:[%s11583_s2 + $0x140] sm:$0xff]  }
 0x433   : > { %8422 = vmatprep.mubr.bf16.mxu1 %v4378_v31  ;;  %8439 = vmatpush3.bf16.msra.mxu1 %v9405_v61  ;;  %v4685_v61 = vsel %vm11636_vm14, %v4682_v25, %v4684_v56  ;;  %v4686_v31 = vrot.slane %v9426_v19, 2  ;;  %v9431_v25 = vld [vmem:[%s11583_s2 + $0x158] sm:$0xff]   ;;  %v4975_v19 = vshll.u32 %v10987_v55, 16  ;;  %vm11651_vm14 = vmmov %vm11649_vm12 }
 0x434   : > { %8440 = vmatprep.subr.bf16.mxu1 %v9406_v24 }
 0x437   : > { %8441 = vmatpush3.bf16.msra.mxu1 %v9406_v24  ;;  %v4906_v24 = vrot.slane %v4904_v63, 3 }
 0x438   : > { %8442 = vmatprep.subr.bf16.mxu1 %v9407_v59 }
 0x439   : > { %v4907_v48 = vor.u32 %v4906_v24, %v4903_v57  ;;  %v9433_v57 = vld [vmem:[%s11583_s2 + $0x168] sm:$0xff]  }
 0x43a   : > { %8423 = vmatmul.mubr.bf16.gmra.mrb[104].mxu1 %v4380_v41  ;;  %v9498_v41 = vld [vmem:[#allocation3 + $0x18] sm:$0xff]  }
 0x43b   : > { %8426 = vmatprep.mubr.bf16.mxu1 %v4382_v51  ;;  %8443 = vmatpush3.bf16.msra.mxu1 %v9407_v59  ;;  %v4915_v59 = vor.u32 %v4914_v33, %v4911_v7  ;;  %v4918_v36 = vshrl.u32 %v9498_v41, 16  ;;  %v4921_v51 = vshll.u32 %v9498_v41, 16  ;;  %v4981_v7 = vshrl.u32 %v11001_v46, 16 }
 0x43c   : > { %8444 = vmatprep.subr.bf16.mxu1 %v9410_v43  ;;  %v4984_v33 = vshll.u32 %v11001_v46, 16  ;;  %v9451_v46 = vld [vmem:[#allocation3 + $0x2c] sm:$0xff]  }
 0x43d   : > { %v4916_v23 = vsel %vm11638_vm2, %v4907_v48, %v4915_v59 }
 0x43e   : > { %v4986_v49 = vrot.slane %v4984_v33, 3 }
 0x43f   : > { %8445 = vmatpush3.bf16.msra.mxu1 %v9410_v43  ;;  %v4930_v43 = vshll.u32 %v9497_v58, 16  ;;  %v4983_v58 = vrot.slane %v4981_v7, 2 }
 0x440   : > { %8466 = vmatprep.subr.bf16.mxu1 %v9412_v53 }
 0x441   : > { %v4932_v27 = vrot.slane %v4930_v43, 3  ;;  %v9434_v43 = vld [vmem:[%s11583_s2 + $0x170] sm:$0xff]   ;;  %v4987_v48 = vor.u32 %v4986_v49, %v4983_v58 }
 0x442   : > { %8427 = vmatmul.mubr.bf16.gmra.mrb[108].mxu1 %v4384_v62  ;;  %v4920_v62 = vrot.slane %v4918_v36, 2 }
 0x443   : > { %8446 = vmatprep.mubr.bf16.mxu1 %v4669_v9  ;;  %v4923_v9 = vrot.slane %v4921_v51, 3 }
 0x44a   : > { %8447 = vmatmul.mubr.bf16.vlgmr.msra.gmra.mrb[92].mxu1 %v4671_v18  ;;  %v4945_v18 = vshrl.u32 %v10971_v3, 16 }
 0x44b   : > { %8450 = vmatprep.mubr.bf16.mxu1 %v4673_v21  ;;  %8467 = vmatpush3.bf16.msra.mxu1 %v9412_v53  ;;  %v4687_v53 = vsel %vm11637_vm15, %v4684_v56, %v4686_v31  ;;  %v4948_v21 = vshll.u32 %v10971_v3, 16  ;;  %v4977_v31 = vrot.slane %v4975_v19, 3  ;;  %vm11652_vm15 = vmmov %vm11649_vm12 }
 0x44c   : > { %8468 = vmatprep.subr.bf16.mxu1 %v9414_v16 }
 0x44d   : > { %v4950_v14 = vrot.slane %v4948_v21, 3 }
 0x44f   : > { %8469 = vmatpush3.bf16.msra.mxu1 %v9414_v16  ;;  %v4933_v16 = vor.u32 %v4932_v27, %v4929_v34 }
 0x450   : > { %8470 = vmatprep.subr.bf16.mxu1 %v9417_v0 }
 0x452   : > { %8451 = vmatmul.mubr.bf16.gmra.mrb[96].mxu1 %v4675_v6  ;;  %v4941_v6 = vrot.slane %v4939_v40, 3 }
 0x453   : > { %8454 = vmatprep.mubr.bf16.mxu1 %v4677_v42  ;;  %8471 = vmatpush3.bf16.msra.mxu1 %v9417_v0  ;;  %v4924_v0 = vor.u32 %v4923_v9, %v4920_v62  ;;  %v9438_v9 = vld [vmem:[%s11583_s2 + $0x180] sm:$0xff]  }
 0x454   : > { %8472 = vmatprep.subr.bf16.mxu1 %v9418_v32 }
 0x455   : > { %v4925_v47 = vsel %vm11639_vm4, %v4915_v59, %v4924_v0  ;;  %v4934_v42 = vsel %vm11640_vm1, %v4924_v0, %v4933_v16  ;;  %v11296_v59 = vld [vmem:[#allocation3 + $0x58] ss:$0 sps:$4 sm:$0x77]  }
 0x456   : > { %v4990_v36 = vshrl.u32 %v11296_v59, 16  ;;  %v4993_v51 = vshll.u32 %v11296_v59, 16  ;;  %v9445_v0 = vld [vmem:[#allocation3 + $0x14] sm:$0xff]  }
 0x457   : > { %8473 = vmatpush3.bf16.msra.mxu1 %v9418_v32  ;;  %v4938_v32 = vrot.slane %v4936_v38, 2 }
 0x458   : > { %8474 = vmatprep.subr.bf16.mxu1 %v9421_v45  ;;  %v4992_v34 = vrot.slane %v4990_v36, 2  ;;  %v4995_v27 = vrot.slane %v4993_v51, 3 }
 0x459   : > { %v4942_v3 = vor.u32 %v4941_v6, %v4938_v32  ;;  %v9452_v32 = vld [vmem:[#allocation3 + $0x34] sm:$0xff]   ;;  %v9457_v6 = vld [vmem:[%s11583_s2 + $0x1e0] sm:$0xff]  }
 0x45a   : > { %8455 = vmatmul.mubr.bf16.gmra.mrb[100].mxu1 %v4679_v5  ;;  %v4996_v38 = vor.u32 %v4995_v27, %v4992_v34  ;;  %v11403_v34 = vld [vmem:[#allocation3 + $0x44] sm:$0xff]  }
 0x45b   : > { %8458 = vmatprep.mubr.bf16.mxu1 %v4681_v37  ;;  %8475 = vmatpush3.bf16.msra.mxu1 %v9421_v45  ;;  %v4947_v45 = vrot.slane %v4945_v18, 2  ;;  %v4963_v37 = vshrl.u32 %v10980_v1, 16  ;;  %v4943_v56 = vsel %vm11641_vm5, %v4933_v16, %v4942_v3  ;;  %v9439_v16 = vld [vmem:[%s11583_s2 + $0x188] sm:$0xff]   ;;  %v9440_v18 = vld [vmem:[%s11583_s2 + $0x190] sm:$0xff]  }
 0x45c   : > { %8476 = vmatprep.subr.bf16.mxu1 %v9424_v30  ;;  %v4997_v40 = vsel %vm11647_vm10, %v4987_v48, %v4996_v38  ;;  %v11407_v38 = vld [vmem:[#allocation3 + $0x4c] sm:$0xff]  }
 0x45d   : > { %v4951_v5 = vor.u32 %v4950_v14, %v4947_v45  ;;  %v4965_v63 = vrot.slane %v4963_v37, 2  ;;  %v9455_v45 = vld [vmem:[#allocation3 + $0x3c] sm:$0xff]   ;;  %v9460_v14 = vld [vmem:[%s11583_s2 + $0x1e8] sm:$0xff]  }
 0x45e   : > { %v9458_v37 = vld [vmem:[#allocation3 + $0x4c] sm:$0xff]  }
 0x45f   : > { %8477 = vmatpush3.bf16.msra.mxu1 %v9424_v30  ;;  %v4957_v30 = vshll.u32 %v10973_v12, 16  ;;  %v4952_v44 = vsel %vm11642_vm6, %v4942_v3, %v4951_v5  ;;  %v11365_v3 = vld [vmem:[#allocation3 + $0x18] sm:$0xf] }
 0x460   : > { %8478 = vmatprep.subr.bf16.mxu1 %v9425_v29 }
 0x461   : > { %v4959_v26 = vrot.slane %v4957_v30, 3  ;;  %v9461_v30 = vld [vmem:[%s11583_s2 + $0x1f0] sm:$0xff]  }
 0x462   : > { %8459 = vmatmul.mubr.bf16.gmra.mrb[104].mxu1 %v4683_v8  ;;  %v4972_v8 = vshrl.u32 %v10987_v55, 16 }
 0x463   : > { %8462 = vmatprep.mubr.bf16.mxu1 %v4685_v61  ;;  %8479 = vmatpush3.bf16.msra.mxu1 %v9425_v29  ;;  %v4966_v29 = vshll.u32 %v10980_v1, 16  ;;  %v9432_v1 = vld [vmem:[%s11583_s2 + $0x160] sm:$0xff]  }
 0x464   : > { %8480 = vmatprep.subr.bf16.mxu1 %v9427_v35 }
 0x465   : > { %v4968_v12 = vrot.slane %v4966_v29, 3  ;;  %v11371_v29 = vld [vmem:[#allocation3 + $0x1c] sm:$0xff]  }
 0x467   : > { %8481 = vmatpush3.bf16.msra.mxu1 %v9427_v35  ;;  %v4960_v35 = vor.u32 %v4959_v26, %v4956_v4  ;;  %v4969_v61 = vor.u32 %v4968_v12, %v4965_v63  ;;  %v11377_v63 = vld [vmem:[#allocation3 + $0x24] sm:$0xff]  }
 0x468   : > { %8502 = vmatprep.subr.bf16.mxu1 %v9428_v54  ;;  %v9467_v12 = vld [vmem:[%s11583_s2 + $0x200] sm:$0xff]  }
 0x469   : > { %v4961_v24 = vsel %vm11643_vm7, %v4951_v5, %v4960_v35  ;;  %v4970_v55 = vsel %vm11644_vm0, %v4960_v35, %v4969_v61  ;;  %v11382_v35 = vld [vmem:[#allocation3 + $0x2c] sm:$0xff]   ;;  %vm11659_vm7 = vcmask 1045504  }
 0x46a   : > { %8463 = vmatmul.mubr.bf16.gmra.mrb[108].mxu1 %v4687_v53  ;;  %v9437_v53 = vld [vmem:[%s11583_s2 + $0x178] sm:$0xff]   ;;  %v5815_v33 = vshll.u32 %v11382_v35, 16  ;;  %v5819_v27 = vshrl.u32 %v11382_v35, 16  ;;  %vm11660_vm0 = vmmov %vm11659_vm7 }
 0x46b   : > { %8482 = vmatprep.mubr.bf16.mxu1 %v4916_v23  ;;  %vm11663_vm10 = vmmov %vm11660_vm0 }
 0x472   : > { %8483 = vmatmul.mubr.bf16.vlgmr.msra.gmra.mrb[92].mxu1 %v4925_v47  ;;  %v9453_v47 = vld [vmem:[%s11583_s2 + $0x1d0] sm:$0xff]  }
 0x473   : > { %8486 = vmatprep.mubr.bf16.mxu1 %v4934_v42  ;;  %8503 = vmatpush3.bf16.msra.mxu1 %v9428_v54  ;;  %v4974_v54 = vrot.slane %v4972_v8, 2  ;;  %v5700_v42 = vld [vmem:[#allocation3 + $0x14] sm:$0xf]  ;;  %v9462_v8 = vld [vmem:[#allocation3 + $0x5c] sm:$0xff]  }
 0x474   : > { %8504 = vmatprep.subr.bf16.mxu1 %v9429_v22  ;;  %v7165_v28 = vcombine.low %v5700_v42, %v11365_v3 }
 0x475   : > { %v4978_v41 = vor.u32 %v4977_v31, %v4974_v54  ;;  %v5803_v54 = vshrl.u32 %v11371_v29, 16  ;;  %v5811_v31 = vshrl.u32 %v11377_v63, 16 }
 0x476   : > { %v5794_v5 = vshll.u32 %v7165_v28, 16  ;;  %v5792_v26 = vshrl.u32 %v7165_v28, 16 }
 0x477   : > { %8505 = vmatpush3.bf16.msra.mxu1 %v9429_v22  ;;  %v4979_v23 = vsel %vm11645_vm8, %v4969_v61, %v4978_v41  ;;  %v4988_v62 = vsel %vm11646_vm9, %v4978_v41, %v4987_v48  ;;  %v9449_v22 = vld [vmem:[#allocation3 + $0x24] sm:$0xff]   ;;  %v5807_v61 = vshll.u32 %v11377_v63, 16  ;;  %vm11661_vm8 = vmmov %vm11660_vm0 }
 0x478   : > { %8506 = vmatprep.subr.bf16.mxu1 %v9430_v39  ;;  %v5796_v4 = vrot.slane %v5794_v5, 1  ;;  %vm11662_vm9 = vmmov %vm11660_vm0 }
 0x47a   : > { %8487 = vmatmul.mubr.bf16.gmra.mrb[96].mxu1 %v4943_v56  ;;  %v9459_v56 = vld [vmem:[#allocation3 + $0x54] sm:$0xff]  }
 0x47b   : > { %8490 = vmatprep.mubr.bf16.mxu1 %v4952_v44  ;;  %8507 = vmatpush3.bf16.msra.mxu1 %v9430_v39  ;;  %v9456_v39 = vld [vmem:[#allocation3 + $0x44] sm:$0xff]   ;;  %v5799_v44 = vshll.u32 %v11371_v29, 16 }
 0x47c   : > { %8508 = vmatprep.subr.bf16.mxu1 %v9431_v25 }
 0x47d   : > { %v5801_v19 = vrot.slane %v5799_v44, 1 }
 0x47f   : > { %8509 = vmatpush3.bf16.msra.mxu1 %v9431_v25  ;;  %v9465_v25 = vld [vmem:[%s11583_s2 + $0x1f8] sm:$0xff]   ;;  %v5805_v58 = vor.u32 %v5803_v54, %v5801_v19 }
 0x480   : > { %8510 = vmatprep.subr.bf16.mxu1 %v9432_v1 }
 0x482   : > { %8491 = vmatmul.mubr.bf16.gmra.mrb[100].mxu1 %v4961_v24  ;;  %v11387_v24 = vld [vmem:[#allocation3 + $0x34] sm:$0xff]  }
 0x483   : > { %8494 = vmatprep.mubr.bf16.mxu1 %v4970_v55  ;;  %8511 = vmatpush3.bf16.msra.mxu1 %v9432_v1  ;;  %v5797_v1 = vor.u32 %v5796_v4, %v5792_v26  ;;  %v11391_v55 = vld [vmem:[#allocation3 + $0x3c] sm:$0xff]   ;;  %v5823_v41 = vshll.u32 %v11387_v24, 16 }
 0x484   : > { %8512 = vmatprep.subr.bf16.mxu1 %v9433_v57  ;;  %v5831_v48 = vshll.u32 %v11391_v55, 16  ;;  %v9483_v4 = vld [vmem:[%s11583_s2 + $0x238] sm:$0xff]  }
 0x485   : > { %v5802_v7 = vsel %vm539_vm3, %v5797_v1, %v5801_v19 }
 0x487   : > { %8513 = vmatpush3.bf16.msra.mxu1 %v9433_v57  ;;  %v5809_v57 = vrot.slane %v5807_v61, 1 }
 0x488   : > { %8514 = vmatprep.subr.bf16.mxu1 %v9434_v43 }
 0x489   : > { %v5813_v49 = vor.u32 %v5811_v31, %v5809_v57  ;;  %v5810_v36 = vsel %vm539_vm3, %v5805_v58, %v5809_v57  ;;  %v6090_v31 = vrot.slane %v11377_v63, 1  ;;  %v6098_v63 = vrot.slane %v11403_v34, 1 }
 0x48a   : > { %8495 = vmatmul.mubr.bf16.gmra.mrb[104].mxu1 %v4979_v23  ;;  %v9472_v23 = vld [vmem:[%s11583_s2 + $0x210] sm:$0xff]  }
 0x48b   : > { %8498 = vmatprep.mubr.bf16.mxu1 %v4988_v62  ;;  %8515 = vmatpush3.bf16.msra.mxu1 %v9434_v43  ;;  %v9469_v43 = vld [vmem:[%s11583_s2 + $0x208] sm:$0xff]   ;;  %v5827_v62 = vshrl.u32 %v11387_v24, 16 }
 0x48c   : > { %8516 = vmatprep.subr.bf16.mxu1 %v9437_v53 }
 0x48f   : > { %8517 = vmatpush3.bf16.msra.mxu1 %v9437_v53  ;;  %v5825_v53 = vrot.slane %v5823_v41, 1 }
 0x490   : > { %8538 = vmatprep.subr.bf16.mxu1 %v9438_v9 }
 0x492   : > { %8499 = vmatmul.mubr.bf16.gmra.mrb[108].mxu1 %v4997_v40 }
 0x493   : > { %8518 = vmatprep.mubr.bf16.mxu1 %v11074_v10  ;;  %v9441_v10 = vld [vmem:[%s11583_s2 + $0x198] sm:$0xff]  }
 0x49a   : > { %8519 = vmatmul.mubr.bf16.vlgmr.msra.gmra.mrb[92].mxu1 %v11079_v2  ;;  %v9443_v2 = vld [vmem:[%s11583_s2 + $0x1a8] sm:$0xff]  }
 0x49b   : > { %8522 = vmatprep.mubr.bf16.mxu1 %v10929_v50  ;;  %8539 = vmatpush3.bf16.msra.mxu1 %v9438_v9  ;;  %v9442_v50 = vld [vmem:[%s11583_s2 + $0x1a0] sm:$0xff]   ;;  %v5833_v9 = vrot.slane %v5831_v48, 1 }
 0x49c   : > { %8540 = vmatprep.subr.bf16.mxu1 %v9439_v16 }
 0x49f   : > { %8541 = vmatpush3.bf16.msra.mxu1 %v9439_v16  ;;  %v5829_v16 = vor.u32 %v5827_v62, %v5825_v53  ;;  %v7351_v62 = vld [vmem:[%s9640_s28 + $0x20] sm:$0xff]  }
 0x4a0   : > { %8542 = vmatprep.subr.bf16.mxu1 %v9440_v18 }
 0x4a2   : > { %8523 = vmatmul.mubr.bf16.gmra.mrb[96].mxu1 %v10992_v60  ;;  %v9444_v60 = vld [vmem:[%s11583_s2 + $0x1b0] sm:$0xff]  }
 0x4a3   : > { %8526 = vmatprep.mubr.bf16.mxu1 %v10995_v11  ;;  %8543 = vmatpush3.bf16.msra.mxu1 %v9440_v18  ;;  %v9446_v11 = vld [vmem:[%s11583_s2 + $0x1b8] sm:$0xff]  }
 0x4a4   : > { %8544 = vmatprep.subr.bf16.mxu1 %v9441_v10  ;;  %v9473_v18 = vld [vmem:[%s11583_s2 + $0x218] sm:$0xff]  }
 0x4a7   : > { %8545 = vmatpush3.bf16.msra.mxu1 %v9441_v10  ;;  %v5839_v10 = vshll.u32 %v11403_v34, 16 }
 0x4a8   : > { %8546 = vmatprep.subr.bf16.mxu1 %v9442_v50 }
 0x4aa   : > { %8527 = vmatmul.mubr.bf16.gmra.mrb[100].mxu1 %v10998_v17  ;;  %v9448_v17 = vld [vmem:[%s11583_s2 + $0x1c0] sm:$0xff]  }
 0x4ab   : > { %8530 = vmatprep.mubr.bf16.mxu1 %v11007_v15  ;;  %8547 = vmatpush3.bf16.msra.mxu1 %v9442_v50  ;;  %v5229_v15 = vrot.slane %v11296_v59, 3  ;;  %v5817_v59 = vrot.slane %v5815_v33, 1  ;;  %v6088_v33 = vrot.slane %v11371_v29, 1  ;;  %v6096_v29 = vrot.slane %v11391_v55, 1 }
 0x4ac   : > { %8548 = vmatprep.subr.bf16.mxu1 %v9443_v2 }
 0x4ad   : > { %v5230_v21 = vsel %vm11648_vm11, %v5227_v52, %v5229_v15  ;;  %v9454_v52 = vld [vmem:[%s11583_s2 + $0x1d8] sm:$0xff]   ;;  %v5818_v51 = vsel %vm539_vm3, %v5813_v49, %v5817_v59  ;;  %v5821_v40 = vor.u32 %v5819_v27, %v5817_v59  ;;  %v11419_v15 = vld [vmem:[#allocation3 + $0x54] sm:$0xff]   ;;  %v6091_v59 = vsel %vm11650_vm13, %v6088_v33, %v6090_v31  ;;  %vm11664_vm11 = vmmov %vm11660_vm0 }
 0x4ae   : > { %v5859_v28 = vshrl.u32 %v11419_v15, 16  ;;  %v6094_v49 = vrot.slane %v11387_v24, 1  ;;  %v7350_v27 = vld [vmem:[%s9640_s28 + $0x18] sm:$0xff]   ;;  %vm11666_vm13 = vmmov %vm11660_vm0 }
 0x4af   : > { %8549 = vmatpush3.bf16.msra.mxu1 %v9443_v2  ;;  %v5826_v50 = vsel %vm539_vm3, %v5821_v40, %v5825_v53  ;;  %v5834_v2 = vsel %vm539_vm3, %v5829_v16, %v5833_v9  ;;  %v7309_v40 = vunpack.c.l.bf16 %v7351_v62  ;;  %v7305_v16 = vunpack.c.l.bf16 %v7350_v27 }
 0x4b0   : > { %8550 = vmatprep.subr.bf16.mxu1 %v9444_v60 }
 0x4b2   : > { %8531 = vmatmul.mubr.bf16.gmra.mrb[104].mxu1 %v11016_v13  ;;  %v9447_v13 = vld [vmem:[#allocation3 + $0x1c] sm:$0xff]  }
 0x4b3   : > { %8534 = vmatprep.mubr.bf16.mxu1 %v11021_v20  ;;  %8551 = vmatpush3.bf16.msra.mxu1 %v9444_v60  ;;  %v9450_v20 = vld [vmem:[%s11583_s2 + $0x1c8] sm:$0xff]   ;;  %v5847_v60 = vshll.u32 %v11407_v38, 16 }
 0x4b4   : > { %8552 = vmatprep.subr.bf16.mxu1 %v9446_v11 }
 0x4b7   : > { %8553 = vmatpush3.bf16.msra.mxu1 %v9446_v11  ;;  %v5841_v11 = vrot.slane %v5839_v10, 1  ;;  %v7310_v10 = vunpack.c.h.bf16 %v7351_v62 }
 0x4b8   : > { %8574 = vmatprep.subr.bf16.mxu1 %v9448_v17 }
 0x4ba   : > { %8535 = vmatmul.mubr.bf16.gmra.mrb[108].mxu1 %v5230_v21  ;;  %v5835_v21 = vshrl.u32 %v11391_v55, 16  ;;  %v6102_v55 = vrot.slane %v11419_v15, 1 }
 0x4bb   : > { %8554 = vmatprep.mubr.bf16.mxu1 %v9445_v0  ;;  %v5843_v0 = vshrl.u32 %v11403_v34, 16 }
 0x4c2   : > { %8555 = vmatmul.mubr.bf16.vlgmr.msra.gmra.mrb[92].mxu1 %v9447_v13  ;;  %v5849_v13 = vrot.slane %v5847_v60, 1  ;;  %v6418_v60 = vrot.slane %v7309_v40, 2 }
 0x4c3   : > { %8558 = vmatprep.mubr.bf16.mxu1 %v9449_v22  ;;  %8575 = vmatpush3.bf16.msra.mxu1 %v9448_v17  ;;  %v9476_v17 = vld [vmem:[%s11583_s2 + $0x220] sm:$0xff]   ;;  %v5837_v22 = vor.u32 %v5835_v21, %v5833_v9  ;;  %v6299_v9 = vld [vmem:[%s9640_s28 + $0x14] sm:$0xe]  ;;  %v6414_v21 = vrot.slane %v7305_v16, 2 }
 0x4c4   : > { %8576 = vmatprep.subr.bf16.mxu1 %v9450_v20 }
 0x4c7   : > { %8577 = vmatpush3.bf16.msra.mxu1 %v9450_v20  ;;  %v11423_v20 = vld [vmem:[#allocation3 + $0x5c] sm:$0xff]  }
 0x4c8   : > { %8578 = vmatprep.subr.bf16.mxu1 %v9453_v47  ;;  %v5863_v42 = vshll.u32 %v11423_v20, 16 }
 0x4ca   : > { %8559 = vmatmul.mubr.bf16.gmra.mrb[96].mxu1 %v9451_v46  ;;  %v5855_v46 = vshll.u32 %v11419_v15, 16 }
 0x4cb   : > { %8562 = vmatprep.mubr.bf16.mxu1 %v9452_v32  ;;  %8579 = vmatpush3.bf16.msra.mxu1 %v9453_v47  ;;  %v5845_v47 = vor.u32 %v5843_v0, %v5841_v11  ;;  %v5842_v32 = vsel %vm539_vm3, %v5837_v22, %v5841_v11  ;;  %v7352_v11 = vld [vmem:[%s9640_s28 + $0x28] sm:$0xff]  }
 0x4cc   : > { %8580 = vmatprep.subr.bf16.mxu1 %v9454_v52 }
 0x4cf   : > { %8581 = vmatpush3.bf16.msra.mxu1 %v9454_v52  ;;  %v9479_v52 = vld [vmem:[%s11583_s2 + $0x228] sm:$0xff]  }
 0x4d0   : > { %8582 = vmatprep.subr.bf16.mxu1 %v9457_v6 }
 0x4d2   : > { %8563 = vmatmul.mubr.bf16.gmra.mrb[100].mxu1 %v9455_v45  ;;  %v5857_v45 = vrot.slane %v5855_v46, 1  ;;  %v7314_v46 = vunpack.c.h.bf16 %v7352_v11 }
 0x4d3   : > { %8566 = vmatprep.mubr.bf16.mxu1 %v9456_v39  ;;  %8583 = vmatpush3.bf16.msra.mxu1 %v9457_v6  ;;  %v5850_v6 = vsel %vm539_vm3, %v5845_v47, %v5849_v13  ;;  %v5851_v39 = vshrl.u32 %v11407_v38, 16 }
 0x4d4   : > { %8584 = vmatprep.subr.bf16.mxu1 %v9460_v14 }
 0x4d5   : > { %v5853_v5 = vor.u32 %v5851_v39, %v5849_v13  ;;  %v11477_v13 = vld [vmem:[%s11584_s3 + $0x3] ss:$0 sm:$0xff] }
 0x4d7   : > { %8585 = vmatpush3.bf16.msra.mxu1 %v9460_v14  ;;  %v9480_v14 = vld [vmem:[%s11583_s2 + $0x230] sm:$0xff]   ;;  %v5858_v26 = vsel %vm539_vm3, %v5853_v5, %v5857_v45  ;;  %v7313_v5 = vunpack.c.l.bf16 %v7352_v11 }
 0x4d8   : > { %8586 = vmatprep.subr.bf16.mxu1 %v9461_v30 }
 0x4da   : > { %8567 = vmatmul.mubr.bf16.gmra.mrb[104].mxu1 %v9458_v37  ;;  %v9481_v37 = vld [vmem:[#allocation3 + $0x64] ss:$0 sps:$4 sm:$0x11]  }
 0x4db   : > { %8570 = vmatprep.mubr.bf16.mxu1 %v9459_v56  ;;  %8587 = vmatpush3.bf16.msra.mxu1 %v9461_v30  ;;  %v5865_v30 = vrot.slane %v5863_v42, 1  ;;  %v5861_v56 = vor.u32 %v5859_v28, %v5857_v45  ;;  %v5871_v44 = vshll.u32 %v9481_v37, 16 }
 0x4dc   : > { %8588 = vmatprep.subr.bf16.mxu1 %v9465_v25 }
 0x4dd   : > { %v5873_v61 = vrot.slane %v5871_v44, 1 }
 0x4df   : > { %8589 = vmatpush3.bf16.msra.mxu1 %v9465_v25  ;;  %v6066_v25 = vld [vmem:[#allocation3 + $0x14] sm:$0xe] }
 0x4e0   : > { %8610 = vmatprep.subr.bf16.mxu1 %v9467_v12  ;;  %v7200_v1 = vcombine.low %v6066_v25, %v11365_v3  ;;  %v6092_v3 = vrot.slane %v11382_v35, 1  ;;  %v6100_v35 = vrot.slane %v11407_v38, 1  ;;  %v7306_v38 = vunpack.c.h.bf16 %v7350_v27 }
 0x4e2   : > { %8571 = vmatmul.mubr.bf16.gmra.mrb[108].mxu1 %v9462_v8  ;;  %v5867_v8 = vshrl.u32 %v11423_v20, 16  ;;  %v6093_v58 = vsel %vm11651_vm14, %v6090_v31, %v6092_v3  ;;  %vm11667_vm14 = vmmov %vm11660_vm0 }
 0x4e3   : > { %8590 = vmatprep.mubr.bf16.mxu1 %v5802_v7  ;;  %v6087_v7 = vrot.slane %v7200_v1, 1 }
 0x4e4   : > { %v5869_v19 = vor.u32 %v5867_v8, %v5865_v30 }
 0x4e5   : > { %v6089_v54 = vsel %vm11649_vm12, %v6087_v7, %v6088_v33 }
 0x4e6   : > { %v5874_v57 = vsel %vm539_vm3, %v5869_v19, %v5873_v61  ;;  %v7354_v61 = vld [vmem:[%s9640_s28 + $0x38] sm:$0xff]  }
 0x4ea   : > { %8591 = vmatmul.mubr.bf16.vlgmr.msra.gmra.mrb[92].mxu1 %v5810_v36 }
 0x4eb   : > { %8594 = vmatprep.mubr.bf16.mxu1 %v5818_v51  ;;  %8611 = vmatpush3.bf16.msra.mxu1 %v9467_v12  ;;  %v5866_v12 = vsel %vm539_vm3, %v5861_v56, %v5865_v30  ;;  %vm11653_vm3 = vmmov %vm11649_vm12  ;;  %v6104_v51 = vrot.slane %v11423_v20, 1  ;;  %v6420_v20 = vrot.slane %v7310_v10, 2 }
 0x4ec   : > { %8612 = vmatprep.subr.bf16.mxu1 %v9469_v43  ;;  %v6097_v41 = vsel %vm11653_vm3, %v6094_v49, %v6096_v29  ;;  %vm11654_vm2 = vmmov %vm11653_vm3 }
 0x4ed   : > { %v6099_v36 = vsel %vm11654_vm2, %v6096_v29, %v6098_v63  ;;  %vm11655_vm4 = vmmov %vm11654_vm2  ;;  %v6421_v25 = vsel %vm11662_vm9, %v6418_v60, %v6420_v20 }
 0x4ee   : > { %v6101_v24 = vsel %vm11655_vm4, %v6098_v63, %v6100_v35  ;;  %vm11656_vm1 = vmmov %vm11654_vm2  ;;  %v7322_v63 = vunpack.c.h.bf16 %v7354_v61 }
 0x4ef   : > { %8613 = vmatpush3.bf16.msra.mxu1 %v9469_v43  ;;  %v6095_v43 = vsel %vm11652_vm15, %v6092_v3, %v6094_v49  ;;  %v6103_v48 = vsel %vm11656_vm1, %v6100_v35, %v6102_v55  ;;  %vm11657_vm5 = vmmov %vm11656_vm1 }
 0x4f0   : > { %8614 = vmatprep.subr.bf16.mxu1 %v9472_v23  ;;  %v6105_v53 = vsel %vm11657_vm5, %v6102_v55, %v6104_v51  ;;  %vm11658_vm6 = vmmov %vm11656_vm1  ;;  %v6432_v10 = vrot.slane %v7322_v63, 2 }
 0x4f1   : > { %vm11665_vm12 = vmmov %vm11660_vm0 }
 0x4f2   : > { %8595 = vmatmul.mubr.bf16.gmra.mrb[96].mxu1 %v5826_v50  ;;  %v11470_v50 = vld [vmem:[%s11584_s3 + $0x2] ss:$0 sm:$0xff]  ;;  %vm11668_vm15 = vmmov %vm11660_vm0 }
 0x4f3   : > { %8598 = vmatprep.mubr.bf16.mxu1 %v5834_v2  ;;  %8615 = vmatpush3.bf16.msra.mxu1 %v9472_v23  ;;  %v6106_v23 = vrot.slane %v9481_v37, 1  ;;  %v6416_v2 = vrot.slane %v7306_v38, 2  ;;  %vm11669_vm3 = vmmov %vm11660_vm0 }
 0x4f4   : > { %8616 = vmatprep.subr.bf16.mxu1 %v9473_v18  ;;  %vm11670_vm2 = vmmov %vm11660_vm0 }
 0x4f5   : > { %v6107_v34 = vsel %vm11658_vm6, %v6104_v51, %v6106_v23  ;;  %v6417_v45 = vsel %vm11660_vm0, %v6414_v21, %v6416_v2  ;;  %v7321_v51 = vunpack.c.l.bf16 %v7354_v61  ;;  %vm11671_vm4 = vmmov %vm11660_vm0 }
 0x4f6   : > { %vm11672_vm1 = vmmov %vm11660_vm0 }
 0x4f7   : > { %8617 = vmatpush3.bf16.msra.mxu1 %v9473_v18  ;;  %v6320_v18 = vunpack.c.l.bf16 %v6299_v9  ;;  %vm11673_vm5 = vmmov %vm11660_vm0 }
 0x4f8   : > { %8618 = vmatprep.subr.bf16.mxu1 %v9476_v17  ;;  %vm11674_vm6 = vmmov %vm11660_vm0 }
 0x4f9   : > { %v6413_v15 = vrot.slane %v6320_v18, 2  ;;  %vm11677_vm9 = vmmov %vm11660_vm0 }
 0x4fa   : > { %8599 = vmatmul.mubr.bf16.gmra.mrb[100].mxu1 %v5842_v32  ;;  %v6419_v32 = vsel %vm11659_vm7, %v6416_v2, %v6418_v60  ;;  %vm11675_vm7 = vmmov %vm11660_vm0 }
 0x4fb   : > { %8602 = vmatprep.mubr.bf16.mxu1 %v5850_v6  ;;  %8619 = vmatpush3.bf16.msra.mxu1 %v9476_v17  ;;  %v7353_v17 = vld [vmem:[%s9640_s28 + $0x30] sm:$0xff]   ;;  %v6415_v39 = vsel %vm11661_vm8, %v6413_v15, %v6414_v21  ;;  %v7356_v15 = vld [vmem:[%s9640_s28 + $0x48] sm:$0xff]   ;;  %vm11676_vm8 = vmmov %vm11660_vm0 }
 0x4fc   : > { %8620 = vmatprep.subr.bf16.mxu1 %v9479_v52  ;;  %v7357_v21 = vld [vmem:[%s9640_s28 + $0x50] sm:$0xff]  }
 0x4ff   : > { %8621 = vmatpush3.bf16.msra.mxu1 %v9479_v52  ;;  %v7317_v52 = vunpack.c.l.bf16 %v7353_v17 }
 0x500   : > { %8622 = vmatprep.subr.bf16.mxu1 %v9480_v14 }
 0x501   : > { %v6426_v1 = vrot.slane %v7317_v52, 2 }
 0x502   : > { %8603 = vmatmul.mubr.bf16.gmra.mrb[104].mxu1 %v5858_v26 }
 0x503   : > { %8606 = vmatprep.mubr.bf16.mxu1 %v5866_v12  ;;  %8623 = vmatpush3.bf16.msra.mxu1 %v9480_v14  ;;  %v6424_v12 = vrot.slane %v7314_v46, 2 }
 0x504   : > { %8624 = vmatprep.subr.bf16.mxu1 %v9483_v4 }
 0x507   : > { %8625 = vmatpush3.bf16.msra.mxu1 %v9483_v4  ;;  %v7318_v4 = vunpack.c.h.bf16 %v7353_v17  ;;  %v6430_v17 = vrot.slane %v7321_v51, 2 }
 0x50a   : > { %8607 = vmatmul.mubr.bf16.gmra.mrb[108].mxu1 %v5874_v57  ;;  %v6422_v57 = vrot.slane %v7313_v5, 2 }
 0x50b   : > { %8626 = vmatprep.mubr.bf16.mxu1 %v6089_v54  ;;  %v7355_v54 = vld [vmem:[%s9640_s28 + $0x40] sm:$0xff]  }
 0x50c   : > { %v7325_v55 = vunpack.c.l.bf16 %v7355_v54  ;;  %v7326_v38 = vunpack.c.h.bf16 %v7355_v54  ;;  %v6425_v18 = vsel %vm11666_vm13, %v6422_v57, %v6424_v12 }
 0x50e   : > { %v6434_v11 = vrot.slane %v7325_v55, 2  ;;  %v6436_v52 = vrot.slane %v7326_v38, 2 }
 0x512   : > { %8627 = vmatmul.mubr.bf16.vlgmr.msra.gmra.mrb[92].mxu1 %v6091_v59 }
 0x513   : > { %8630 = vmatprep.mubr.bf16.mxu1 %v6093_v58  ;;  %v6428_v58 = vrot.slane %v7318_v4, 2 }
 0x515   : > { %v6429_v62 = vsel %vm11665_vm12, %v6426_v1, %v6428_v58  ;;  %v6431_v5 = vsel %vm11668_vm15, %v6428_v58, %v6430_v17 }
 0x51a   : > { %8631 = vmatmul.mubr.bf16.gmra.mrb[96].mxu1 %v6095_v43  ;;  %v6427_v43 = vsel %vm11663_vm10, %v6424_v12, %v6426_v1  ;;  %v6437_v1 = vsel %vm11670_vm2, %v6434_v11, %v6436_v52 }
 0x51b   : > { %8634 = vmatprep.mubr.bf16.mxu1 %v6097_v41 }
 0x522   : > { %8635 = vmatmul.mubr.bf16.gmra.mrb[100].mxu1 %v6099_v36 }
 0x523   : > { %8638 = vmatprep.mubr.bf16.mxu1 %v6101_v24 }
 0x52a   : > { %8639 = vmatmul.mubr.bf16.gmra.mrb[104].mxu1 %v6103_v48 }
 0x52b   : > { %8642 = vmatprep.mubr.bf16.mxu1 %v6105_v53  ;;  %v6423_v53 = vsel %vm11664_vm11, %v6420_v20, %v6422_v57 }
 0x532   : > { %8643 = vmatmul.mubr.bf16.gmra.mrb[108].mxu1 %v6107_v34 }
 0x5e5   : > { %v8628_v0 = vpop.f32.mrb[92].mxu1 }
 0x5e6   : > { %v6348_v22 = vmul.f32 %v8628_v0, %v11470_v50  ;;  %v6200_v47 = vpop.f32.mrb[93].mxu1 }
 0x5e7   : > { %v6346_v6 = vmul.f32 %v11470_v50, %v6200_v47  ;;  %v8629_v42 = vpop.f32.mrb[94].mxu1 }
 0x5e8   : > { %v6373_v14 = vadd.f32 %v11477_v13, %v6348_v22  ;;  %v6349_v28 = vmul.f32 %v8629_v42, %v11470_v50  ;;  %v6203_v30 = vpop.f32.mrb[95].mxu1 }
 0x5e9   : > { %v6371_v37 = vadd.f32 %v11477_v13, %v6346_v6  ;;  %v6347_v56 = vmul.f32 %v11470_v50, %v6203_v30 }
 0x5ea   : > { %v6476_v26 = vadd.f32 %v6419_v32, %v6373_v14  ;;  %v6374_v44 = vadd.f32 %v11477_v13, %v6349_v28  ;;  %v7333_v14 = vunpack.c.l.bf16 %v7357_v21  ;;  %v6435_v28 = vsel %vm11667_vm14, %v6432_v10, %v6434_v11 }
 0x5eb   : > { %v6474_v8 = vadd.f32 %v6415_v39, %v6371_v37  ;;  %v6372_v19 = vadd.f32 %v11477_v13, %v6347_v56 }
 0x5ec   : > { %v6496_v7 = vmax.f32 %v6476_v26, 0.0  ;;  %v6477_v33 = vadd.f32 %v6421_v25, %v6374_v44  ;;  %v6433_v26 = vsel %vm11669_vm3, %v6430_v17, %v6432_v10  ;;  %v7329_v44 = vunpack.c.l.bf16 %v7356_v15 }
 0x5ed   : > { %v6494_v31 = vmax.f32 %v6474_v8, 0.0  ;;  %v6475_v3 = vadd.f32 %v6417_v45, %v6372_v19  ;;  %v8632_v59 = vpop.f32.mrb[96].mxu1  ;;  %v7330_v45 = vunpack.c.h.bf16 %v7356_v15  ;;  %v7334_v19 = vunpack.c.h.bf16 %v7357_v21 }
 0x5ee   : > { %6516 = vst [vmem:[%s9617_s11 + $0x10] sm:$0xff] %v6496_v7  ;;  %v6497_v49 = vmax.f32 %v6477_v33, 0.0  ;;  %v6352_v29 = vmul.f32 %v8632_v59, %v11470_v50  ;;  %v6216_v41 = vpop.f32.mrb[97].mxu1  ;;  %v6442_v57 = vrot.slane %v7333_v14, 2  ;;  %v6438_v58 = vrot.slane %v7329_v44, 2 }
 0x5ef   : > { %6514 = vst [vmem:[%s9617_s11] sm:$0xff] %v6494_v31  ;;  %v6495_v35 = vmax.f32 %v6475_v3, 0.0  ;;  %v6350_v36 = vmul.f32 %v11470_v50, %v6216_v41  ;;  %v8633_v24 = vpop.f32.mrb[98].mxu1  ;;  %v6440_v33 = vrot.slane %v7330_v45, 2 }
 0x5f0   : > { %6517 = vst [vmem:[%s9617_s11 + $0x18] sm:$0xff] %v6497_v49  ;;  %v6377_v48 = vadd.f32 %v11477_v13, %v6352_v29  ;;  %v6353_v23 = vmul.f32 %v8633_v24, %v11470_v50  ;;  %v6219_v34 = vpop.f32.mrb[99].mxu1  ;;  %v7358_v49 = vld [vmem:[%s9640_s28 + $0x58] sm:$0xff]   ;;  %v6318_v29 = vld [vmem:[%s9640_s28 + $0x60] sm:$0xf]  ;;  %v6439_v38 = vsel %vm11672_vm1, %v6436_v52, %v6438_v58 }
 0x5f1   : > { %6515 = vst [vmem:[%s9617_s11 + $0x8] sm:$0xff] %v6495_v35  ;;  %v6375_v27 = vadd.f32 %v11477_v13, %v6350_v36  ;;  %v6351_v9 = vmul.f32 %v11470_v50, %v6219_v34  ;;  %v6444_v35 = vrot.slane %v7334_v19, 2  ;;  %v6443_v55 = vsel %vm11671_vm4, %v6440_v33, %v6442_v57 }
 0x5f2   : > { %v6480_v40 = vadd.f32 %v6427_v43, %v6377_v48  ;;  %v6378_v16 = vadd.f32 %v11477_v13, %v6353_v23  ;;  %v6319_v48 = vld [vmem:[%s9640_s28 + $0x64] sm:$0x1]  ;;  %v6441_v21 = vsel %vm11674_vm6, %v6438_v58, %v6440_v33 }
 0x5f3   : > { %v6478_v2 = vadd.f32 %v6423_v53, %v6375_v27  ;;  %v6376_v60 = vadd.f32 %v11477_v13, %v6351_v9  ;;  %v7338_v27 = vunpack.c.h.bf16 %v7358_v49  ;;  %v6340_v11 = vunpack.c.l.bf16 %v6319_v48 }
 0x5f4   : > { %v6500_v0 = vmax.f32 %v6480_v40, 0.0  ;;  %v6481_v20 = vadd.f32 %v6429_v62, %v6378_v16  ;;  %v6339_v62 = vunpack.c.l.bf16 %v6318_v29 }
 0x5f5   : > { %v6498_v22 = vmax.f32 %v6478_v2, 0.0  ;;  %v6479_v47 = vadd.f32 %v6425_v18, %v6376_v60  ;;  %v8636_v46 = vpop.f32.mrb[100].mxu1  ;;  %v7337_v18 = vunpack.c.l.bf16 %v7358_v49  ;;  %v6445_v2 = vsel %vm11673_vm5, %v6442_v57, %v6444_v35 }
 0x5f6   : > { %6520 = vst [vmem:[%s9617_s11 + $0x30] sm:$0xff] %v6500_v0  ;;  %v6501_v32 = vmax.f32 %v6481_v20, 0.0  ;;  %v6356_v6 = vmul.f32 %v8636_v46, %v11470_v50  ;;  %v6232_v42 = vpop.f32.mrb[101].mxu1  ;;  %v6452_v14 = vrot.slane %v6340_v11, 2 }
 0x5f7   : > { %6518 = vst [vmem:[%s9617_s11 + $0x20] sm:$0xff] %v6498_v22  ;;  %v6499_v39 = vmax.f32 %v6479_v47, 0.0  ;;  %v6354_v30 = vmul.f32 %v11470_v50, %v6232_v42  ;;  %v8637_v37 = vpop.f32.mrb[102].mxu1  ;;  %v6448_v22 = vrot.slane %v7338_v27, 2  ;;  %v6450_v47 = vrot.slane %v6339_v62, 2 }
 0x5f8   : > { %6521 = vst [vmem:[%s9617_s11 + $0x38] sm:$0xff] %v6501_v32  ;;  %v6381_v25 = vadd.f32 %v11477_v13, %v6356_v6  ;;  %v6357_v56 = vmul.f32 %v8637_v37, %v11470_v50  ;;  %v6235_v4 = vpop.f32.mrb[103].mxu1  ;;  %v6446_v32 = vrot.slane %v7337_v18, 2 }
 0x5f9   : > { %6519 = vst [vmem:[%s9617_s11 + $0x28] sm:$0xff] %v6499_v39  ;;  %v6379_v12 = vadd.f32 %v11477_v13, %v6354_v30  ;;  %v6355_v8 = vmul.f32 %v11470_v50, %v6235_v4  ;;  %v6451_v37 = vsel %vm11675_vm7, %v6448_v22, %v6450_v47 }
 0x5fa   : > { %v6484_v61 = vadd.f32 %v6435_v28, %v6381_v25  ;;  %v6382_v7 = vadd.f32 %v11477_v13, %v6357_v56  ;;  %v6449_v33 = vsel %vm11677_vm9, %v6446_v32, %v6448_v22 }
 0x5fb   : > { %v6482_v54 = vadd.f32 %v6431_v5, %v6379_v12  ;;  %v6380_v31 = vadd.f32 %v11477_v13, %v6355_v8  ;;  %v6453_v8 = vsel %vm11676_vm8, %v6450_v47, %v6452_v14 }
 0x5fc   : > { %v6504_v3 = vmax.f32 %v6484_v61, 0.0  ;;  %v6485_v59 = vadd.f32 %v6437_v1, %v6382_v7 }
 0x5fd   : > { %v6502_v43 = vmax.f32 %v6482_v54, 0.0  ;;  %v6483_v41 = vadd.f32 %v6433_v26, %v6380_v31  ;;  %v8640_v63 = vpop.f32.mrb[104].mxu1  ;;  %v6447_v26 = vsel %vm11660_vm0, %v6444_v35, %v6446_v32 }
 0x5fe   : > { %6524 = vst [vmem:[%s9617_s11 + $0x50] sm:$0xff] %v6504_v3  ;;  %v6505_v36 = vmax.f32 %v6485_v59, 0.0  ;;  %v6360_v24 = vmul.f32 %v8640_v63, %v11470_v50  ;;  %v6248_v51 = vpop.f32.mrb[105].mxu1 }
 0x5ff   : > { %6522 = vst [vmem:[%s9617_s11 + $0x40] sm:$0xff] %v6502_v43  ;;  %v6503_v53 = vmax.f32 %v6483_v41, 0.0  ;;  %v6358_v23 = vmul.f32 %v11470_v50, %v6248_v51  ;;  %v8641_v34 = vpop.f32.mrb[106].mxu1 }
 0x600   : > { %6525 = vst [vmem:[%s9617_s11 + $0x58] sm:$0xff] %v6505_v36  ;;  %v6385_v9 = vadd.f32 %v11477_v13, %v6360_v24  ;;  %v6361_v40 = vmul.f32 %v8641_v34, %v11470_v50  ;;  %v6251_v16 = vpop.f32.mrb[107].mxu1 }
 0x601   : > { %6523 = vst [vmem:[%s9617_s11 + $0x48] sm:$0xff] %v6503_v53  ;;  %v6383_v10 = vadd.f32 %v11477_v13, %v6358_v23  ;;  %v6359_v60 = vmul.f32 %v11470_v50, %v6251_v16 }
 0x602   : > { %v6488_v17 = vadd.f32 %v6443_v55, %v6385_v9  ;;  %v6386_v15 = vadd.f32 %v11477_v13, %v6361_v40 }
 0x603   : > { %v6486_v0 = vadd.f32 %v6439_v38, %v6383_v10  ;;  %v6384_v20 = vadd.f32 %v11477_v13, %v6359_v60 }
 0x604   : > { %v6508_v46 = vmax.f32 %v6488_v17, 0.0  ;;  %v6489_v52 = vadd.f32 %v6445_v2, %v6386_v15 }
 0x605   : > { %v6506_v6 = vmax.f32 %v6486_v0, 0.0  ;;  %v6487_v42 = vadd.f32 %v6441_v21, %v6384_v20  ;;  %v8644_v45 = vpop.f32.mrb[108].mxu1 }
 0x606   : > { %6528 = vst [vmem:[%s9617_s11 + $0x70] sm:$0xff] %v6508_v46  ;;  %v6509_v39 = vmax.f32 %v6489_v52, 0.0  ;;  %v6364_v28 = vmul.f32 %v8644_v45, %v11470_v50  ;;  %v6264_v30 = vpop.f32.mrb[109].mxu1 }
 0x607   : > { %6526 = vst [vmem:[%s9617_s11 + $0x60] sm:$0xff] %v6506_v6  ;;  %v6507_v5 = vmax.f32 %v6487_v42, 0.0  ;;  %v6362_v25 = vmul.f32 %v11470_v50, %v6264_v30  ;;  %v8645_v56 = vpop.f32.mrb[110].mxu1 }
 0x608   : > { %6529 = vst [vmem:[%s9617_s11 + $0x78] sm:$0xff] %v6509_v39  ;;  %v6389_v4 = vadd.f32 %v11477_v13, %v6364_v28  ;;  %v6365_v44 = vmul.f32 %v8645_v56, %v11470_v50  ;;  %v6267_v12 = vpop.f32.mrb[111].mxu1 }
 0x609   : > { %6527 = vst [vmem:[%s9617_s11 + $0x68] sm:$0xff] %v6507_v5  ;;  %v6387_v1 = vadd.f32 %v11477_v13, %v6362_v25  ;;  %v6363_v19 = vmul.f32 %v11470_v50, %v6267_v12 }
 0x60a   : > { %v6492_v61 = vadd.f32 %v6451_v37, %v6389_v4  ;;  %v6390_v7 = vadd.f32 %v11477_v13, %v6365_v44 }
 0x60b   : > { %v6490_v57 = vadd.f32 %v6447_v26, %v6387_v1  ;;  %v6388_v54 = vadd.f32 %v11477_v13, %v6363_v19 }
 0x60c   : > { %v6512_v31 = vmax.f32 %v6492_v61, 0.0  ;;  %v6493_v3 = vadd.f32 %v6453_v8, %v6390_v7 }
 0x60d   : > { %v6510_v59 = vmax.f32 %v6490_v57, 0.0  ;;  %v6491_v58 = vadd.f32 %v6449_v33, %v6388_v54 }
 0x60e   : > { %6532 = vst [vmem:[%s9617_s11 + $0x90] sm:$0xff] %v6512_v31  ;;  %v6513_v49 = vmax.f32 %v6493_v3, 0.0 }
 0x60f   : > { %6530 = vst [vmem:[%s9617_s11 + $0x80] sm:$0xff] %v6510_v59  ;;  %v6511_v29 = vmax.f32 %v6491_v58, 0.0 }
 0x610   : > { %6533 = vst [vmem:[%s9617_s11 + $0x98] sm:$0xff] %v6513_v49 }
 0x611   : > { %6531 = vst [vmem:[%s9617_s11 + $0x88] sm:$0xff] %v6511_v29 }
 0x612 PF: > { %s15_s22 = sadd.s32 1, %s9539_s22   ;;  %s11678_s18 = smov %s9531_s20 }
 0x613   : > { %p12_p11 = scmp.ge.s32.totalorder %s15_s22, 6   ;;  %s11679_s19 = smov %s9535_s21 }
 0x614   : > { %s11680_s20 = smov %s11683_s23  ;;  %s11681_s21 = smov %s11687_s24 }
 0x615   :  { %14 = sbr.rel (!%p12_p11) target bundleno = 3 (0x3), region = 180 }
 0x61c   :  { %6570 = vsyncmov [#allocation4] }
 0x61f   :  { %s6571_s11 = vpop.sfrf %6570 }
 0x620   :  { %p7213_p12 = scmp.ne.s32.totalorder %s6571_s11, 0 }
 0x622   :  { %6575 = shalt.err (%p7213_p12)  }
 0x623   :  { %6577 = vsyncmov [#allocation4 + $0x1] }
 0x626   :  { %s6578_s28 = vpop.sfrf %6577 }
 0x627   :  { %p7214_p13 = scmp.ne.s32.totalorder %s6578_s28, 0 }
 0x629   :  { %6582 = shalt.err (%p7214_p13)  }

</bundles_post_ra>
